<compile_context>
chip_gen: v5e
topology: v5e:2x2
jax: 0.10.0
libtpu: 0.0.40
codegen_flags: <defaults>
</compile_context>

<pallas_src>
import functools

import jax
import jax.numpy as jnp
from jax.experimental import pallas as pl
from jax.experimental.pallas import tpu as pltpu


def _attention_kernel(x_ref, wqkv_ref, wo_ref, bo_ref, o_ref, *, heads, dim_head):
    """Grid = (batch,).  One full multi-head attention per step.

    x_ref   : (1, c, n)      bf16 input tokens, channels-major
    wqkv_ref: (3*hidden, c)  bf16 fused q/k/v 1x1-conv weight (q rows pre-scaled)
    wo_ref  : (c, hidden)    bf16 output 1x1-conv weight
    bo_ref  : (c, 1)         f32 output 1x1-conv bias
    o_ref   : (1, c, n)      f32 output, channels-major
    """
    hidden = heads * dim_head
    x = x_ref[0]                                                 # (c, n) bf16

    # Fused QKV projection: (3*hidden, c) @ (c, n) -> (3*hidden, n), f32 accumulate.
    qkv = jax.lax.dot_general(
        wqkv_ref[...], x, (((1,), (0,)), ((), ())),
        preferred_element_type=jnp.float32)

    outs = []
    for hi in range(heads):                                      # static unroll
        lo = hi * dim_head
        q = qkv[lo:lo + dim_head]                                # (dh, n) f32 (pre-scaled)
        k = qkv[hidden + lo:hidden + lo + dim_head]              # (dh, n)
        v = qkv[2 * hidden + lo:2 * hidden + lo + dim_head]      # (dh, n)

        # sim^T[j, i] = <k_j, q_i>   (keys on sublanes, queries on lanes)
        sim_t = jax.lax.dot_general(
            k.astype(jnp.bfloat16), q.astype(jnp.bfloat16),
            (((0,), (0,)), ((), ())),
            preferred_element_type=jnp.float32)                  # (n, n) f32

        # Softmax over keys (axis 0); elementwise math stays in f32.
        sim_t = sim_t - jnp.max(sim_t, axis=0, keepdims=True)
        p = jnp.exp(sim_t)
        attn_t = p * pl.reciprocal(jnp.sum(p, axis=0, keepdims=True), approx=True)

        # out_h[d, i] = sum_j v[d, j] * attn[i, j]  ->  (dh, n)
        outs.append(jax.lax.dot_general(
            v.astype(jnp.bfloat16), attn_t.astype(jnp.bfloat16),
            (((1,), (0,)), ((), ())),
            preferred_element_type=jnp.float32))

    out_all = jnp.concatenate(outs, axis=0).astype(jnp.bfloat16)  # (hidden, n)

    # Output projection: (c, hidden) @ (hidden, n) -> (c, n), plus bias.
    y = jax.lax.dot_general(
        wo_ref[...], out_all, (((1,), (0,)), ((), ())),
        preferred_element_type=jnp.float32)
    o_ref[0] = (y + bo_ref[...]).astype(o_ref.dtype)


def attention_pallas(x_nchw, w_qkv, w_out, b_out, *, heads, dim_head):
    """x_nchw: (b, c, h, w) f32; w_qkv: (3*heads*dim_head, c); w_out: (c, heads*dim_head); b_out: (c,)."""
    b, c, h, w = x_nchw.shape
    n = h * w
    hidden = heads * dim_head
    scale = dim_head ** (-0.5)

    # Free reshape (contiguous) -- no wrapper transpose. bf16 operands for the MXU.
    x_cn = x_nchw.reshape(b, c, n).astype(jnp.bfloat16)

    # Fold 1/sqrt(dim_head) into the q rows of the fused QKV weight.
    wqkv = w_qkv.at[:hidden].multiply(scale).astype(jnp.bfloat16)   # (3*hidden, c)
    wo = w_out.astype(jnp.bfloat16)                                 # (c, hidden)
    bo = b_out.reshape(c, 1).astype(jnp.float32)                    # (c, 1)

    kernel = functools.partial(_attention_kernel, heads=heads, dim_head=dim_head)

    out_cn = pl.pallas_call(
        kernel,
        out_shape=jax.ShapeDtypeStruct((b, c, n), jnp.float32),
        grid_spec=pltpu.PrefetchScalarGridSpec(
            num_scalar_prefetch=0,
            grid=(b,),
            in_specs=[
                pl.BlockSpec((1, c, n), lambda bi: (bi, 0, 0)),       # x (per batch)
                pl.BlockSpec((3 * hidden, c), lambda bi: (0, 0)),     # fused Wqkv
                pl.BlockSpec((c, hidden), lambda bi: (0, 0)),         # Wo
                pl.BlockSpec((c, 1), lambda bi: (0, 0)),              # bias
            ],
            out_specs=pl.BlockSpec((1, c, n), lambda bi: (bi, 0, 0)),
        ),
        compiler_params=pltpu.CompilerParams(
            dimension_semantics=("parallel",)),
    )(x_cn, wqkv, wo, bo)

    # (b, c, n) -> (b, c, h, w): free reshape, no transpose needed.
    return out_cn.reshape(b, c, h, w)


def attention_reference(x, w_qkv, w_out, b_out, *, heads, dim_head):
    """Pure-JAX f32 mirror of the PyTorch forward (for verification)."""
    b, c, h, w = x.shape
    n = h * w
    hidden = heads * dim_head
    scale = dim_head ** (-0.5)

    qkv = jnp.einsum('bchw,oc->bohw', x, w_qkv)            # (b, 3*hidden, h, w)
    q, k, v = jnp.split(qkv, 3, axis=1)
    q, k, v = (t.reshape(b, heads, dim_head, n) for t in (q, k, v))
    q = q * scale
    sim = jnp.einsum('bhdi,bhdj->bhij', q, k)
    sim = sim - jnp.max(sim, axis=-1, keepdims=True)
    attn = jax.nn.softmax(sim, axis=-1)
    out = jnp.einsum('bhij,bhdj->bhid', attn, v)           # (b, heads, n, dh)
    out = jnp.transpose(out, (0, 1, 3, 2)).reshape(b, hidden, h, w)
    y = jnp.einsum('bchw,oc->bohw', out, w_out) + b_out[None, :, None, None]
    return y


if __name__ == "__main__":
    # Shapes consistent with the module defaults: dim=32, heads=4, dim_head=32.
    # Spatial 16x16 -> n=256 so the kernel's output store is lane-dense.
    B, DIM, H, W = 2, 32, 16, 16
    HEADS, DIM_HEAD = 4, 32
    HIDDEN = HEADS * DIM_HEAD

    key = jax.random.PRNGKey(0)
    kx, kqkv, kwo, kbo = jax.random.split(key, 4)

    x = jax.random.normal(kx, (B, DIM, H, W), dtype=jnp.float32)
    # nn.Conv2d(dim, hidden*3, 1, bias=False).weight -> (3*hidden, dim, 1, 1); squeezed to 2D.
    w_qkv = jax.random.normal(kqkv, (3 * HIDDEN, DIM), dtype=jnp.float32) * 0.05
    # nn.Conv2d(hidden, dim, 1).weight -> (dim, hidden, 1, 1); bias -> (dim,).
    w_out = jax.random.normal(kwo, (DIM, HIDDEN), dtype=jnp.float32) * 0.05
    b_out = jax.random.normal(kbo, (DIM,), dtype=jnp.float32) * 0.05

    y = attention_pallas(x, w_qkv, w_out, b_out, heads=HEADS, dim_head=DIM_HEAD)
    y = jax.block_until_ready(y)

    y_ref = attention_reference(x, w_qkv, w_out, b_out, heads=HEADS, dim_head=DIM_HEAD)
    assert y.shape == (B, DIM, H, W)
    max_err = float(jnp.max(jnp.abs(y - y_ref)))
    assert jnp.allclose(y, y_ref, atol=5e-3, rtol=5e-3), (
        f"Pallas output mismatch vs reference (max abs err {max_err})")

    print("KERNEL_OK")
</pallas_src>

<mosaic_0001>
module attributes {stable_mosaic.version = 11 : i64} {
  func.func @_attention_kernel(%arg0: i32, %arg1: memref<1x32x256xbf16, #tpu.memory_space<vmem>>, %arg2: memref<384x32xbf16, #tpu.memory_space<vmem>>, %arg3: memref<32x128xbf16, #tpu.memory_space<vmem>>, %arg4: memref<32x1xf32, #tpu.memory_space<vmem>>, %arg5: memref<1x32x256xf32, #tpu.memory_space<vmem>>) attributes {dimension_semantics = [#tpu.dimension_semantics<parallel>], iteration_bounds = array<i64: 2>, scalar_prefetch = 0 : i64, scratch_operands = 0 : i64, tpu.core_type = #tpu.core_type<tc>, window_params = [{transform_indices = @transform_0, window_bounds = array<i64: 1, 32, 256>}, {pipeline_mode = #tpu.pipeline_mode<synchronous>, transform_indices = @transform_1, window_bounds = array<i64: 384, 32>}, {pipeline_mode = #tpu.pipeline_mode<synchronous>, transform_indices = @transform_2, window_bounds = array<i64: 32, 128>}, {pipeline_mode = #tpu.pipeline_mode<synchronous>, transform_indices = @transform_3, window_bounds = array<i64: 32, 1>}, {transform_indices = @transform_4, window_bounds = array<i64: 1, 32, 256>}]} {
    %c0 = arith.constant 0 : index
    %c0_0 = arith.constant 0 : index
    %c0_1 = arith.constant 0 : index
    %0 = vector.load %arg1[%c0, %c0_0, %c0_1] : memref<1x32x256xbf16, #tpu.memory_space<vmem>>, vector<1x32x256xbf16>
    %1 = vector.shape_cast %0 : vector<1x32x256xbf16> to vector<32x256xbf16>
    %c0_2 = arith.constant 0 : index
    %c0_3 = arith.constant 0 : index
    %2 = vector.load %arg2[%c0_2, %c0_3] : memref<384x32xbf16, #tpu.memory_space<vmem>>, vector<384x32xbf16>
    %cst = arith.constant dense<0.000000e+00> : vector<384x256xf32>
    %3 = tpu.matmul %2, %1, %cst {dimension_numbers = #tpu.dot_dimension_numbers<[1], [0], [0], [1], [0, 0, 1, 1], [], []>} : vector<384x32xbf16>, vector<32x256xbf16>, vector<384x256xf32> -> vector<384x256xf32>
    %4 = vector.extract_strided_slice %3 {offsets = [0, 0], sizes = [32, 256], strides = [1, 1]} : vector<384x256xf32> to vector<32x256xf32>
    %5 = vector.extract_strided_slice %3 {offsets = [128, 0], sizes = [32, 256], strides = [1, 1]} : vector<384x256xf32> to vector<32x256xf32>
    %6 = vector.extract_strided_slice %3 {offsets = [256, 0], sizes = [32, 256], strides = [1, 1]} : vector<384x256xf32> to vector<32x256xf32>
    %7 = arith.truncf %5 : vector<32x256xf32> to vector<32x256xbf16>
    %8 = arith.truncf %4 : vector<32x256xf32> to vector<32x256xbf16>
    %cst_4 = arith.constant dense<0.000000e+00> : vector<256x256xf32>
    %9 = tpu.matmul %7, %8, %cst_4 {dimension_numbers = #tpu.dot_dimension_numbers<[0], [0], [1], [1], [0, 1, 1, 1], [], []>} : vector<32x256xbf16>, vector<32x256xbf16>, vector<256x256xf32> -> vector<256x256xf32>
    %cst_5 = arith.constant dense<0xFF800000> : vector<256xf32>
    %10 = vector.multi_reduction <maximumf>, %9, %cst_5 [0] : vector<256x256xf32> to vector<256xf32>
    %11 = vector.shape_cast %10 : vector<256xf32> to vector<1x256xf32>
    %12 = vector.broadcast %11 : vector<1x256xf32> to vector<256x256xf32>
    %13 = arith.subf %9, %12 : vector<256x256xf32>
    %14 = math.exp %13 : vector<256x256xf32>
    %cst_6 = arith.constant dense<0.000000e+00> : vector<256xf32>
    %15 = vector.multi_reduction <add>, %14, %cst_6 [0] : vector<256x256xf32> to vector<256xf32>
    %16 = vector.shape_cast %15 : vector<256xf32> to vector<1x256xf32>
    %17 = tpu.reciprocal %16 {approx = true} : vector<1x256xf32> -> vector<1x256xf32>
    %18 = vector.broadcast %17 : vector<1x256xf32> to vector<256x256xf32>
    %19 = arith.mulf %14, %18 : vector<256x256xf32>
    %20 = arith.truncf %6 : vector<32x256xf32> to vector<32x256xbf16>
    %21 = arith.truncf %19 : vector<256x256xf32> to vector<256x256xbf16>
    %cst_7 = arith.constant dense<0.000000e+00> : vector<32x256xf32>
    %22 = tpu.matmul %20, %21, %cst_7 {dimension_numbers = #tpu.dot_dimension_numbers<[1], [0], [0], [1], [0, 0, 1, 1], [], []>} : vector<32x256xbf16>, vector<256x256xbf16>, vector<32x256xf32> -> vector<32x256xf32>
    %23 = vector.extract_strided_slice %3 {offsets = [32, 0], sizes = [32, 256], strides = [1, 1]} : vector<384x256xf32> to vector<32x256xf32>
    %24 = vector.extract_strided_slice %3 {offsets = [160, 0], sizes = [32, 256], strides = [1, 1]} : vector<384x256xf32> to vector<32x256xf32>
    %25 = vector.extract_strided_slice %3 {offsets = [288, 0], sizes = [32, 256], strides = [1, 1]} : vector<384x256xf32> to vector<32x256xf32>
    %26 = arith.truncf %24 : vector<32x256xf32> to vector<32x256xbf16>
    %27 = arith.truncf %23 : vector<32x256xf32> to vector<32x256xbf16>
    %cst_8 = arith.constant dense<0.000000e+00> : vector<256x256xf32>
    %28 = tpu.matmul %26, %27, %cst_8 {dimension_numbers = #tpu.dot_dimension_numbers<[0], [0], [1], [1], [0, 1, 1, 1], [], []>} : vector<32x256xbf16>, vector<32x256xbf16>, vector<256x256xf32> -> vector<256x256xf32>
    %cst_9 = arith.constant dense<0xFF800000> : vector<256xf32>
    %29 = vector.multi_reduction <maximumf>, %28, %cst_9 [0] : vector<256x256xf32> to vector<256xf32>
    %30 = vector.shape_cast %29 : vector<256xf32> to vector<1x256xf32>
    %31 = vector.broadcast %30 : vector<1x256xf32> to vector<256x256xf32>
    %32 = arith.subf %28, %31 : vector<256x256xf32>
    %33 = math.exp %32 : vector<256x256xf32>
    %cst_10 = arith.constant dense<0.000000e+00> : vector<256xf32>
    %34 = vector.multi_reduction <add>, %33, %cst_10 [0] : vector<256x256xf32> to vector<256xf32>
    %35 = vector.shape_cast %34 : vector<256xf32> to vector<1x256xf32>
    %36 = tpu.reciprocal %35 {approx = true} : vector<1x256xf32> -> vector<1x256xf32>
    %37 = vector.broadcast %36 : vector<1x256xf32> to vector<256x256xf32>
    %38 = arith.mulf %33, %37 : vector<256x256xf32>
    %39 = arith.truncf %25 : vector<32x256xf32> to vector<32x256xbf16>
    %40 = arith.truncf %38 : vector<256x256xf32> to vector<256x256xbf16>
    %cst_11 = arith.constant dense<0.000000e+00> : vector<32x256xf32>
    %41 = tpu.matmul %39, %40, %cst_11 {dimension_numbers = #tpu.dot_dimension_numbers<[1], [0], [0], [1], [0, 0, 1, 1], [], []>} : vector<32x256xbf16>, vector<256x256xbf16>, vector<32x256xf32> -> vector<32x256xf32>
    %42 = vector.extract_strided_slice %3 {offsets = [64, 0], sizes = [32, 256], strides = [1, 1]} : vector<384x256xf32> to vector<32x256xf32>
    %43 = vector.extract_strided_slice %3 {offsets = [192, 0], sizes = [32, 256], strides = [1, 1]} : vector<384x256xf32> to vector<32x256xf32>
    %44 = vector.extract_strided_slice %3 {offsets = [320, 0], sizes = [32, 256], strides = [1, 1]} : vector<384x256xf32> to vector<32x256xf32>
    %45 = arith.truncf %43 : vector<32x256xf32> to vector<32x256xbf16>
    %46 = arith.truncf %42 : vector<32x256xf32> to vector<32x256xbf16>
    %cst_12 = arith.constant dense<0.000000e+00> : vector<256x256xf32>
    %47 = tpu.matmul %45, %46, %cst_12 {dimension_numbers = #tpu.dot_dimension_numbers<[0], [0], [1], [1], [0, 1, 1, 1], [], []>} : vector<32x256xbf16>, vector<32x256xbf16>, vector<256x256xf32> -> vector<256x256xf32>
    %cst_13 = arith.constant dense<0xFF800000> : vector<256xf32>
    %48 = vector.multi_reduction <maximumf>, %47, %cst_13 [0] : vector<256x256xf32> to vector<256xf32>
    %49 = vector.shape_cast %48 : vector<256xf32> to vector<1x256xf32>
    %50 = vector.broadcast %49 : vector<1x256xf32> to vector<256x256xf32>
    %51 = arith.subf %47, %50 : vector<256x256xf32>
    %52 = math.exp %51 : vector<256x256xf32>
    %cst_14 = arith.constant dense<0.000000e+00> : vector<256xf32>
    %53 = vector.multi_reduction <add>, %52, %cst_14 [0] : vector<256x256xf32> to vector<256xf32>
    %54 = vector.shape_cast %53 : vector<256xf32> to vector<1x256xf32>
    %55 = tpu.reciprocal %54 {approx = true} : vector<1x256xf32> -> vector<1x256xf32>
    %56 = vector.broadcast %55 : vector<1x256xf32> to vector<256x256xf32>
    %57 = arith.mulf %52, %56 : vector<256x256xf32>
    %58 = arith.truncf %44 : vector<32x256xf32> to vector<32x256xbf16>
    %59 = arith.truncf %57 : vector<256x256xf32> to vector<256x256xbf16>
    %cst_15 = arith.constant dense<0.000000e+00> : vector<32x256xf32>
    %60 = tpu.matmul %58, %59, %cst_15 {dimension_numbers = #tpu.dot_dimension_numbers<[1], [0], [0], [1], [0, 0, 1, 1], [], []>} : vector<32x256xbf16>, vector<256x256xbf16>, vector<32x256xf32> -> vector<32x256xf32>
    %61 = vector.extract_strided_slice %3 {offsets = [96, 0], sizes = [32, 256], strides = [1, 1]} : vector<384x256xf32> to vector<32x256xf32>
    %62 = vector.extract_strided_slice %3 {offsets = [224, 0], sizes = [32, 256], strides = [1, 1]} : vector<384x256xf32> to vector<32x256xf32>
    %63 = vector.extract_strided_slice %3 {offsets = [352, 0], sizes = [32, 256], strides = [1, 1]} : vector<384x256xf32> to vector<32x256xf32>
    %64 = arith.truncf %62 : vector<32x256xf32> to vector<32x256xbf16>
    %65 = arith.truncf %61 : vector<32x256xf32> to vector<32x256xbf16>
    %cst_16 = arith.constant dense<0.000000e+00> : vector<256x256xf32>
    %66 = tpu.matmul %64, %65, %cst_16 {dimension_numbers = #tpu.dot_dimension_numbers<[0], [0], [1], [1], [0, 1, 1, 1], [], []>} : vector<32x256xbf16>, vector<32x256xbf16>, vector<256x256xf32> -> vector<256x256xf32>
    %cst_17 = arith.constant dense<0xFF800000> : vector<256xf32>
    %67 = vector.multi_reduction <maximumf>, %66, %cst_17 [0] : vector<256x256xf32> to vector<256xf32>
    %68 = vector.shape_cast %67 : vector<256xf32> to vector<1x256xf32>
    %69 = vector.broadcast %68 : vector<1x256xf32> to vector<256x256xf32>
    %70 = arith.subf %66, %69 : vector<256x256xf32>
    %71 = math.exp %70 : vector<256x256xf32>
    %cst_18 = arith.constant dense<0.000000e+00> : vector<256xf32>
    %72 = vector.multi_reduction <add>, %71, %cst_18 [0] : vector<256x256xf32> to vector<256xf32>
    %73 = vector.shape_cast %72 : vector<256xf32> to vector<1x256xf32>
    %74 = tpu.reciprocal %73 {approx = true} : vector<1x256xf32> -> vector<1x256xf32>
    %75 = vector.broadcast %74 : vector<1x256xf32> to vector<256x256xf32>
    %76 = arith.mulf %71, %75 : vector<256x256xf32>
    %77 = arith.truncf %63 : vector<32x256xf32> to vector<32x256xbf16>
    %78 = arith.truncf %76 : vector<256x256xf32> to vector<256x256xbf16>
    %cst_19 = arith.constant dense<0.000000e+00> : vector<32x256xf32>
    %79 = tpu.matmul %77, %78, %cst_19 {dimension_numbers = #tpu.dot_dimension_numbers<[1], [0], [0], [1], [0, 0, 1, 1], [], []>} : vector<32x256xbf16>, vector<256x256xbf16>, vector<32x256xf32> -> vector<32x256xf32>
    %80 = tpu.concatenate %22, %41, %60, %79 in 0 : vector<32x256xf32>, vector<32x256xf32>, vector<32x256xf32>, vector<32x256xf32> -> vector<128x256xf32>
    %81 = arith.truncf %80 : vector<128x256xf32> to vector<128x256xbf16>
    %c0_20 = arith.constant 0 : index
    %c0_21 = arith.constant 0 : index
    %82 = vector.load %arg3[%c0_20, %c0_21] : memref<32x128xbf16, #tpu.memory_space<vmem>>, vector<32x128xbf16>
    %cst_22 = arith.constant dense<0.000000e+00> : vector<32x256xf32>
    %83 = tpu.matmul %82, %81, %cst_22 {dimension_numbers = #tpu.dot_dimension_numbers<[1], [0], [0], [1], [0, 0, 1, 1], [], []>} : vector<32x128xbf16>, vector<128x256xbf16>, vector<32x256xf32> -> vector<32x256xf32>
    %c0_23 = arith.constant 0 : index
    %c0_24 = arith.constant 0 : index
    %84 = vector.load %arg4[%c0_23, %c0_24] : memref<32x1xf32, #tpu.memory_space<vmem>>, vector<32x1xf32>
    %85 = vector.broadcast %84 : vector<32x1xf32> to vector<32x256xf32>
    %86 = arith.addf %83, %85 : vector<32x256xf32>
    %c0_25 = arith.constant 0 : index
    %c0_26 = arith.constant 0 : index
    %c0_27 = arith.constant 0 : index
    %87 = vector.load %arg5[%c0_25, %c0_26, %c0_27] : memref<1x32x256xf32, #tpu.memory_space<vmem>>, vector<1x32x256xf32>
    %88 = vector.shape_cast %87 : vector<1x32x256xf32> to vector<32x256xf32>
    %89 = vector.shape_cast %86 : vector<32x256xf32> to vector<1x32x256xf32>
    tpu.vector_store %arg5[%c0_25, %c0_26, %c0_27], %89 {strides = array<i32>} : memref<1x32x256xf32, #tpu.memory_space<vmem>>, vector<1x32x256xf32>,
    return
  }
  func.func @transform_0(%arg0: i32) -> (i32, i32, i32) {
    %c0_i32 = arith.constant 0 : i32
    %c0_i32_0 = arith.constant 0 : i32
    %c0_i32_1 = arith.constant 0 : i32
    return %arg0, %c0_i32, %c0_i32_0 : i32, i32, i32
  }
  func.func @transform_1(%arg0: i32) -> (i32, i32) {
    %c0_i32 = arith.constant 0 : i32
    %c0_i32_0 = arith.constant 0 : i32
    %c0_i32_1 = arith.constant 0 : i32
    return %c0_i32, %c0_i32_0 : i32, i32
  }
  func.func @transform_2(%arg0: i32) -> (i32, i32) {
    %c0_i32 = arith.constant 0 : i32
    %c0_i32_0 = arith.constant 0 : i32
    %c0_i32_1 = arith.constant 0 : i32
    return %c0_i32, %c0_i32_0 : i32, i32
  }
  func.func @transform_3(%arg0: i32) -> (i32, i32) {
    %c0_i32 = arith.constant 0 : i32
    %c0_i32_0 = arith.constant 0 : i32
    %c0_i32_1 = arith.constant 0 : i32
    return %c0_i32, %c0_i32_0 : i32, i32
  }
  func.func @transform_4(%arg0: i32) -> (i32, i32, i32) {
    %c0_i32 = arith.constant 0 : i32
    %c0_i32_0 = arith.constant 0 : i32
    %c0_i32_1 = arith.constant 0 : i32
    return %arg0, %c0_i32, %c0_i32_0 : i32, i32, i32
  }
}

</mosaic_0001>

<bundles_post_ra>
// kernel: tpu_custom_call.1
= control target key start
LH: loop header
LB: loop body
LE: loop exit
PB: predicated region body
PF: predicated region fallthrough
CT: control target
= control target key end

     0   :  { %9 = vsyncpa [#allocation3], 0  ;;  %s8308_s0 = inlined_call_operand.vmem [shape: bf16[2,32,256], index: 0, kind: input, shape index: {}]   ;;  %s8309_s1 = inlined_call_operand.vmem [shape: bf16[384,32], index: 1, kind: input, shape index: {}]   ;;  %s8310_s2 = inlined_call_operand.vmem [shape: bf16[32,128], index: 2, kind: input, shape index: {}]   ;;  %s8311_s3 = inlined_call_operand.vmem [shape: f32[32,1], index: 3, kind: input, shape index: {}]   ;;  %s8312_s4 = inlined_call_operand.hbm [shape: f32[2,32,256], index: 4, kind: output, shape index: {}]  }
   0x1   :  { %11 = vsyncpa [#allocation3 + $0x1], 0  ;;  %s5013_s15 = smov 0   ;;  %s5015_s16 = smov 0  }
   0x2   :  { %s5017_s17 = smov 0   ;;  %s5019_s18 = smov 0  }
   0x3 LB: > { %s5034_s19 = sadd.s32 4294967295, %s4983_s18   ;;  %s4004_s20 = sadd.s32 4294967294, %s4983_s18   ;;  %s4983_s18 = sphi %s5019_s18, %s8832_s18   ;;  %s4979_s17 = sphi %s5017_s17, %s8831_s17   ;;  %s4975_s16 = sphi %s5015_s16, %s8830_s16   ;;  %s4971_s15 = sphi %s5013_s15, %s8829_s15  }
   0x4   : > { %s5038_s21 = sadd.s32 1, %s4983_s18   ;;  %s113_s22 = sadd.s32 1, %s4979_s17 }
   0x5   : > { %s110_s23 = ssub.s32 %s4983_s18, %s5038_s21  ;;  %p123_p0 = scmp.ne.s32.totalorder %s4979_s17, %s4975_s16 }
   0x6   : > { %p111_p1 = scmp.eq.s32.totalorder %s110_s23, 0  ;;  %p124_p2 = scmp.eq.s32.totalorder %s5034_s19, 1 }
   0x7   : > { %p129_p3 = scmp.ne.s32.totalorder %s4975_s16, %s4971_s15  ;;  %p130_p4 = scmp.eq.s32.totalorder %s4004_s20, 1 }
   0x8   : > { %s5049_s24 = scalar_select %p111_p1, %s4979_s17, %s113_s22  }
   0x9   : > { %p5051_p5 = por %p124_p2, %p123_p0  ;;  %p5055_p6 = por %p130_p4, %p129_p3 }
   0xa   : > { %p4007_p7 = scmp.ge.s32.totalorder %s4983_s18, 1  ;;  %p165_p8 = scmp.lt.s32.totalorder %s4983_s18, 3 }
   0xc   : > { %p166_p9 = pnand %p4007_p7, %p165_p8 }
   0xe   : > { %169 = sbr.rel (%p166_p9) target bundleno = 3152 (0xc50), region = 36 }
  0x13   : > { %p191_p10 = scmp.lt.s32.totalorder %s5034_s19, 1  ;;  %v4317_v12 = vld [vmem:[%s8309_s1] sm:$0xff]  ;;  %vm389_vm0 = vcmask 261120   ;;  %v4318_v13 = vld [vmem:[%s8309_s1 + $0x8] sm:$0xff]  ;;  %v4319_v14 = vld [vmem:[%s8309_s1 + $0x10] sm:$0xff]  ;;  %s188_s20 = sand.u32 1, %s4975_s16  }
  0x14   : > { %v4320_v15 = vld [vmem:[%s8309_s1 + $0x18] sm:$0xff]  ;;  %v4321_v16 = vld [vmem:[%s8309_s1 + $0x20] sm:$0xff]  ;;  %v4322_v17 = vld [vmem:[%s8309_s1 + $0x28] sm:$0xff]  ;;  %s4008_s22 = sshll.u32 %s188_s20, 6  ;;  %s3927_s7 = scalar_lea.sflag [#allocation3], %s188_s20 }
  0x15   : > { %s192_s27 = scalar_select %p191_p10, %s5034_s19, 1  ;;  %v4323_v18 = vld [vmem:[%s8309_s1 + $0x30] sm:$0xff]  ;;  %v4324_v19 = vld [vmem:[%s8309_s1 + $0x38] sm:$0xff]  ;;  %v4325_v20 = vld [vmem:[%s8309_s1 + $0x40] sm:$0xff] }
  0x16   : > { %v4326_v25 = vld [vmem:[%s8309_s1 + $0x48] sm:$0xff]  ;;  %v4327_v40 = vld [vmem:[%s8309_s1 + $0x50] sm:$0xff]  ;;  %v4328_v45 = vld [vmem:[%s8309_s1 + $0x58] sm:$0xff]  ;;  %s190_s23 = scalar_lea.vmem [#allocation2], %s4008_s22  ;;  %s4941_s11 = scalar_lea.hbm %s8312_s4, 128 }
  0x17   : > { %s4312_s28 = sshll.u32 %s192_s27, 5  ;;  %v4329_v50 = vld [vmem:[%s8309_s1 + $0x60] sm:$0xff]  ;;  %v4330_v55 = vld [vmem:[%s8309_s1 + $0x68] sm:$0xff]  ;;  %v4331_v60 = vld [vmem:[%s8309_s1 + $0x70] sm:$0xff]  ;;  %s4343_s27 = sshll.u32 %s5034_s19, 6 }
  0x18   : > { %s195_s5 = scalar_lea.vmem %s8308_s0, %s4312_s28  ;;  %s3938_s30 = scalar_lea.hbm %s8312_s4, %s4343_s27 }
  0x19   : > { %v4117_v0 = vld [vmem:[%s195_s5 + $0x10] sm:$0xf]  ;;  %v4316_v1 = vld [vmem:[%s195_s5 + $0x14] sm:$0xf0]  ;;  %v4315_v2 = vld [vmem:[%s195_s5 + $0x14] sm:$0xf] }
  0x1a   : > { %v4118_v3 = vor.u32 %v4316_v1, %v4117_v0  ;;  %v4119_v4 = vld [vmem:[%s195_s5 + $0x18] sm:$0xf0]  ;;  %v4109_v5 = vld [vmem:[%s195_s5] sm:$0xf]  ;;  %v4314_v6 = vld [vmem:[%s195_s5 + $0x4] sm:$0xf0] }
  0x1b   : > { %v4122_v7 = vor.u32 %v4315_v2, %v4119_v4  ;;  %v4313_v8 = vld [vmem:[%s195_s5 + $0x4] sm:$0xf]  ;;  %v4111_v9 = vld [vmem:[%s195_s5 + $0x8] sm:$0xf0]  ;;  %v4110_v10 = vor.u32 %v4314_v6, %v4109_v5  ;;  %v4332_v1 = vld [vmem:[%s8309_s1 + $0x78] sm:$0xff]  ;;  %s3939_s5 = sshll.u32 %s190_s23, 4  ;;  %s3940_s5 = int_to_ptr.vmem [resolvable:$true] %s3939_s5 }
  0x1c   : > { %468 = vmatpush.bf16.msra.mxu0 %v4118_v3  ;;  %v4114_v11 = vor.u32 %v4313_v8, %v4111_v9  ;;  %v4333_v8 = vld [vmem:[%s8309_s1 + $0x80] sm:$0xff]  ;;  %s3941_s6 = sshll.u32 %s3938_s30, 4  ;;  %s3942_s6 = int_to_ptr.hbm [resolvable:$true] %s3941_s6 }
  0x1d   : > { %597 = vmatpush.bf16.msra.mxu1 %v4122_v7  ;;  %s4935_s8 = sshra.s32 %s3942_s6, 4  ;;  %s4936_s8 = int_to_ptr.hbm [resolvable:$true] %s4935_s8 }
  0x1e   : > { %s4937_s9 = scalar_lea.hbm %s4936_s8, 64  ;;  %p4942_p0 = scmp.lt.s32.totalorder %s4936_s8, %s8312_s4 }
  0x1f   : > { %p4938_p11 = scmp.ne.s32.totalorder %s4936_s8, %s4937_s9  ;;  %p4943_p1 = scmp.lt.s32.totalorder %s4941_s11, %s4937_s9 }
  0x20   : > { %469 = vmatpush.bf16.msra.mxu0 %v4110_v10 }
  0x21   : > { %598 = vmatpush.bf16.msra.mxu1 %v4114_v11  ;;  %p4939_p12 = pnand %p4938_p11, %p5051_p5  ;;  %p4944_p2 = por %p4943_p1, %p4942_p0 }
  0x23   : > { %4123 = vmatmul.msk.bf16.vlgmr.msra.gmra.mxu0 %vm389_vm0, %v4317_v12  ;;  %p4940_p13 = pneg %p4939_p12 }
  0x24   : > { %4147 = vmatmul.msk.bf16.vlgmr.msra.gmra.mxu1 %vm389_vm0, %v4317_v12 }
  0x25   : > { %p4945_p3 = pnand %p4944_p2, %p4940_p13 }
  0x33   : > { %4124 = vmatmul.msk.bf16.gmra.mxu0 %vm389_vm0, %v4318_v13 }
  0x34   : > { %4148 = vmatmul.msk.bf16.gmra.mxu1 %vm389_vm0, %v4318_v13  ;;  %v4334_v13 = vld [vmem:[%s8309_s1 + $0x88] sm:$0xff] }
  0x43   : > { %4125 = vmatmul.msk.bf16.gmra.mxu0 %vm389_vm0, %v4319_v14 }
  0x44   : > { %4149 = vmatmul.msk.bf16.gmra.mxu1 %vm389_vm0, %v4319_v14  ;;  %v4335_v14 = vld [vmem:[%s8309_s1 + $0x90] sm:$0xff] }
  0x53   : > { %4126 = vmatmul.msk.bf16.gmra.mxu0 %vm389_vm0, %v4320_v15 }
  0x54   : > { %4150 = vmatmul.msk.bf16.gmra.mxu1 %vm389_vm0, %v4320_v15 }
  0x63   : > { %4127 = vmatmul.msk.bf16.gmra.mxu0 %vm389_vm0, %v4321_v16 }
  0x64   : > { %4151 = vmatmul.msk.bf16.gmra.mxu1 %vm389_vm0, %v4321_v16 }
  0x73   : > { %4128 = vmatmul.msk.bf16.gmra.mxu0 %vm389_vm0, %v4322_v17 }
  0x74   : > { %4152 = vmatmul.msk.bf16.gmra.mxu1 %vm389_vm0, %v4322_v17 }
  0x83   : > { %4129 = vmatmul.msk.bf16.gmra.mxu0 %vm389_vm0, %v4323_v18 }
  0x84   : > { %4153 = vmatmul.msk.bf16.gmra.mxu1 %vm389_vm0, %v4323_v18 }
  0x93   : > { %4130 = vmatmul.msk.bf16.gmra.mxu0 %vm389_vm0, %v4324_v19 }
  0x94   : > { %4154 = vmatmul.msk.bf16.gmra.mxu1 %vm389_vm0, %v4324_v19  ;;  %v4336_v19 = vld [vmem:[%s8309_s1 + $0x98] sm:$0xff] }
  0xa0   : > { %v471_v21 = vpop.f32.mrf.mxu0 }
  0xa1   : > { %v600_v22 = vpop.f32.mrf.mxu1 }
  0xa3   : > { %4131 = vmatmul.msk.bf16.gmra.mxu0 %vm389_vm0, %v4325_v20 }
  0xa4   : > { %4155 = vmatmul.msk.bf16.gmra.mxu1 %vm389_vm0, %v4325_v20 }
  0xa8   : > { %v473_v23 = vpop.f32.mrf.mxu0 }
  0xa9   : > { %v602_v24 = vpop.f32.mrf.mxu1  ;;  %v724_v32 = vpack.c.bf16 %v473_v23, %v471_v21 }
  0xaa   : > { %v725_v33 = vpack.c.bf16 %v602_v24, %v600_v22 }
  0xb0   : > { %v476_v26 = vpop.f32.mrf.mxu0 }
  0xb1   : > { %v605_v27 = vpop.f32.mrf.mxu1 }
  0xb3   : > { %4132 = vmatmul.msk.bf16.gmra.mxu0 %vm389_vm0, %v4326_v25 }
  0xb4   : > { %4156 = vmatmul.msk.bf16.gmra.mxu1 %vm389_vm0, %v4326_v25 }
  0xb8   : > { %v478_v28 = vpop.f32.mrf.mxu0 }
  0xb9   : > { %v607_v29 = vpop.f32.mrf.mxu1  ;;  %v726_v30 = vpack.c.bf16 %v478_v28, %v476_v26  ;;  %v4337_v26 = vld [vmem:[%s8309_s1 + $0xa0] sm:$0xff] }
  0xba   : > { %v727_v31 = vpack.c.bf16 %v607_v29, %v605_v27 }
  0xbb   : > { %806 = vmatpush.bf16.msrb.mxu0 %v726_v30  ;;  %4344 = vmatpush.bf16.msra.mxu2 %v726_v30 }
  0xbc   : > { %895 = vmatpush.bf16.msrb.mxu1 %v727_v31  ;;  %4346 = vmatpush.bf16.msra.mxu3 %v727_v31  ;;  %v4338_v31 = vld [vmem:[%s8309_s1 + $0xa8] sm:$0xff] }
  0xbf   : > { %807 = vmatpush.bf16.msrb.mxu0 %v724_v32  ;;  %4345 = vmatpush.bf16.msra.mxu2 %v724_v32 }
  0xc0   : > { %896 = vmatpush.bf16.msrb.mxu1 %v725_v33  ;;  %4347 = vmatpush.bf16.msra.mxu3 %v725_v33  ;;  %v5116_v34 = vpop.f32.mrf.mxu0 }
  0xc1   : > { %8445 = vst [vmem:[#allocation5_spill] sm:$0xff] %v5116_v34  ;;  %v5118_v35 = vpop.f32.mrf.mxu1 }
  0xc2   : > { %8446 = vst [vmem:[#allocation6_spill] sm:$0xff] %v5118_v35 }
  0xc3   : > { %4133 = vmatmul.msk.bf16.gmra.mxu0 %vm389_vm0, %v4327_v40 }
  0xc4   : > { %4157 = vmatmul.msk.bf16.gmra.mxu1 %vm389_vm0, %v4327_v40 }
  0xc8   : > { %v5120_v36 = vpop.f32.mrf.mxu0 }
  0xc9   : > { %8447 = vst [vmem:[#allocation7_spill] sm:$0xff] %v5120_v36  ;;  %v5122_v37 = vpop.f32.mrf.mxu1 }
  0xca   : > { %8448 = vst [vmem:[#allocation8_spill] sm:$0xff] %v5122_v37 }
  0xd0   : > { %v5124_v38 = vpop.f32.mrf.mxu0 }
  0xd1   : > { %8449 = vst [vmem:[#allocation9_spill] sm:$0xff] %v5124_v38  ;;  %v5126_v39 = vpop.f32.mrf.mxu1 }
  0xd2   : > { %8450 = vst [vmem:[#allocation10_spill] sm:$0xff] %v5126_v39 }
  0xd3   : > { %4134 = vmatmul.msk.bf16.gmra.mxu0 %vm389_vm0, %v4328_v45 }
  0xd4   : > { %4158 = vmatmul.msk.bf16.gmra.mxu1 %vm389_vm0, %v4328_v45 }
  0xd8   : > { %v5131_v41 = vpop.f32.mrf.mxu0 }
  0xd9   : > { %8451 = vst [vmem:[#allocation11_spill] sm:$0xff] %v5131_v41  ;;  %v5133_v42 = vpop.f32.mrf.mxu1 }
  0xda   : > { %8452 = vst [vmem:[#allocation12_spill] sm:$0xff] %v5133_v42 }
  0xe0   : > { %v5137_v43 = vpop.f32.mrf.mxu0 }
  0xe1   : > { %8453 = vst [vmem:[#allocation13_spill] sm:$0xff] %v5137_v43  ;;  %v5139_v44 = vpop.f32.mrf.mxu1 }
  0xe2   : > { %8454 = vst [vmem:[#allocation14_spill] sm:$0xff] %v5139_v44 }
  0xe3   : > { %4135 = vmatmul.msk.bf16.gmra.mxu0 %vm389_vm0, %v4329_v50 }
  0xe4   : > { %4159 = vmatmul.msk.bf16.gmra.mxu1 %vm389_vm0, %v4329_v50  ;;  %v4339_v50 = vld [vmem:[%s8309_s1 + $0xb0] sm:$0xff] }
  0xe8   : > { %v5144_v46 = vpop.f32.mrf.mxu0 }
  0xe9   : > { %8455 = vst [vmem:[#allocation15_spill] sm:$0xff] %v5144_v46  ;;  %v5146_v47 = vpop.f32.mrf.mxu1 }
  0xea   : > { %8456 = vst [vmem:[#allocation16_spill] sm:$0xff] %v5146_v47 }
  0xf0   : > { %v5150_v48 = vpop.f32.mrf.mxu0 }
  0xf1   : > { %8457 = vst [vmem:[#allocation17_spill] sm:$0xff] %v5150_v48  ;;  %v5152_v49 = vpop.f32.mrf.mxu1 }
  0xf2   : > { %8458 = vst [vmem:[#allocation18_spill] sm:$0xff] %v5152_v49 }
  0xf3   : > { %4136 = vmatmul.msk.bf16.gmra.mxu0 %vm389_vm0, %v4330_v55 }
  0xf4   : > { %4160 = vmatmul.msk.bf16.gmra.mxu1 %vm389_vm0, %v4330_v55 }
  0xf8   : > { %v5157_v51 = vpop.f32.mrf.mxu0 }
  0xf9   : > { %8459 = vst [vmem:[#allocation19_spill] sm:$0xff] %v5157_v51  ;;  %v5159_v52 = vpop.f32.mrf.mxu1 }
  0xfa   : > { %8460 = vst [vmem:[#allocation20_spill] sm:$0xff] %v5159_v52 }
 0x100   : > { %v5163_v53 = vpop.f32.mrf.mxu0 }
 0x101   : > { %8461 = vst [vmem:[#allocation21_spill] sm:$0xff] %v5163_v53  ;;  %v5165_v54 = vpop.f32.mrf.mxu1 }
 0x102   : > { %8462 = vst [vmem:[#allocation22_spill] sm:$0xff] %v5165_v54 }
 0x103   : > { %4137 = vmatmul.msk.bf16.gmra.mxu0 %vm389_vm0, %v4331_v60 }
 0x104   : > { %4161 = vmatmul.msk.bf16.gmra.mxu1 %vm389_vm0, %v4331_v60 }
 0x108   : > { %v5170_v56 = vpop.f32.mrf.mxu0 }
 0x109   : > { %8463 = vst [vmem:[#allocation23_spill] sm:$0xff] %v5170_v56  ;;  %v5172_v57 = vpop.f32.mrf.mxu1 }
 0x10a   : > { %8464 = vst [vmem:[#allocation24_spill] sm:$0xff] %v5172_v57 }
 0x110   : > { %v5176_v58 = vpop.f32.mrf.mxu0 }
 0x111   : > { %8465 = vst [vmem:[#allocation25_spill] sm:$0xff] %v5176_v58  ;;  %v5178_v59 = vpop.f32.mrf.mxu1 }
 0x112   : > { %8466 = vst [vmem:[#allocation26_spill] sm:$0xff] %v5178_v59 }
 0x113   : > { %4138 = vmatmul.msk.bf16.gmra.mxu0 %vm389_vm0, %v4332_v1 }
 0x114   : > { %4162 = vmatmul.msk.bf16.gmra.mxu1 %vm389_vm0, %v4332_v1  ;;  %v4340_v1 = vld [vmem:[%s8309_s1 + $0xb8] sm:$0xff] }
 0x118   : > { %v5183_v61 = vpop.f32.mrf.mxu0 }
 0x119   : > { %8467 = vst [vmem:[#allocation27_spill] sm:$0xff] %v5183_v61  ;;  %v5185_v62 = vpop.f32.mrf.mxu1 }
 0x11a   : > { %8468 = vst [vmem:[#allocation28_spill] sm:$0xff] %v5185_v62 }
 0x120   : > { %v511_v63 = vpop.f32.mrf.mxu0 }
 0x121   : > { %v640_v0 = vpop.f32.mrf.mxu1 }
 0x123   : > { %4139 = vmatmul.msk.bf16.gmra.mxu0 %vm389_vm0, %v4333_v8 }
 0x124   : > { %4163 = vmatmul.msk.bf16.gmra.mxu1 %vm389_vm0, %v4333_v8 }
 0x128   : > { %v513_v2 = vpop.f32.mrf.mxu0 }
 0x129   : > { %v642_v3 = vpop.f32.mrf.mxu1  ;;  %v720_v4 = vpack.c.bf16 %v513_v2, %v511_v63 }
 0x12a   : > { %v721_v5 = vpack.c.bf16 %v642_v3, %v640_v0 }
 0x12c   : > { %728 = vxpose.binary.xlu0.c.b16.start [1/4] (short) %v721_v5, %v720_v4, 128 }
 0x130   : > { %v516_v6 = vpop.f32.mrf.mxu0 }
 0x131   : > { %v645_v7 = vpop.f32.mrf.mxu1 }
 0x133   : > { %4140 = vmatmul.msk.bf16.gmra.mxu0 %vm389_vm0, %v4334_v13 }
 0x134   : > { %4164 = vmatmul.msk.bf16.gmra.mxu1 %vm389_vm0, %v4334_v13 }
 0x138   : > { %v518_v9 = vpop.f32.mrf.mxu0 }
 0x139   : > { %v722_v10 = vpack.c.bf16 %v518_v9, %v516_v6  ;;  %v647_v11 = vpop.f32.mrf.mxu1 }
 0x13a   : > { %v723_v12 = vpack.c.bf16 %v647_v11, %v645_v7 }
 0x13c   : > { %729 = vxpose.binary.xlu0.c.b16.end [2/4] (short) %v723_v12, %v722_v10, 128 }
 0x140   : > { %v5207_v15 = vpop.f32.mrf.mxu0 }
 0x141   : > { %v5209_v16 = vpop.f32.mrf.mxu1 }
 0x143   : > { %4141 = vmatmul.msk.bf16.gmra.mxu0 %vm389_vm0, %v4335_v14 }
 0x144   : > { %4165 = vmatmul.msk.bf16.gmra.mxu1 %vm389_vm0, %v4335_v14 }
 0x148   : > { %v5213_v17 = vpop.f32.mrf.mxu0 }
 0x149   : > { %v5215_v18 = vpop.f32.mrf.mxu1 }
 0x150   : > { %v5220_v20 = vpop.f32.mrf.mxu0 }
 0x151   : > { %v5222_v21 = vpop.f32.mrf.mxu1 }
 0x153   : > { %4142 = vmatmul.msk.bf16.gmra.mxu0 %vm389_vm0, %v4336_v19 }
 0x154   : > { %4166 = vmatmul.msk.bf16.gmra.mxu1 %vm389_vm0, %v4336_v19 }
 0x158   : > { %v528_v22 = vpop.f32.mrf.mxu0 }
 0x159   : > { %v657_v23 = vpop.f32.mrf.mxu1  ;;  %v1498_v24 = vpack.c.bf16 %v528_v22, %v5220_v20  ;;  %v1496_v22 = vpack.c.bf16 %v5213_v17, %v5207_v15 }
 0x15a   : > { %v1499_v25 = vpack.c.bf16 %v657_v23, %v5222_v21  ;;  %v1497_v23 = vpack.c.bf16 %v5215_v18, %v5209_v16 }
 0x15c   : > { %1504 = vxpose.binary.xlu1.c.b16.start [1/4] (short) %v1497_v23, %v1496_v22, 128 }
 0x160   : > { %v5231_v27 = vpop.f32.mrf.mxu0 }
 0x161   : > { %v660_v28 = vpop.f32.mrf.mxu1 }
 0x163   : > { %4143 = vmatmul.msk.bf16.gmra.mxu0 %vm389_vm0, %v4337_v26 }
 0x164   : > { %4167 = vmatmul.msk.bf16.gmra.mxu1 %vm389_vm0, %v4337_v26 }
 0x168   : > { %v533_v29 = vpop.f32.mrf.mxu0 }
 0x169   : > { %v662_v30 = vpop.f32.mrf.mxu1 }
 0x16c   : > { %1505 = vxpose.binary.xlu1.c.b16.end [2/4] (short) %v1499_v25, %v1498_v24, 128 }
 0x170   : > { %v5238_v32 = vpop.f32.mrf.mxu0 }
 0x171   : > { %v665_v33 = vpop.f32.mrf.mxu1 }
 0x173   : > { %4144 = vmatmul.msk.bf16.gmra.mxu0 %vm389_vm0, %v4338_v31 }
 0x174   : > { %4168 = vmatmul.msk.bf16.gmra.mxu1 %vm389_vm0, %v4338_v31 }
 0x178   : > { %v538_v40 = vpop.f32.mrf.mxu0 }
 0x179   : > { %v667_v45 = vpop.f32.mrf.mxu1  ;;  %v2274_v16 = vpack.c.bf16 %v538_v40, %v5238_v32 }
 0x17a   : > { %v2275_v17 = vpack.c.bf16 %v667_v45, %v665_v33 }
 0x180   : > { %v541_v55 = vpop.f32.mrf.mxu0 }
 0x181   : > { %v670_v60 = vpop.f32.mrf.mxu1 }
 0x183   : > { %4145 = vmatmul.msk.bf16.gmra.mxu0 %vm389_vm0, %v4339_v50 }
 0x184   : > { %4169 = vmatmul.msk.bf16.gmra.mxu1 %vm389_vm0, %v4339_v50 }
 0x188   : > { %v543_v63 = vpop.f32.mrf.mxu0 }
 0x189   : > { %v672_v0 = vpop.f32.mrf.mxu1  ;;  %v3048_v2 = vpack.c.bf16 %v543_v63, %v541_v55  ;;  %v2272_v55 = vpack.c.bf16 %v533_v29, %v5231_v27 }
 0x18a   : > { %v3049_v3 = vpack.c.bf16 %v672_v0, %v670_v60  ;;  %v2273_v60 = vpack.c.bf16 %v662_v30, %v660_v28 }
 0x18c   : > { %2280 = vxpose.binary.xlu2.c.b16.start [1/4] (short) %v2273_v60, %v2272_v55, 128 }
 0x190   : > { %v546_v4 = vpop.f32.mrf.mxu0 }
 0x191   : > { %v675_v5 = vpop.f32.mrf.mxu1 }
 0x193   : > { %4146 = vmatmul.msk.bf16.gmra.mxu0 %vm389_vm0, %v4340_v1 }
 0x194   : > { %4170 = vmatmul.msk.bf16.gmra.mxu1 %vm389_vm0, %v4340_v1 }
 0x198   : > { %v548_v6 = vpop.f32.mrf.mxu0 }
 0x199   : > { %v677_v7 = vpop.f32.mrf.mxu1  ;;  %v3050_v8 = vpack.c.bf16 %v548_v6, %v546_v4 }
 0x19a   : > { %v3051_v9 = vpack.c.bf16 %v677_v7, %v675_v5 }
 0x19c   : > { %2281 = vxpose.binary.xlu2.c.b16.end [2/4] (short) %v2275_v17, %v2274_v16, 128 }
 0x1a0   : > { %v5276_v27 = vpop.f32.mrf.mxu0 }
 0x1a1   : > { %8469 = vst [vmem:[#allocation29_spill] sm:$0xff] %v5276_v27  ;;  %v5282_v29 = vpop.f32.mrf.mxu1 }
 0x1a2   : > { %8471 = vst [vmem:[#allocation31_spill] sm:$0xff] %v5282_v29 }
 0x1a8   : > { %v5280_v28 = vpop.f32.mrf.mxu0 }
 0x1a9   : > { %8470 = vst [vmem:[#allocation30_spill] sm:$0xff] %v5280_v28  ;;  %v5288_v32 = vpop.f32.mrf.mxu1 }
 0x1aa   : > { %8473 = vst [vmem:[#allocation33_spill] sm:$0xff] %v5288_v32 }
 0x1ac   : > { %3056 = vxpose.binary.xlu0.c.b16.start [1/4] (short) %v3049_v3, %v3048_v2, 128 }
 0x1b0   : > { %v5284_v30 = vpop.f32.mrf.mxu0 }
 0x1b1   : > { %8472 = vst [vmem:[#allocation32_spill] sm:$0xff] %v5284_v30  ;;  %v5294_v40 = vpop.f32.mrf.mxu1 }
 0x1b2   : > { %8475 = vst [vmem:[#allocation35_spill] sm:$0xff] %v5294_v40 }
 0x1b8   : > { %v5290_v33 = vpop.f32.mrf.mxu0 }
 0x1b9   : > { %8474 = vst [vmem:[#allocation34_spill] sm:$0xff] %v5290_v33  ;;  %v5306_v3 = vpop.f32.mrf.mxu1 }
 0x1ba   : > { %8478 = vst [vmem:[#allocation38_spill] sm:$0xff] %v5306_v3 }
 0x1bc   : > { %3057 = vxpose.binary.xlu0.c.b16.end [2/4] (short) %v3051_v9, %v3050_v8, 128 }
 0x1c0   : > { %v5300_v0 = vpop.f32.mrf.mxu0 }
 0x1c1   : > { %8476 = vst [vmem:[#allocation36_spill] sm:$0xff] %v5300_v0  ;;  %v5316_v7 = vpop.f32.mrf.mxu1 }
 0x1c2   : > { %8480 = vst [vmem:[#allocation40_spill] sm:$0xff] %v5316_v7 }
 0x1c8   : > { %v5308_v4 = vpop.f32.mrf.mxu0 }
 0x1c9   : > { %8479 = vst [vmem:[#allocation39_spill] sm:$0xff] %v5308_v4 }
 0x1d0   : > { %v5318_v8 = vpop.f32.mrf.mxu0 }
 0x1d1   : > { %8481 = vst [vmem:[#allocation41_spill] sm:$0xff] %v5318_v8 }
 0x1d8   : > { %v736_v10 = vpop.trf.xlu0 }
 0x1d9   : > { %4171 = vmatmul.msk.bf16.vlgmr.msrb.gmra.mxu0 %vm389_vm0, %v736_v10  ;;  %4187 = vmatmul.msk.bf16.vlgmr.msrb.gmra.mxu1 %vm389_vm0, %v736_v10 }
 0x1e0   : > { %v737_v11 = vpop.trf.xlu0 }
 0x1e8   : > { %v738_v12 = vpop.trf.xlu0 }
 0x1e9   : > { %4172 = vmatmul.msk.bf16.gmra.mxu0 %vm389_vm0, %v738_v12  ;;  %4188 = vmatmul.msk.bf16.gmra.mxu1 %vm389_vm0, %v738_v12  ;;  %v5328_v12 = vpop.f32.mrf.mxu0 }
 0x1ea   : > { %8483 = vst [vmem:[#allocation43_spill] sm:$0xff] %v5328_v12 }
 0x1f0   : > { %v739_v13 = vpop.trf.xlu0 }
 0x1f1   : > { %v5340_v22 = vpop.f32.mrf.mxu0 }
 0x1f2   : > { %8486 = vst [vmem:[#allocation46_spill] sm:$0xff] %v5340_v22 }
 0x1f8   : > { %v740_v14 = vpop.trf.xlu0 }
 0x1f9   : > { %4173 = vmatmul.msk.bf16.gmra.mxu0 %vm389_vm0, %v740_v14  ;;  %4189 = vmatmul.msk.bf16.gmra.mxu1 %vm389_vm0, %v740_v14 }
 0x200   : > { %v741_v19 = vpop.trf.xlu0 }
 0x208   : > { %v742_v20 = vpop.trf.xlu0 }
 0x209   : > { %4174 = vmatmul.msk.bf16.vlgmr.msra.gmra.mxu2 %vm389_vm0, %v742_v20  ;;  %4190 = vmatmul.msk.bf16.vlgmr.msra.gmra.mxu3 %vm389_vm0, %v742_v20 }
 0x210   : > { %v743_v21 = vpop.trf.xlu0 }
 0x218   : > { %v744_v26 = vpop.trf.xlu0 }
 0x219   : > { %4175 = vmatmul.msk.bf16.gmra.mxu2 %vm389_vm0, %v744_v26  ;;  %4191 = vmatmul.msk.bf16.gmra.mxu3 %vm389_vm0, %v744_v26 }
 0x220   : > { %v745_v31 = vpop.trf.xlu0 }
 0x228   : > { %v746_v50 = vpop.trf.xlu0 }
 0x229   : > { %4176 = vmatmul.msk.bf16.gmra.mxu2 %vm389_vm0, %v746_v50  ;;  %4192 = vmatmul.msk.bf16.gmra.mxu3 %vm389_vm0, %v746_v50  ;;  %v5350_v50 = vpop.f32.mrf.mxu0 }
 0x22a   : > { %8488 = vst [vmem:[#allocation48_spill] sm:$0xff] %v5350_v50 }
 0x230   : > { %v747_v15 = vpop.trf.xlu0 }
 0x231   : > { %v5358_v17 = vpop.f32.mrf.mxu0 }
 0x232   : > { %8491 = vst [vmem:[#allocation51_spill] sm:$0xff] %v5358_v17 }
 0x238   : > { %v748_v18 = vpop.trf.xlu0 }
 0x239   : > { %4177 = vmatmul.msk.bf16.gmra.mxu2 %vm389_vm0, %v748_v18  ;;  %4193 = vmatmul.msk.bf16.gmra.mxu3 %vm389_vm0, %v748_v18  ;;  %v5368_v57 = vpop.f32.mrf.mxu0 }
 0x23a   : > { %8493 = vst [vmem:[#allocation53_spill] sm:$0xff] %v5368_v57 }
 0x240   : > { %v749_v24 = vpop.trf.xlu0 }
 0x241   : > { %v5380_v61 = vpop.f32.mrf.mxu0 }
 0x242   : > { %8495 = vst [vmem:[#allocation55_spill] sm:$0xff] %v5380_v61 }
 0x248   : > { %v750_v25 = vpop.trf.xlu0 }
 0x249   : > { %4178 = vmatmul.msk.bf16.gmra.mxu2 %vm389_vm0, %v750_v25  ;;  %4194 = vmatmul.msk.bf16.gmra.mxu3 %vm389_vm0, %v750_v25 }
 0x259   : > { %4179 = vmatmul.msk.bf16.gmra.mxu2 %vm389_vm0, %v737_v11  ;;  %4195 = vmatmul.msk.bf16.gmra.mxu3 %vm389_vm0, %v737_v11  ;;  %v5324_v11 = vpop.f32.mrf.mxu1 }
 0x25a   : > { %8482 = vst [vmem:[#allocation42_spill] sm:$0xff] %v5324_v11 }
 0x269   : > { %4180 = vmatmul.msk.bf16.gmra.mxu2 %vm389_vm0, %v739_v13  ;;  %4196 = vmatmul.msk.bf16.gmra.mxu3 %vm389_vm0, %v739_v13 }
 0x279   : > { %4181 = vmatmul.msk.bf16.gmra.mxu2 %vm389_vm0, %v741_v19  ;;  %4197 = vmatmul.msk.bf16.gmra.mxu3 %vm389_vm0, %v741_v19  ;;  %v5334_v19 = vpop.f32.mrf.mxu1 }
 0x27a   : > { %8484 = vst [vmem:[#allocation44_spill] sm:$0xff] %v5334_v19 }
 0x289   : > { %4182 = vmatmul.msk.bf16.gmra.mxu2 %vm389_vm0, %v743_v21  ;;  %4198 = vmatmul.msk.bf16.gmra.mxu3 %vm389_vm0, %v743_v21 }
 0x28c   : > { %v5296_v45 = vpop.f32.mrf.mxu2  ;;  %v5298_v63 = vpop.f32.mrf.mxu3 }
 0x294   : > { %v5302_v1 = vpop.f32.mrf.mxu2  ;;  %v5304_v2 = vpop.f32.mrf.mxu3 }
 0x295   : > { %8477 = vst [vmem:[#allocation37_spill] sm:$0xff] %v5302_v1 }
 0x299   : > { %4183 = vmatmul.msk.bf16.gmra.mxu2 %vm389_vm0, %v745_v31  ;;  %4199 = vmatmul.msk.bf16.gmra.mxu3 %vm389_vm0, %v745_v31  ;;  %v5348_v31 = vpop.f32.mrf.mxu1 }
 0x29a   : > { %8487 = vst [vmem:[#allocation47_spill] sm:$0xff] %v5348_v31 }
 0x29c   : > { %v5312_v5 = vpop.f32.mrf.mxu2  ;;  %v5314_v6 = vpop.f32.mrf.mxu3 }
 0x2a1   : > { %v5356_v16 = vpop.f32.mrf.mxu1 }
 0x2a2   : > { %8490 = vst [vmem:[#allocation50_spill] sm:$0xff] %v5356_v16 }
 0x2a4   : > { %v5320_v9 = vpop.f32.mrf.mxu2  ;;  %v5322_v10 = vpop.f32.mrf.mxu3 }
 0x2a9   : > { %4184 = vmatmul.msk.bf16.gmra.mxu2 %vm389_vm0, %v747_v15  ;;  %4200 = vmatmul.msk.bf16.gmra.mxu3 %vm389_vm0, %v747_v15  ;;  %v751_v15 = vpop.trf.xlu0  ;;  %v5366_v25 = vpop.f32.mrf.mxu1 }
 0x2aa   : > { %8492 = vst [vmem:[#allocation52_spill] sm:$0xff] %v5366_v25  ;;  %v5388_v25 = vpop.f32.mrf.mxu0 }
 0x2ab   : > { %8498 = vst [vmem:[#allocation58_spill] sm:$0xff] %v5388_v25 }
 0x2ac   : > { %v5330_v13 = vpop.f32.mrf.mxu2  ;;  %v5332_v14 = vpop.f32.mrf.mxu3 }
 0x2b1   : > { %v5374_v53 = vpop.f32.mrf.mxu1 }
 0x2b2   : > { %8494 = vst [vmem:[#allocation54_spill] sm:$0xff] %v5374_v53  ;;  %v5396_v53 = vpop.f32.mrf.mxu0 }
 0x2b3   : > { %8501 = vst [vmem:[#allocation61_spill] sm:$0xff] %v5396_v53 }
 0x2b4   : > { %v5336_v20 = vpop.f32.mrf.mxu2  ;;  %v5338_v21 = vpop.f32.mrf.mxu3 }
 0x2b5   : > { %8485 = vst [vmem:[#allocation45_spill] sm:$0xff] %v5336_v20 }
 0x2b9   : > { %4185 = vmatmul.msk.bf16.gmra.mxu2 %vm389_vm0, %v749_v24  ;;  %4201 = vmatmul.msk.bf16.gmra.mxu3 %vm389_vm0, %v749_v24  ;;  %v5386_v17 = vpop.f32.mrf.mxu1 }
 0x2ba   : > { %8497 = vst [vmem:[#allocation57_spill] sm:$0xff] %v5386_v17  ;;  %v5404_v44 = vpop.f32.mrf.mxu0 }
 0x2bb   : > { %8504 = vst [vmem:[#allocation64_spill] sm:$0xff] %v5404_v44 }
 0x2bc   : > { %v5344_v23 = vpop.f32.mrf.mxu2  ;;  %v5346_v26 = vpop.f32.mrf.mxu3 }
 0x2c1   : > { %v5394_v50 = vpop.f32.mrf.mxu1 }
 0x2c2   : > { %8500 = vst [vmem:[#allocation60_spill] sm:$0xff] %v5394_v50  ;;  %v5416_v50 = vpop.f32.mrf.mxu0 }
 0x2c4   : > { %v5352_v55 = vpop.f32.mrf.mxu2  ;;  %v5354_v60 = vpop.f32.mrf.mxu3 }
 0x2c5   : > { %8489 = vst [vmem:[#allocation49_spill] sm:$0xff] %v5354_v60 }
 0x2c9   : > { %4186 = vmatmul.msk.bf16.gmra.mxu2 %vm389_vm0, %v751_v15  ;;  %4202 = vmatmul.msk.bf16.gmra.mxu3 %vm389_vm0, %v751_v15  ;;  %v5402_v61 = vpop.f32.mrf.mxu1 }
 0x2ca   : > { %8503 = vst [vmem:[#allocation63_spill] sm:$0xff] %v5402_v61  ;;  %v5424_v61 = vpop.f32.mrf.mxu0 }
 0x2cc   : > { %v5362_v18 = vpop.f32.mrf.mxu2  ;;  %v5364_v24 = vpop.f32.mrf.mxu3 }
 0x2d1   : > { %v5410_v25 = vpop.f32.mrf.mxu1 }
 0x2d2   : > { %8506 = vst [vmem:[#allocation66_spill] sm:$0xff] %v5410_v25  ;;  %v5432_v25 = vpop.f32.mrf.mxu0 }
 0x2d3   : > { %v978_v39 = vmax.f32 %v5416_v50, %v5432_v25 }
 0x2d4   : > { %v5370_v54 = vpop.f32.mrf.mxu2  ;;  %v5372_v56 = vpop.f32.mrf.mxu3 }
 0x2d9   : > { %v5422_v51 = vpop.f32.mrf.mxu1 }
 0x2da   : > { %8508 = vst [vmem:[#allocation68_spill] sm:$0xff] %v5422_v51  ;;  %v5440_v11 = vpop.f32.mrf.mxu0 }
 0x2db   : > { %8510 = vst [vmem:[#allocation70_spill] sm:$0xff] %v5440_v11  ;;  %v979_v41 = vmax.f32 %v5424_v61, %v5440_v11 }
 0x2dc   : > { %v5376_v62 = vpop.f32.mrf.mxu2  ;;  %v5378_v59 = vpop.f32.mrf.mxu3 }
 0x2e1   : > { %v5430_v31 = vpop.f32.mrf.mxu1 }
 0x2e2   : > { %v5450_v37 = vpop.f32.mrf.mxu0 }
 0x2e3   : > { %8511 = vst [vmem:[#allocation71_spill] sm:$0xff] %v5450_v37  ;;  %v980_v38 = vmax.f32 %v978_v39, %v5450_v37 }
 0x2e4   : > { %v5382_v15 = vpop.f32.mrf.mxu2  ;;  %v5384_v58 = vpop.f32.mrf.mxu3 }
 0x2e5   : > { %8496 = vst [vmem:[#allocation56_spill] sm:$0xff] %v5384_v58  ;;  %v982_v30 = vmax.f32 %v980_v38, %v5296_v45 }
 0x2e7   : > { %v984_v29 = vmax.f32 %v982_v30, %v5312_v5 }
 0x2e9   : > { %v5438_v8 = vpop.f32.mrf.mxu1  ;;  %v986_v11 = vmax.f32 %v984_v29, %v5330_v13 }
 0x2ea   : > { %v5458_v42 = vpop.f32.mrf.mxu0 }
 0x2eb   : > { %8514 = vst [vmem:[#allocation74_spill] sm:$0xff] %v5458_v42  ;;  %v981_v3 = vmax.f32 %v979_v41, %v5458_v42  ;;  %v988_v41 = vmax.f32 %v986_v11, %v5344_v23 }
 0x2ec   : > { %v5390_v57 = vpop.f32.mrf.mxu2  ;;  %v5392_v16 = vpop.f32.mrf.mxu3 }
 0x2ed   : > { %8499 = vst [vmem:[#allocation59_spill] sm:$0xff] %v5390_v57  ;;  %v983_v32 = vmax.f32 %v981_v3, %v5302_v1  ;;  %v990_v38 = vmax.f32 %v988_v41, %v5362_v18 }
 0x2ef   : > { %v985_v28 = vmax.f32 %v983_v32, %v5320_v9  ;;  %v992_v30 = vmax.f32 %v990_v38, %v5376_v62 }
 0x2f1   : > { %v5446_v4 = vpop.f32.mrf.mxu1  ;;  %v987_v39 = vmax.f32 %v985_v28, %v5336_v20  ;;  %v994_v29 = vmax.f32 %v992_v30, %v5390_v57 }
 0x2f2   : > { %v1015_v38 = vmax.f32 %v5430_v31, %v5446_v4 }
 0x2f3   : > { %v989_v42 = vmax.f32 %v987_v39, %v5352_v55 }
 0x2f4   : > { %v5398_v22 = vpop.f32.mrf.mxu2  ;;  %v5400_v47 = vpop.f32.mrf.mxu3 }
 0x2f5   : > { %8502 = vst [vmem:[#allocation62_spill] sm:$0xff] %v5398_v22  ;;  %v991_v3 = vmax.f32 %v989_v42, %v5370_v54 }
 0x2f7   : > { %v993_v32 = vmax.f32 %v991_v3, %v5382_v15 }
 0x2f9   : > { %v5456_v34 = vpop.f32.mrf.mxu1  ;;  %v995_v28 = vmax.f32 %v993_v32, %v5398_v22 }
 0x2fa   : > { %8513 = vst [vmem:[#allocation73_spill] sm:$0xff] %v5456_v34  ;;  %v1016_v11 = vmax.f32 %v5438_v8, %v5456_v34 }
 0x2fc   : > { %v5406_v46 = vpop.f32.mrf.mxu2  ;;  %v5408_v17 = vpop.f32.mrf.mxu3 }
 0x2fd   : > { %8505 = vst [vmem:[#allocation65_spill] sm:$0xff] %v5406_v46  ;;  %v996_v39 = vmax.f32 %v994_v29, %v5406_v46 }
 0x301   : > { %v5474_v27 = vpop.f32.mrf.mxu1 }
 0x302   : > { %v1017_v22 = vmax.f32 %v1015_v38, %v5474_v27 }
 0x304   : > { %v5412_v43 = vpop.f32.mrf.mxu2  ;;  %v5414_v52 = vpop.f32.mrf.mxu3 }
 0x305   : > { %8507 = vst [vmem:[#allocation67_spill] sm:$0xff] %v5412_v43  ;;  %v997_v41 = vmax.f32 %v995_v28, %v5412_v43  ;;  %v1019_v43 = vmax.f32 %v1017_v22, %v5298_v63 }
 0x309   : > { %v5490_v20 = vpop.f32.mrf.mxu1 }
 0x30a   : > { %v1018_v3 = vmax.f32 %v1016_v11, %v5490_v20 }
 0x30c   : > { %v5418_v53 = vpop.f32.mrf.mxu2  ;;  %v5420_v49 = vpop.f32.mrf.mxu3  ;;  %v1020_v57 = vmax.f32 %v1018_v3, %v5304_v2 }
 0x30d   : > { %v998_v30 = vmax.f32 %v996_v39, %v5418_v53 }
 0x30e   : > { %v1022_v46 = vmax.f32 %v1020_v57, %v5322_v10 }
 0x310   : > { %v1024_v38 = vmax.f32 %v1022_v46, %v5338_v21 }
 0x312   : > { %v1026_v22 = vmax.f32 %v1024_v38, %v5354_v60 }
 0x314   : > { %v5426_v44 = vpop.f32.mrf.mxu2  ;;  %v5428_v48 = vpop.f32.mrf.mxu3 }
 0x315   : > { %v999_v32 = vmax.f32 %v997_v41, %v5426_v44  ;;  %v1021_v41 = vmax.f32 %v1019_v43, %v5314_v6  ;;  %v1028_v43 = vmax.f32 %v1026_v22, %v5372_v56 }
 0x31c   : > { %v5434_v19 = vpop.f32.mrf.mxu2  ;;  %v5436_v12 = vpop.f32.mrf.mxu3 }
 0x31d   : > { %8509 = vst [vmem:[#allocation69_spill] sm:$0xff] %v5434_v19  ;;  %v1000_v34 = vmax.f32 %v998_v30, %v5434_v19 }
 0x324   : > { %v5442_v7 = vpop.f32.mrf.mxu2  ;;  %v5444_v51 = vpop.f32.mrf.mxu3 }
 0x325   : > { %v1001_v29 = vmax.f32 %v999_v32, %v5442_v7  ;;  %v1023_v32 = vmax.f32 %v1021_v41, %v5332_v14 }
 0x32c   : > { %v5448_v0 = vpop.f32.mrf.mxu2  ;;  %v5452_v35 = vpop.f32.mrf.mxu3 }
 0x32d   : > { %v1002_v11 = vmax.f32 %v1000_v34, %v5448_v0 }
 0x334   : > { %v5454_v36 = vpop.f32.mrf.mxu2  ;;  %v5466_v40 = vpop.f32.mrf.mxu3 }
 0x335   : > { %8512 = vst [vmem:[#allocation72_spill] sm:$0xff] %v5454_v36  ;;  %v1003_v39 = vmax.f32 %v1001_v29, %v5454_v36  ;;  %v1025_v29 = vmax.f32 %v1023_v32, %v5346_v26 }
 0x337   : > { %v1027_v46 = vmax.f32 %v1025_v29, %v5364_v24 }
 0x339   : > { %v1029_v41 = vmax.f32 %v1027_v46, %v5378_v59 }
 0x33c   : > { %v5468_v33 = vpop.f32.mrf.mxu2  ;;  %v5484_v1 = vpop.f32.mrf.mxu3 }
 0x33d   : > { %v1004_v3 = vmax.f32 %v1002_v11, %v5468_v33  ;;  %v1030_v11 = vmax.f32 %v1028_v43, %v5384_v58 }
 0x33f   : > { %v1032_v38 = vmax.f32 %v1030_v11, %v5400_v47 }
 0x344   : > { %v5480_v37 = vpop.f32.mrf.mxu2  ;;  %v5507_v28 = vpop.f32.mrf.mxu3 }
 0x345   : > { %8515 = vst [vmem:[#allocation75_spill] sm:$0xff] %v5480_v37  ;;  %v1005_v30 = vmax.f32 %v1003_v39, %v5480_v37 }
 0x34c   : > { %v5496_v42 = vpop.f32.mrf.mxu2  ;;  %v5527_v37 = vpop.f32.mrf.mxu3 }
 0x34d   : > { %v1006_v57 = vmax.f32 %v1004_v3, %v5496_v42  ;;  %v1031_v3 = vmax.f32 %v1029_v41, %v5392_v16 }
 0x34f   : > { %v1033_v22 = vmax.f32 %v1031_v3, %v5408_v17 }
 0x351   : > { %v1035_v29 = vmax.f32 %v1033_v22, %v5420_v49 }
 0x353   : > { %v1037_v46 = vmax.f32 %v1035_v29, %v5436_v12 }
 0x354   : > { %v5517_v19 = vpop.f32.mrf.mxu2 }
 0x355   : > { %v1007_v34 = vmax.f32 %v1005_v30, %v5517_v19  ;;  %v1034_v30 = vmax.f32 %v1032_v38, %v5414_v52 }
 0x357   : > { %v1008_v36 = vmax.f32 %v1006_v57, %v1007_v34  ;;  %v1036_v57 = vmax.f32 %v1034_v30, %v5428_v48 }
 0x359   : > { %v1009_v39 = vrot.slane %v1008_v36, 4  ;;  %v1038_v43 = vmax.f32 %v1036_v57, %v5444_v51 }
 0x35b   : > { %v1010_v60 = vmax.f32 %v1008_v36, %v1009_v39  ;;  %v1040_v11 = vmax.f32 %v1038_v43, %v5466_v40  ;;  %v5539_v36 = vpop.f32.mrf.mxu3  ;;  %v1039_v39 = vmax.f32 %v1037_v46, %v5452_v35  ;;  %v8517_v43 = vld [vmem:[#allocation70_spill] sm:$0xff] }
 0x35c   : > { %8516 = vst [vmem:[#allocation76_spill] sm:$0xff] %v5539_v36 }
 0x35d   : > { %v1011_v32 = vrot.slane %v1010_v60, 2  ;;  %v1042_v41 = vmax.f32 %v1040_v11, %v5507_v28  ;;  %v1041_v3 = vmax.f32 %v1039_v39, %v5484_v1  ;;  %v8518_v11 = vld [vmem:[#allocation71_spill] sm:$0xff] }
 0x35f   : > { %v1012_v34 = vmax.f32 %v1010_v60, %v1011_v32  ;;  %v1044_v60 = vmax.f32 %v1042_v41, %v5539_v36  ;;  %v1043_v30 = vmax.f32 %v1041_v3, %v5527_v37 }
 0x361   : > { %v1013_v58 = vrot.slane %v1012_v34, 1  ;;  %v1045_v29 = vmax.f32 %v1043_v30, %v1044_v60 }
 0x363   : > { %v5543_v38 = vmax.f32 %v1012_v34, %v1013_v58  ;;  %v1046_v3 = vrot.slane %v1045_v29, 4 }
 0x365   : > { %v1052_v32 = vsub.f32 %v5416_v50, %v5543_v38  ;;  %v1054_v22 = vsub.f32 %v5424_v61, %v5543_v38  ;;  %v1056_v57 = vsub.f32 %v5432_v25, %v5543_v38  ;;  %v1058_v58 = vsub.f32 %v8517_v43, %v5543_v38  ;;  %v8519_v50 = vld [vmem:[#allocation74_spill] sm:$0xff] }
 0x366   : > { %v1060_v39 = vsub.f32 %v8518_v11, %v5543_v38  ;;  %v1062_v36 = vsub.f32 %v8519_v50, %v5543_v38  ;;  %v1064_v25 = vsub.f32 %v5296_v45, %v5543_v38  ;;  %v1047_v30 = vmax.f32 %v1045_v29, %v1046_v3 }
 0x367   : > { %v1116_v34 = vmul.f32 1.442695, %v1052_v32  ;;  %v1120_v46 = vmul.f32 1.442695, %v1054_v22  ;;  %v1124_v41 = vmul.f32 1.442695, %v1056_v57  ;;  %v1070_v29 = vsub.f32 %v5320_v9, %v5543_v38 }
 0x368   : > { %v1128_v61 = vmul.f32 1.442695, %v1058_v58  ;;  %v1132_v60 = vmul.f32 1.442695, %v1060_v39  ;;  %v8520_v32 = vld [vmem:[#allocation37_spill] sm:$0xff] }
 0x369   : > { %4393 = vpow2.f32 %v1116_v34  ;;  %v1066_v22 = vsub.f32 %v8520_v32, %v5543_v38  ;;  %v1136_v43 = vmul.f32 1.442695, %v1062_v36  ;;  %v1068_v34 = vsub.f32 %v5312_v5, %v5543_v38  ;;  %v8525_v32 = vld [vmem:[#allocation45_spill] sm:$0xff] }
 0x36a   : > { %4395 = vpow2.f32 %v1120_v46  ;;  %v1140_v58 = vmul.f32 1.442695, %v1064_v25  ;;  %v1048_v46 = vrot.slane %v1047_v30, 2  ;;  %v1072_v5 = vsub.f32 %v5330_v13, %v5543_v38 }
 0x36b   : > { %4397 = vpow2.f32 %v1124_v41  ;;  %v1144_v36 = vmul.f32 1.442695, %v1066_v22  ;;  %v1148_v50 = vmul.f32 1.442695, %v1068_v34  ;;  %v1152_v9 = vmul.f32 1.442695, %v1070_v29 }
 0x36c   : > { %4399 = vpow2.f32 %v1128_v61  ;;  %v1049_v25 = vmax.f32 %v1047_v30, %v1048_v46  ;;  %v1156_v13 = vmul.f32 1.442695, %v1072_v5  ;;  %v1078_v46 = vsub.f32 %v5352_v55, %v5543_v38 }
 0x36d   : > { %4401 = vpow2.f32 %v1132_v60  ;;  %v1082_v55 = vsub.f32 %v5370_v54, %v5543_v38 }
 0x36e   : > { %4403 = vpow2.f32 %v1136_v43 }
 0x36f   : > { %v5564_v11 = vpop.eup %4393  ;;  %4405 = vpow2.f32 %v1140_v58  ;;  %v1050_v58 = vrot.slane %v1049_v25, 1 }
 0x370   : > { %8521 = vst [vmem:[#allocation70_spill] sm:$0xff] %v5564_v11  ;;  %v5566_v57 = vpop.eup %4395  ;;  %4407 = vpow2.f32 %v1144_v36 }
 0x371   : > { %8522 = vst [vmem:[#allocation71_spill] sm:$0xff] %v5566_v57  ;;  %v1244_v45 = vadd.f32 %v5566_v57, %v5564_v11  ;;  %v5572_v39 = vpop.eup %4397  ;;  %v1074_v57 = vsub.f32 %v8525_v32, %v5543_v38  ;;  %4409 = vpow2.f32 %v1148_v50  ;;  %v5602_v50 = vmax.f32 %v1049_v25, %v1050_v58  ;;  %v8529_v11 = vld [vmem:[#allocation65_spill] sm:$0xff] }
 0x372   : > { %8523 = vst [vmem:[#allocation74_spill] sm:$0xff] %v5572_v39  ;;  %v5577_v3 = vpop.eup %4399  ;;  %4411 = vpow2.f32 %v1152_v9  ;;  %v1084_v9 = vsub.f32 %v5376_v62, %v5543_v38  ;;  %v1176_v58 = vmul.f32 1.442695, %v1082_v55 }
 0x373   : > { %v1245_v41 = vadd.f32 %v5572_v39, %v1244_v45  ;;  %8524 = vst [vmem:[#allocation37_spill] sm:$0xff] %v5577_v3  ;;  %v5582_v60 = vpop.eup %4401  ;;  %v1076_v45 = vsub.f32 %v5344_v23, %v5543_v38  ;;  %v1160_v36 = vmul.f32 1.442695, %v1074_v57  ;;  %4413 = vpow2.f32 %v1156_v13 }
 0x374   : > { %v5587_v43 = vpop.eup %4403  ;;  %v1168_v57 = vmul.f32 1.442695, %v1078_v46  ;;  %v1053_v13 = vsub.f32 %v5430_v31, %v5602_v50  ;;  %v1055_v62 = vsub.f32 %v5438_v8, %v5602_v50  ;;  %v8526_v46 = vld [vmem:[#allocation59_spill] sm:$0xff]  ;;  %v1057_v31 = vsub.f32 %v5446_v4, %v5602_v50 }
 0x375   : > { %v1246_v61 = vadd.f32 %v5577_v3, %v1245_v41  ;;  %v5592_v30 = vpop.eup %4405  ;;  %v1164_v23 = vmul.f32 1.442695, %v1076_v45  ;;  %4415 = vpow2.f32 %v1160_v36  ;;  %v1088_v36 = vsub.f32 %v8526_v46, %v5543_v38 }
 0x376   : > { %v5597_v41 = vpop.eup %4407 }
 0x377   : > { %v1247_v22 = vadd.f32 %v5582_v60, %v1246_v61  ;;  %v1080_v61 = vsub.f32 %v5362_v18, %v5543_v38  ;;  %v5604_v32 = vpop.eup %4409  ;;  %v1086_v18 = vsub.f32 %v5382_v15, %v5543_v38  ;;  %4417 = vpow2.f32 %v1164_v23 }
 0x378   : > { %4419 = vpow2.f32 %v1168_v57 }
 0x379   : > { %v1248_v34 = vadd.f32 %v5587_v43, %v1247_v22  ;;  %v1172_v25 = vmul.f32 1.442695, %v1080_v61  ;;  %v1184_v61 = vmul.f32 1.442695, %v1086_v18  ;;  %v1188_v18 = vmul.f32 1.442695, %v1088_v36 }
 0x37b   : > { %v1249_v29 = vadd.f32 %v5592_v30, %v1248_v34  ;;  %v5611_v34 = vpop.eup %4411  ;;  %4421 = vpow2.f32 %v1172_v25  ;;  %v1092_v25 = vsub.f32 %v8529_v11, %v5543_v38  ;;  %v1063_v11 = vsub.f32 %v5490_v20, %v5602_v50 }
 0x37c   : > { %v5618_v54 = vpop.eup %4413  ;;  %4423 = vpow2.f32 %v1176_v58  ;;  %v8530_v58 = vld [vmem:[#allocation67_spill] sm:$0xff]  ;;  %v1098_v20 = vsub.f32 %v5426_v44, %v5543_v38 }
 0x37d   : > { %v1250_v5 = vadd.f32 %v5597_v41, %v1249_v29  ;;  %v1180_v29 = vmul.f32 1.442695, %v1084_v9  ;;  %v5625_v23 = vpop.eup %4415  ;;  %v8528_v9 = vld [vmem:[#allocation73_spill] sm:$0xff] }
 0x37e   : > { %v5632_v8 = vpop.eup %4417  ;;  %v1059_v46 = vsub.f32 %v8528_v9, %v5602_v50 }
 0x37f   : > { %v1251_v22 = vadd.f32 %v5604_v32, %v1250_v5  ;;  %v8527_v5 = vld [vmem:[#allocation62_spill] sm:$0xff]  ;;  %4425 = vpow2.f32 %v1180_v29  ;;  %v5639_v3 = vpop.eup %4419  ;;  %v1096_v29 = vsub.f32 %v5418_v53, %v5543_v38 }
 0x380   : > { %v1090_v57 = vsub.f32 %v8527_v5, %v5543_v38  ;;  %4427 = vpow2.f32 %v1184_v61  ;;  %v1094_v5 = vsub.f32 %v8530_v58, %v5543_v38  ;;  %v1130_v36 = vmul.f32 1.442695, %v1059_v46 }
 0x381   : > { %v1252_v45 = vadd.f32 %v5611_v34, %v1251_v22  ;;  %v1118_v22 = vmul.f32 1.442695, %v1053_v13  ;;  %v1061_v13 = vsub.f32 %v5474_v27, %v5602_v50  ;;  %v5646_v9 = vpop.eup %4421  ;;  %v1196_v27 = vmul.f32 1.442695, %v1092_v25 }
 0x382   : > { %v1192_v39 = vmul.f32 1.442695, %v1090_v57  ;;  %v1065_v57 = vsub.f32 %v5298_v63, %v5602_v50  ;;  %v1200_v46 = vmul.f32 1.442695, %v1094_v5  ;;  %v1067_v25 = vsub.f32 %v5304_v2, %v5602_v50  ;;  %v8532_v63 = vld [vmem:[#allocation69_spill] sm:$0xff] }
 0x383   : > { %v1253_v15 = vadd.f32 %v5618_v54, %v1252_v45  ;;  %v1122_v45 = vmul.f32 1.442695, %v1055_v62  ;;  %4429 = vpow2.f32 %v1118_v22  ;;  %v1102_v58 = vsub.f32 %v5442_v7, %v5543_v38 }
 0x384   : > { %v1069_v5 = vsub.f32 %v5314_v6, %v5602_v50  ;;  %v1142_v2 = vmul.f32 1.442695, %v1065_v57  ;;  %v1071_v7 = vsub.f32 %v5322_v10, %v5602_v50  ;;  %v1146_v6 = vmul.f32 1.442695, %v1067_v25 }
 0x385   : > { %v1254_v55 = vadd.f32 %v5625_v23, %v1253_v15  ;;  %v1126_v15 = vmul.f32 1.442695, %v1057_v31  ;;  %4431 = vpow2.f32 %v1122_v45  ;;  %v5653_v31 = vpop.eup %4423  ;;  %v1216_v25 = vmul.f32 1.442695, %v1102_v58 }
 0x386   : > { %4433 = vpow2.f32 %v1188_v18  ;;  %v5657_v22 = vpop.eup %4425  ;;  %v1138_v18 = vmul.f32 1.442695, %v1063_v11  ;;  %v1208_v11 = vmul.f32 1.442695, %v1098_v20  ;;  %v1150_v10 = vmul.f32 1.442695, %v1069_v5 }
 0x387   : > { %v1255_v4 = vadd.f32 %v5632_v8, %v1254_v55  ;;  %4435 = vpow2.f32 %v1126_v15  ;;  %v1134_v55 = vmul.f32 1.442695, %v1061_v13  ;;  %v5662_v45 = vpop.eup %4427  ;;  %v1100_v13 = vsub.f32 %v8532_v63, %v5543_v38  ;;  %v8536_v63 = vld [vmem:[#allocation72_spill] sm:$0xff] }
 0x388   : > { %4437 = vpow2.f32 %v1192_v39  ;;  %v1204_v15 = vmul.f32 1.442695, %v1096_v29 }
 0x389   : > { %v1256_v62 = vadd.f32 %v5639_v3, %v1255_v4  ;;  %4439 = vpow2.f32 %v1130_v36  ;;  %v5666_v4 = vpop.eup %4429 }
 0x38a   : > { %8531 = vst [vmem:[#allocation45_spill] sm:$0xff] %v5666_v4  ;;  %4441 = vpow2.f32 %v1196_v27 }
 0x38b   : > { %v1257_v61 = vadd.f32 %v5646_v9, %v1256_v62  ;;  %v5671_v39 = vpop.eup %4431  ;;  %4443 = vpow2.f32 %v1134_v55  ;;  %v1212_v55 = vmul.f32 1.442695, %v1100_v13 }
 0x38c   : > { %8533 = vst [vmem:[#allocation59_spill] sm:$0xff] %v5671_v39  ;;  %v5677_v62 = vpop.eup %4433  ;;  %4445 = vpow2.f32 %v1200_v46  ;;  %v1281_v29 = vadd.f32 %v5671_v39, %v5666_v4 }
 0x38d   : > { %v1258_v53 = vadd.f32 %v5653_v31, %v1257_v61  ;;  %v5682_v27 = vpop.eup %4435  ;;  %v1104_v61 = vsub.f32 %v5448_v0, %v5543_v38  ;;  %4447 = vpow2.f32 %v1138_v18  ;;  %v1073_v0 = vsub.f32 %v5332_v14, %v5602_v50 }
 0x38e   : > { %8534 = vst [vmem:[#allocation62_spill] sm:$0xff] %v5682_v27  ;;  %v5688_v57 = vpop.eup %4437  ;;  %4449 = vpow2.f32 %v1204_v15  ;;  %v1282_v46 = vadd.f32 %v5682_v27, %v1281_v29  ;;  %v1108_v29 = vsub.f32 %v5468_v33, %v5543_v38  ;;  %v1154_v14 = vmul.f32 1.442695, %v1071_v7 }
 0x38f   : > { %v1259_v44 = vadd.f32 %v5657_v22, %v1258_v53  ;;  %v5692_v53 = vpop.eup %4439  ;;  %4451 = vpow2.f32 %v1142_v2  ;;  %v1220_v5 = vmul.f32 1.442695, %v1104_v61  ;;  %v1077_v33 = vsub.f32 %v5346_v26, %v5602_v50 }
 0x390   : > { %8535 = vst [vmem:[#allocation73_spill] sm:$0xff] %v5692_v53  ;;  %v5698_v18 = vpop.eup %4441  ;;  %4453 = vpow2.f32 %v1208_v11  ;;  %v1283_v15 = vadd.f32 %v5692_v53, %v1282_v46  ;;  %v8539_v46 = vld [vmem:[#allocation75_spill] sm:$0xff] }
 0x391   : > { %v1260_v36 = vadd.f32 %v5662_v45, %v1259_v44  ;;  %v1106_v44 = vsub.f32 %v8536_v63, %v5543_v38  ;;  %v1075_v63 = vsub.f32 %v5338_v21, %v5602_v50  ;;  %4455 = vpow2.f32 %v1146_v6 }
 0x392   : > { %4457 = vpow2.f32 %v1212_v55  ;;  %v1110_v39 = vsub.f32 %v8539_v46, %v5543_v38  ;;  %v1158_v21 = vmul.f32 1.442695, %v1073_v0  ;;  %v8541_v46 = vld [vmem:[#allocation49_spill] sm:$0xff]  ;;  %v1228_v0 = vmul.f32 1.442695, %v1108_v29 }
 0x393   : > { %v1261_v20 = vadd.f32 %v5677_v62, %v1260_v36  ;;  %v5702_v36 = vpop.eup %4443  ;;  %4459 = vpow2.f32 %v1150_v10  ;;  %v1224_v7 = vmul.f32 1.442695, %v1106_v44  ;;  %v1079_v4 = vsub.f32 %v8541_v46, %v5602_v50 }
 0x394   : > { %8537 = vst [vmem:[#allocation65_spill] sm:$0xff] %v5702_v36  ;;  %v5708_v2 = vpop.eup %4445  ;;  %v1284_v11 = vadd.f32 %v5702_v36, %v1283_v15  ;;  %4461 = vpow2.f32 %v1216_v25  ;;  %v1112_v15 = vsub.f32 %v5496_v42, %v5543_v38  ;;  %v1162_v26 = vmul.f32 1.442695, %v1075_v63 }
 0x395   : > { %v1262_v13 = vadd.f32 %v5688_v57, %v1261_v20  ;;  %v5712_v20 = vpop.eup %4447  ;;  %4463 = vpow2.f32 %v1154_v14  ;;  %v1081_v42 = vsub.f32 %v5364_v24, %v5602_v50  ;;  %v1166_v46 = vmul.f32 1.442695, %v1077_v33 }
 0x396   : > { %8538 = vst [vmem:[#allocation67_spill] sm:$0xff] %v5712_v20  ;;  %v5718_v6 = vpop.eup %4449  ;;  %v1285_v55 = vadd.f32 %v5712_v20, %v1284_v11  ;;  %4465 = vpow2.f32 %v1220_v5  ;;  %v1114_v11 = vsub.f32 %v5517_v19, %v5543_v38  ;;  %v1232_v63 = vmul.f32 1.442695, %v1110_v39 }
 0x397   : > { %v1263_v58 = vadd.f32 %v5698_v18, %v1262_v13  ;;  %v5722_v13 = vpop.eup %4451  ;;  %4467 = vpow2.f32 %v1158_v21  ;;  %v1170_v19 = vmul.f32 1.442695, %v1079_v4  ;;  %v1236_v24 = vmul.f32 1.442695, %v1112_v15 }
 0x398   : > { %8540 = vst [vmem:[#allocation69_spill] sm:$0xff] %v5722_v13  ;;  %v5728_v10 = vpop.eup %4453  ;;  %v1286_v25 = vadd.f32 %v5722_v13, %v1285_v55  ;;  %4469 = vpow2.f32 %v1224_v7  ;;  %v1083_v55 = vsub.f32 %v5372_v56, %v5602_v50  ;;  %v1085_v7 = vsub.f32 %v5378_v59, %v5602_v50 }
 0x399   : > { %v1264_v61 = vadd.f32 %v5708_v2, %v1263_v58  ;;  %v5732_v58 = vpop.eup %4455  ;;  %4471 = vpow2.f32 %v1162_v26  ;;  %v1240_v56 = vmul.f32 1.442695, %v1114_v11  ;;  %v1089_v11 = vsub.f32 %v5392_v16, %v5602_v50 }
 0x39a   : > { %8542 = vst [vmem:[#allocation72_spill] sm:$0xff] %v5732_v58  ;;  %v5738_v14 = vpop.eup %4457  ;;  %v1287_v5 = vadd.f32 %v5732_v58, %v1286_v25  ;;  %4473 = vpow2.f32 %v1228_v0  ;;  %v8543_v0 = vld [vmem:[#allocation56_spill] sm:$0xff] }
 0x39b   : > { %v1265_v44 = vadd.f32 %v5718_v6, %v1264_v61  ;;  %v5742_v61 = vpop.eup %4459  ;;  %4475 = vpow2.f32 %v1166_v46 }
 0x39c   : > { %v5746_v38 = vpop.eup %4461  ;;  %v1288_v21 = vadd.f32 %v5742_v61, %v1287_v5  ;;  %4477 = vpow2.f32 %v1232_v63  ;;  %v1178_v5 = vmul.f32 1.442695, %v1083_v55  ;;  %v1182_v63 = vmul.f32 1.442695, %v1085_v7 }
 0x39d   : > { %v1266_v29 = vadd.f32 %v5728_v10, %v1265_v44  ;;  %v5750_v39 = vpop.eup %4463  ;;  %v1174_v44 = vmul.f32 1.442695, %v1081_v42  ;;  %4479 = vpow2.f32 %v1170_v19 }
 0x39e   : > { %v5754_v25 = vpop.eup %4465  ;;  %v1289_v26 = vadd.f32 %v5750_v39, %v1288_v21  ;;  %4481 = vpow2.f32 %v1236_v24  ;;  %v1091_v24 = vsub.f32 %v5400_v47, %v5602_v50 }
 0x39f   : > { %v1267_v33 = vadd.f32 %v5738_v14, %v1266_v29  ;;  %v5758_v15 = vpop.eup %4467  ;;  %v1087_v29 = vsub.f32 %v8543_v0, %v5602_v50  ;;  %4483 = vpow2.f32 %v1174_v44  ;;  %v1190_v0 = vmul.f32 1.442695, %v1089_v11 }
 0x3a0   : > { %v5762_v53 = vpop.eup %4469  ;;  %v1290_v42 = vadd.f32 %v5758_v15, %v1289_v26  ;;  %4485 = vpow2.f32 %v1240_v56  ;;  %v1093_v56 = vsub.f32 %v5408_v17, %v5602_v50 }
 0x3a1   : > { %v1268_v4 = vadd.f32 %v5746_v38, %v1267_v33  ;;  %v5766_v46 = vpop.eup %4471  ;;  %4487 = vpow2.f32 %v1178_v5  ;;  %v1095_v5 = vsub.f32 %v5414_v52, %v5602_v50 }
 0x3a2   : > { %v5770_v33 = vpop.eup %4473  ;;  %v1291_v55 = vadd.f32 %v5766_v46, %v1290_v42  ;;  %4489 = vpow2.f32 %v1182_v63  ;;  %v1097_v63 = vsub.f32 %v5420_v49, %v5602_v50  ;;  %v1101_v49 = vsub.f32 %v5436_v12, %v5602_v50 }
 0x3a3   : > { %v1269_v59 = vadd.f32 %v5754_v25, %v1268_v4  ;;  %v5774_v21 = vpop.eup %4475  ;;  %v1186_v4 = vmul.f32 1.442695, %v1087_v29  ;;  %v1105_v12 = vsub.f32 %v5452_v35, %v5602_v50  ;;  %v1111_v35 = vsub.f32 %v5507_v28, %v5602_v50 }
 0x3a4   : > { %v5778_v26 = vpop.eup %4477  ;;  %v1292_v7 = vadd.f32 %v5774_v21, %v1291_v55 }
 0x3a5   : > { %v1270_v19 = vadd.f32 %v5762_v53, %v1269_v59  ;;  %v5782_v44 = vpop.eup %4479  ;;  %4491 = vpow2.f32 %v1186_v4  ;;  %v1202_v4 = vmul.f32 1.442695, %v1095_v5  ;;  %v1234_v28 = vmul.f32 1.442695, %v1111_v35 }
 0x3a6   : > { %v5786_v59 = vpop.eup %4481  ;;  %v1293_v47 = vadd.f32 %v5782_v44, %v1292_v7  ;;  %4493 = vpow2.f32 %v1190_v0 }
 0x3a7   : > { %v1271_v16 = vadd.f32 %v5770_v33, %v1270_v19  ;;  %v5790_v29 = vpop.eup %4483  ;;  %v1194_v19 = vmul.f32 1.442695, %v1091_v24  ;;  %v1099_v24 = vsub.f32 %v5428_v48, %v5602_v50  ;;  %v1103_v48 = vsub.f32 %v5444_v51, %v5602_v50 }
 0x3a8   : > { %v5794_v55 = vpop.eup %4485  ;;  %v1294_v17 = vadd.f32 %v5790_v29, %v1293_v47  ;;  %v1107_v51 = vsub.f32 %v5466_v40, %v5602_v50 }
 0x3a9   : > { %v1272_v42 = vadd.f32 %v5778_v26, %v1271_v16  ;;  %v5798_v11 = vpop.eup %4487  ;;  %v1198_v16 = vmul.f32 1.442695, %v1093_v56  ;;  %4495 = vpow2.f32 %v1194_v19  ;;  %v1206_v56 = vmul.f32 1.442695, %v1097_v63 }
 0x3aa   : > { %v1295_v20 = vadd.f32 %v5798_v11, %v1294_v17  ;;  %v5804_v52 = vpop.eup %4489  ;;  %v1210_v5 = vmul.f32 1.442695, %v1099_v24  ;;  %v1214_v63 = vmul.f32 1.442695, %v1101_v49  ;;  %v1218_v24 = vmul.f32 1.442695, %v1103_v48 }
 0x3ab   : > { %v1273_v27 = vadd.f32 %v5786_v59, %v1272_v42  ;;  %v5809_v36 = vpop.eup %4491  ;;  %4497 = vpow2.f32 %v1198_v16  ;;  %v1222_v49 = vmul.f32 1.442695, %v1105_v12  ;;  %v8544_v12 = vld [vmem:[#allocation76_spill] sm:$0xff] }
 0x3ac   : > { %v1296_v47 = vadd.f32 %v5804_v52, %v1295_v20  ;;  %v5814_v17 = vpop.eup %4493  ;;  %4499 = vpow2.f32 %v1202_v4 }
 0x3ad   : > { %v1274_v7 = vadd.f32 %v5794_v55, %v1273_v27  ;;  %4501 = vpow2.f32 %v1206_v56 }
 0x3ae   : > { %v1297_v0 = vadd.f32 %v5809_v36, %v1296_v47  ;;  %4503 = vpow2.f32 %v1210_v5  ;;  %v1109_v47 = vsub.f32 %v5484_v1, %v5602_v50  ;;  %v1226_v5 = vmul.f32 1.442695, %v1107_v51 }
 0x3af   : > { %v1275_v42 = vrot.slane %v1274_v7, 4  ;;  %v5819_v58 = vpop.eup %4495  ;;  %4505 = vpow2.f32 %v1214_v63  ;;  %v1115_v63 = vsub.f32 %v8544_v12, %v5602_v50 }
 0x3b0   : > { %v1298_v20 = vadd.f32 %v5814_v17, %v1297_v0  ;;  %4507 = vpow2.f32 %v1218_v24  ;;  %v1230_v1 = vmul.f32 1.442695, %v1109_v47 }
 0x3b1   : > { %v1276_v27 = vadd.f32 %v1275_v42, %v1274_v7  ;;  %v5824_v42 = vpop.eup %4497  ;;  %v1242_v47 = vmul.f32 1.442695, %v1115_v63 }
 0x3b2   : > { %v1299_v7 = vadd.f32 %v5819_v58, %v1298_v20  ;;  %v5831_v13 = vpop.eup %4499 }
 0x3b3   : > { %v1277_v19 = vrot.slane %v1276_v27, 2  ;;  %v5838_v48 = vpop.eup %4501 }
 0x3b4   : > { %v1300_v0 = vadd.f32 %v5824_v42, %v1299_v7  ;;  %v5841_v20 = vpop.eup %4503 }
 0x3b5   : > { %v1278_v16 = vadd.f32 %v1277_v19, %v1276_v27  ;;  %v1113_v27 = vsub.f32 %v5527_v37, %v5602_v50  ;;  %v5846_v7 = vpop.eup %4505 }
 0x3b6   : > { %v1301_v40 = vadd.f32 %v5831_v13, %v1300_v0  ;;  %v5849_v24 = vpop.eup %4507 }
 0x3b7   : > { %v1279_v4 = vrot.slane %v1278_v16, 1 }
 0x3b8   : > { %v1302_v19 = vadd.f32 %v5838_v48, %v1301_v40 }
 0x3b9   : > { %v1280_v56 = vadd.f32 %v1279_v4, %v1278_v16  ;;  %v1238_v16 = vmul.f32 1.442695, %v1113_v27 }
 0x3ba   : > { %v1303_v37 = vadd.f32 %v5841_v20, %v1302_v19 }
 0x3bb   : > { %4509 = vrcp.f32 %v1280_v56 }
 0x3bc   : > { %4511 = vpow2.f32 %v1222_v49  ;;  %v1304_v51 = vadd.f32 %v5846_v7, %v1303_v37 }
 0x3bd   : > { %4513 = vpow2.f32 %v1226_v5 }
 0x3be   : > { %4515 = vpow2.f32 %v1230_v1  ;;  %v1305_v0 = vadd.f32 %v5849_v24, %v1304_v51 }
 0x3bf   : > { %4517 = vpow2.f32 %v1234_v28 }
 0x3c0   : > { %4519 = vpow2.f32 %v1238_v16 }
 0x3c1   : > { %v5851_v4 = vpop.eup %4509  ;;  %4521 = vpow2.f32 %v1242_v47 }
 0x3c2   : > { %v5854_v35 = vpop.eup %4511  ;;  %v1348_v50 = vmul.f32 %v5851_v4, %v5646_v9  ;;  %v1350_v49 = vmul.f32 %v5851_v4, %v5653_v31  ;;  %v1380_v56 = vmul.f32 %v5851_v4, %v5786_v59  ;;  %v1382_v27 = vmul.f32 %v5851_v4, %v5794_v55 }
 0x3c3   : > { %v1306_v40 = vadd.f32 %v5854_v35, %v1305_v0  ;;  %v1344_v5 = vmul.f32 %v5851_v4, %v5632_v8  ;;  %v1346_v1 = vmul.f32 %v5851_v4, %v5639_v3  ;;  %v1376_v9 = vmul.f32 %v5851_v4, %v5770_v33  ;;  %v5871_v19 = vpop.eup %4513 }
 0x3c4   : > { %v1402_v31 = vpack.c.bf16 %v1350_v49, %v1348_v50  ;;  %v1418_v28 = vpack.c.bf16 %v1382_v27, %v1380_v56  ;;  %v1378_v59 = vmul.f32 %v5851_v4, %v5778_v26  ;;  %v1340_v55 = vmul.f32 %v5851_v4, %v5618_v54  ;;  %v5877_v12 = vpop.eup %4515 }
 0x3c5   : > { %v1307_v8 = vadd.f32 %v5871_v19, %v1306_v40  ;;  %v1400_v63 = vpack.c.bf16 %v1346_v1, %v1344_v5  ;;  %v1342_v3 = vmul.f32 %v5851_v4, %v5625_v23  ;;  %v1372_v33 = vmul.f32 %v5851_v4, %v5754_v25  ;;  %v5884_v16 = vpop.eup %4517 }
 0x3c6   : > { %1420 = vmatpush.bf16.msrb.mxu2 %v1402_v31  ;;  %1439 = vmatpush.bf16.msrb.mxu3 %v1418_v28  ;;  %v1416_v26 = vpack.c.bf16 %v1378_v59, %v1376_v9  ;;  %v1374_v54 = vmul.f32 %v5851_v4, %v5762_v53  ;;  %v5888_v37 = vpop.eup %4519  ;;  %v1336_v47 = vmul.f32 %v5851_v4, %v5604_v32 }
 0x3c7   : > { %v1308_v51 = vadd.f32 %v5877_v12, %v1307_v8  ;;  %v1398_v0 = vpack.c.bf16 %v1342_v3, %v1340_v55  ;;  %v1338_v49 = vmul.f32 %v5851_v4, %v5611_v34  ;;  %v1360_v53 = vmul.f32 %v5851_v4, %v5698_v18  ;;  %v4522_v56 = vpop.eup %4521 }
 0x3c8   : > { %v1414_v50 = vpack.c.bf16 %v1374_v54, %v1372_v33  ;;  %v1368_v27 = vmul.f32 %v5851_v4, %v5738_v14  ;;  %v1370_v40 = vmul.f32 %v5851_v4, %v5746_v38  ;;  %v1362_v5 = vmul.f32 %v5851_v4, %v5708_v2  ;;  %v8545_v54 = vld [vmem:[#allocation74_spill] sm:$0xff] }
 0x3c9   : > { %v1309_v23 = vadd.f32 %v5884_v16, %v1308_v51  ;;  %v1356_v1 = vmul.f32 %v5851_v4, %v5677_v62  ;;  %v1358_v34 = vmul.f32 %v5851_v4, %v5688_v57  ;;  %v1332_v18 = vmul.f32 %v5851_v4, %v5592_v30  ;;  %v8546_v51 = vld [vmem:[#allocation37_spill] sm:$0xff] }
 0x3ca   : > { %1421 = vmatpush.bf16.msrb.mxu2 %v1400_v63  ;;  %1440 = vmatpush.bf16.msrb.mxu3 %v1416_v26  ;;  %v1334_v14 = vmul.f32 %v5851_v4, %v5597_v41  ;;  %v1408_v9 = vpack.c.bf16 %v1362_v5, %v1360_v53  ;;  %v1352_v2 = vmul.f32 %v5851_v4, %v5657_v22 }
 0x3cb   : > { %v1310_v25 = vadd.f32 %v5888_v37, %v1309_v23  ;;  %v1406_v31 = vpack.c.bf16 %v1358_v34, %v1356_v1  ;;  %v1354_v62 = vmul.f32 %v5851_v4, %v5662_v45  ;;  %v1396_v28 = vpack.c.bf16 %v1338_v49, %v1336_v47  ;;  %v8551_v34 = vld [vmem:[#allocation31_spill] sm:$0xff] }
 0x3cc   : > { %v1412_v59 = vpack.c.bf16 %v1370_v40, %v1368_v27  ;;  %v1364_v57 = vmul.f32 %v5851_v4, %v5718_v6  ;;  %v1366_v30 = vmul.f32 %v5851_v4, %v5728_v10  ;;  %v1394_v63 = vpack.c.bf16 %v1334_v14, %v1332_v18  ;;  %v8549_v27 = vld [vmem:[#allocation29_spill] sm:$0xff]  ;;  %v8550_v40 = vld [vmem:[#allocation30_spill] sm:$0xff] }
 0x3cd   : > { %v1311_v32 = vadd.f32 %v4522_v56, %v1310_v25  ;;  %v1404_v8 = vpack.c.bf16 %v1354_v62, %v1352_v2  ;;  %v1328_v22 = vmul.f32 %v5851_v4, %v5582_v60  ;;  %v1330_v45 = vmul.f32 %v5851_v4, %v5587_v43  ;;  %v8547_v60 = vld [vmem:[#allocation70_spill] sm:$0xff]  ;;  %v8548_v43 = vld [vmem:[#allocation71_spill] sm:$0xff]  ;;  %v8552_v18 = vld [vmem:[#allocation33_spill] sm:$0xff] }
 0x3ce   : > { %1422 = vmatpush.bf16.msrb.mxu2 %v1398_v0  ;;  %1441 = vmatpush.bf16.msrb.mxu3 %v1414_v50  ;;  %v1410_v3 = vpack.c.bf16 %v1366_v30, %v1364_v57  ;;  %v1324_v10 = vmul.f32 %v5851_v4, %v8545_v54  ;;  %v1326_v0 = vmul.f32 %v5851_v4, %v8546_v51  ;;  %v8559_v51 = vld [vmem:[#allocation65_spill] sm:$0xff] }
 0x3cf   : > { %v1312_v38 = vrot.slane %v1311_v32, 4  ;;  %v1392_v26 = vpack.c.bf16 %v1330_v45, %v1328_v22  ;;  %v1320_v25 = vmul.f32 %v5851_v4, %v8547_v60  ;;  %v1322_v47 = vmul.f32 %v5851_v4, %v8548_v43  ;;  %v8556_v45 = vld [vmem:[#allocation34_spill] sm:$0xff]  ;;  %v8562_v43 = vld [vmem:[#allocation73_spill] sm:$0xff] }
 0x3d0   : > { %v1390_v23 = vpack.c.bf16 %v1326_v0, %v1324_v10  ;;  %v5937_v5 = vpack.c.bf16 %v8550_v40, %v8549_v27  ;;  %v5947_v14 = vpack.c.bf16 %v8552_v18, %v8551_v34  ;;  %v8563_v27 = vld [vmem:[#allocation45_spill] sm:$0xff]  ;;  %v8566_v18 = vld [vmem:[#allocation11_spill] sm:$0xff] }
 0x3d1   : > { %v1313_v55 = vadd.f32 %v1312_v38, %v1311_v32  ;;  %v1388_v49 = vpack.c.bf16 %v1322_v47, %v1320_v25  ;;  %v8565_v34 = vld [vmem:[#allocation9_spill] sm:$0xff] }
 0x3d2   : > { %1423 = vmatpush.bf16.msrb.mxu2 %v1396_v28  ;;  %1442 = vmatpush.bf16.msrb.mxu3 %v1412_v59 }
 0x3d3   : > { %v1314_v41 = vrot.slane %v1313_v55, 2 }
 0x3d5   : > { %v1315_v33 = vadd.f32 %v1314_v41, %v1313_v55 }
 0x3d6   : > { %1424 = vmatpush.bf16.msrb.mxu2 %v1394_v63  ;;  %1443 = vmatpush.bf16.msrb.mxu3 %v1410_v3  ;;  %v8554_v3 = vld [vmem:[#allocation72_spill] sm:$0xff] }
 0x3d7   : > { %v1316_v6 = vrot.slane %v1315_v33, 1 }
 0x3d9   : > { %v1317_v50 = vadd.f32 %v1316_v6, %v1315_v33  ;;  %v8557_v6 = vld [vmem:[#allocation35_spill] sm:$0xff] }
 0x3da   : > { %1425 = vmatpush.bf16.msrb.mxu2 %v1392_v26  ;;  %1444 = vmatpush.bf16.msrb.mxu3 %v1408_v9  ;;  %v8558_v26 = vld [vmem:[#allocation38_spill] sm:$0xff] }
 0x3db   : > { %4523 = vrcp.f32 %v1317_v50  ;;  %v1387_v54 = vpack.c.bf16 %v8558_v26, %v8557_v6  ;;  %v8560_v50 = vld [vmem:[#allocation67_spill] sm:$0xff] }
 0x3de   : > { %1426 = vmatpush.bf16.msrb.mxu2 %v1390_v23  ;;  %1445 = vmatpush.bf16.msrb.mxu3 %v1406_v31 }
 0x3e1   : > { %v5933_v53 = vpop.eup %4523 }
 0x3e2   : > { %1427 = vmatpush.bf16.msrb.mxu2 %v1388_v49  ;;  %1446 = vmatpush.bf16.msrb.mxu3 %v1404_v8  ;;  %v1349_v1 = vmul.f32 %v5933_v53, %v5790_v29  ;;  %v1351_v32 = vmul.f32 %v5933_v53, %v5798_v11  ;;  %v1381_v4 = vmul.f32 %v5933_v53, %v5888_v37 }
 0x3e3   : > { %v1383_v9 = vmul.f32 %v5933_v53, %v4522_v56  ;;  %v1345_v38 = vmul.f32 %v5933_v53, %v5774_v21  ;;  %v1347_v31 = vmul.f32 %v5933_v53, %v5782_v44  ;;  %v1377_v29 = vmul.f32 %v5933_v53, %v5877_v12 }
 0x3e4   : > { %v1403_v2 = vpack.c.bf16 %v1351_v32, %v1349_v1  ;;  %v1341_v11 = vmul.f32 %v5933_v53, %v5758_v15  ;;  %v1343_v37 = vmul.f32 %v5933_v53, %v5766_v46  ;;  %v1379_v21 = vmul.f32 %v5933_v53, %v5884_v16  ;;  %v8564_v1 = vld [vmem:[#allocation59_spill] sm:$0xff] }
 0x3e5   : > { %v1419_v62 = vpack.c.bf16 %v1383_v9, %v1381_v4  ;;  %1428 = vmatmul.bf16.vlgmr.msrb.gmra.mxu2 %v5937_v5  ;;  %1447 = vmatmul.bf16.vlgmr.msrb.gmra.mxu3 %v5947_v14  ;;  %v1401_v56 = vpack.c.bf16 %v1347_v31, %v1345_v38  ;;  %v1373_v12 = vmul.f32 %v5933_v53, %v5854_v35  ;;  %v8567_v38 = vld [vmem:[#allocation10_spill] sm:$0xff]  ;;  %v8568_v31 = vld [vmem:[#allocation12_spill] sm:$0xff] }
 0x3e6   : > { %1458 = vmatpush.bf16.msra.mxu2 %v1403_v2  ;;  %v1399_v44 = vpack.c.bf16 %v1343_v37, %v1341_v11  ;;  %v1417_v28 = vpack.c.bf16 %v1379_v21, %v1377_v29  ;;  %v1375_v15 = vmul.f32 %v5933_v53, %v5871_v19  ;;  %v1361_v46 = vmul.f32 %v5933_v53, %v5824_v42  ;;  %v8569_v29 = vld [vmem:[#allocation5_spill] sm:$0xff]  ;;  %v8570_v11 = vld [vmem:[#allocation7_spill] sm:$0xff]  ;;  %v1512_v21 = vpop.trf.xlu1 }
 0x3e7   : > { %1477 = vmatpush.bf16.msra.mxu3 %v1419_v62  ;;  %v1363_v59 = vmul.f32 %v5933_v53, %v5831_v13  ;;  %v1337_v16 = vmul.f32 %v5933_v53, %v5742_v61  ;;  %v1357_v57 = vmul.f32 %v5933_v53, %v5814_v17  ;;  %v1339_v35 = vmul.f32 %v5933_v53, %v5750_v39  ;;  %v8571_v62 = vld [vmem:[#allocation6_spill] sm:$0xff] }
 0x3e8   : > { %v1369_v19 = vmul.f32 %v5933_v53, %v5846_v7  ;;  %v1359_v42 = vmul.f32 %v5933_v53, %v5819_v58  ;;  %v1415_v55 = vpack.c.bf16 %v1375_v15, %v1373_v12  ;;  %v1371_v13 = vmul.f32 %v5933_v53, %v5849_v24  ;;  %v8553_v7 = vld [vmem:[#allocation69_spill] sm:$0xff] }
 0x3e9   : > { %v1409_v30 = vpack.c.bf16 %v1363_v59, %v1361_v46  ;;  %v1353_v61 = vmul.f32 %v5933_v53, %v5804_v52  ;;  %v1355_v17 = vmul.f32 %v5933_v53, %v5809_v36  ;;  %v1397_v41 = vpack.c.bf16 %v1339_v35, %v1337_v16  ;;  %v8555_v36 = vld [vmem:[#allocation32_spill] sm:$0xff] }
 0x3ea   : > { %1459 = vmatpush.bf16.msra.mxu2 %v1401_v56  ;;  %v1407_v8 = vpack.c.bf16 %v1359_v42, %v1357_v57  ;;  %v1333_v63 = vmul.f32 %v5933_v53, %v8553_v7  ;;  %v1335_v58 = vmul.f32 %v5933_v53, %v8554_v3  ;;  %v1413_v22 = vpack.c.bf16 %v1371_v13, %v1369_v19 }
 0x3eb   : > { %1478 = vmatpush.bf16.msra.mxu3 %v1417_v28  ;;  %v1405_v39 = vpack.c.bf16 %v1355_v17, %v1353_v61  ;;  %v1365_v24 = vmul.f32 %v5933_v53, %v5838_v48  ;;  %v1367_v52 = vmul.f32 %v5933_v53, %v5841_v20  ;;  %v1386_v33 = vpack.c.bf16 %v8556_v45, %v8555_v36  ;;  %v8561_v20 = vld [vmem:[#allocation62_spill] sm:$0xff] }
 0x3ec   : > { %v1395_v10 = vpack.c.bf16 %v1335_v58, %v1333_v63  ;;  %v1329_v0 = vmul.f32 %v5933_v53, %v8559_v51  ;;  %v1331_v23 = vmul.f32 %v5933_v53, %v8560_v50  ;;  %v1325_v25 = vmul.f32 %v5933_v53, %v8561_v20 }
 0x3ed   : > { %v1411_v60 = vpack.c.bf16 %v1367_v52, %v1365_v24  ;;  %v1327_v47 = vmul.f32 %v5933_v53, %v8562_v43  ;;  %v1321_v40 = vmul.f32 %v5933_v53, %v8563_v27  ;;  %v1323_v32 = vmul.f32 %v5933_v53, %v8564_v1  ;;  %v8572_v53 = vld [vmem:[#allocation8_spill] sm:$0xff] }
 0x3ee   : > { %1460 = vmatpush.bf16.msra.mxu2 %v1399_v44  ;;  %v1393_v48 = vpack.c.bf16 %v1331_v23, %v1329_v0  ;;  %v1502_v9 = vpack.c.bf16 %v8566_v18, %v8565_v34  ;;  %v1503_v2 = vpack.c.bf16 %v8568_v31, %v8567_v38  ;;  %v1500_v37 = vpack.c.bf16 %v8570_v11, %v8569_v29  ;;  %v1513_v44 = vpop.trf.xlu1 }
 0x3ef   : > { %1479 = vmatpush.bf16.msra.mxu3 %v1415_v55  ;;  %v1391_v49 = vpack.c.bf16 %v1327_v47, %v1325_v25  ;;  %v1389_v4 = vpack.c.bf16 %v1323_v32, %v1321_v40  ;;  %v1501_v56 = vpack.c.bf16 %v8572_v53, %v8571_v62 }
 0x3f2   : > { %1461 = vmatpush.bf16.msra.mxu2 %v1397_v41 }
 0x3f3   : > { %1480 = vmatpush.bf16.msra.mxu3 %v1413_v22 }
 0x3f5   : > { %1433 = vmatmul.bf16.gmra.mxu2 %v1386_v33  ;;  %1452 = vmatmul.bf16.gmra.mxu3 %v1387_v54 }
 0x3f6   : > { %1462 = vmatpush.bf16.msra.mxu2 %v1395_v10  ;;  %v1514_v28 = vpop.trf.xlu1 }
 0x3f7   : > { %1481 = vmatpush.bf16.msra.mxu3 %v1411_v60 }
 0x3fa   : > { %1463 = vmatpush.bf16.msra.mxu2 %v1393_v48 }
 0x3fb   : > { %1482 = vmatpush.bf16.msra.mxu3 %v1409_v30 }
 0x3fe   : > { %1464 = vmatpush.bf16.msra.mxu2 %v1391_v49  ;;  %v6022_v12 = vpop.trf.xlu1 }
 0x3ff   : > { %1483 = vmatpush.bf16.msra.mxu3 %v1407_v8 }
 0x402   : > { %1465 = vmatpush.bf16.msra.mxu2 %v1389_v4 }
 0x403   : > { %1484 = vmatpush.bf16.msra.mxu3 %v1405_v39 }
 0x405   : > { %1466 = vmatmul.bf16.vlgmr.msra.gmra.mxu2 %v5937_v5 }
 0x406   : > { %1582 = vmatpush.bf16.msrb.mxu2 %v1502_v9  ;;  %1485 = vmatmul.bf16.vlgmr.msra.gmra.mxu3 %v5947_v14  ;;  %v1516_v15 = vpop.trf.xlu1 }
 0x407   : > { %1671 = vmatpush.bf16.msrb.mxu3 %v1503_v2 }
 0x40a   : > { %1583 = vmatpush.bf16.msrb.mxu2 %v1500_v37 }
 0x40b   : > { %1672 = vmatpush.bf16.msrb.mxu3 %v1501_v56 }
 0x40e   : > { %v6028_v5 = vpop.trf.xlu1 }
 0x415   : > { %1471 = vmatmul.bf16.gmra.mxu2 %v1386_v33 }
 0x416   : > { %1490 = vmatmul.bf16.gmra.mxu3 %v1387_v54  ;;  %v1518_v14 = vpop.trf.xlu1 }
 0x41e   : > { %v6032_v46 = vpop.trf.xlu1 }
 0x425   : > { %4203 = vmatmul.msk.bf16.vlgmr.msrb.gmra.mxu2 %vm389_vm0, %v1512_v21 }
 0x426   : > { %4219 = vmatmul.msk.bf16.vlgmr.msrb.gmra.mxu3 %vm389_vm0, %v1512_v21  ;;  %v1520_v59 = vpop.trf.xlu1 }
 0x42e   : > { %v6036_v16 = vpop.trf.xlu1 }
 0x435   : > { %4204 = vmatmul.msk.bf16.gmra.mxu2 %vm389_vm0, %v1514_v28 }
 0x436   : > { %4220 = vmatmul.msk.bf16.gmra.mxu3 %vm389_vm0, %v1514_v28  ;;  %v1522_v30 = vpop.trf.xlu1 }
 0x43e   : > { %v1523_v17 = vpop.trf.xlu1 }
 0x445   : > { %4205 = vmatmul.msk.bf16.gmra.mxu2 %vm389_vm0, %v1516_v15 }
 0x446   : > { %4221 = vmatmul.msk.bf16.gmra.mxu3 %vm389_vm0, %v1516_v15  ;;  %v1524_v7 = vpop.trf.xlu1 }
 0x44e   : > { %v1525_v52 = vpop.trf.xlu1 }
 0x455   : > { %4206 = vmatmul.msk.bf16.gmra.mxu2 %vm389_vm0, %v1518_v14 }
 0x456   : > { %4222 = vmatmul.msk.bf16.gmra.mxu3 %vm389_vm0, %v1518_v14  ;;  %v1526_v54 = vpop.trf.xlu1 }
 0x465   : > { %4207 = vmatmul.msk.bf16.gmra.mxu2 %vm389_vm0, %v1520_v59 }
 0x466   : > { %4223 = vmatmul.msk.bf16.gmra.mxu3 %vm389_vm0, %v1520_v59 }
 0x468   : > { %v1429_v57 = vpop.f32.mrf.mxu2  ;;  %v1448_v35 = vpop.f32.mrf.mxu3 }
 0x469   : > { %v6040_v19 = vadd.f32 %v1448_v35, %v1429_v57 }
 0x46b   : > { %8573 = vst [vmem:[#allocation75_spill] sm:$0xff] %v6040_v19 }
 0x470   : > { %v1431_v42 = vpop.f32.mrf.mxu2  ;;  %v1450_v55 = vpop.f32.mrf.mxu3 }
 0x471   : > { %v6042_v13 = vadd.f32 %v1450_v55, %v1431_v42 }
 0x473   : > { %8574 = vst [vmem:[#allocation49_spill] sm:$0xff] %v6042_v13 }
 0x475   : > { %4208 = vmatmul.msk.bf16.gmra.mxu2 %vm389_vm0, %v1522_v30 }
 0x476   : > { %4224 = vmatmul.msk.bf16.gmra.mxu3 %vm389_vm0, %v1522_v30 }
 0x478   : > { %v1434_v8 = vpop.f32.mrf.mxu2  ;;  %v1453_v39 = vpop.f32.mrf.mxu3 }
 0x479   : > { %v6048_v41 = vadd.f32 %v1453_v39, %v1434_v8 }
 0x47b   : > { %8575 = vst [vmem:[#allocation56_spill] sm:$0xff] %v6048_v41 }
 0x480   : > { %v1436_v63 = vpop.f32.mrf.mxu2  ;;  %v1455_v3 = vpop.f32.mrf.mxu3 }
 0x481   : > { %v6050_v58 = vadd.f32 %v1455_v3, %v1436_v63 }
 0x483   : > { %8576 = vst [vmem:[#allocation76_spill] sm:$0xff] %v6050_v58 }
 0x485   : > { %4209 = vmatmul.msk.bf16.gmra.mxu2 %vm389_vm0, %v1524_v7 }
 0x486   : > { %4225 = vmatmul.msk.bf16.gmra.mxu3 %vm389_vm0, %v1524_v7 }
 0x488   : > { %v1467_v24 = vpop.f32.mrf.mxu2 }
 0x489   : > { %v1486_v36 = vpop.f32.mrf.mxu3 }
 0x48a   : > { %v6056_v45 = vadd.f32 %v1486_v36, %v1467_v24 }
 0x48c   : > { %8577 = vst [vmem:[#allocation74_spill] sm:$0xff] %v6056_v45 }
 0x490   : > { %v1469_v33 = vpop.f32.mrf.mxu2 }
 0x491   : > { %v1488_v6 = vpop.f32.mrf.mxu3 }
 0x492   : > { %v6058_v26 = vadd.f32 %v1488_v6, %v1469_v33 }
 0x494   : > { %8578 = vst [vmem:[#allocation37_spill] sm:$0xff] %v6058_v26 }
 0x495   : > { %4210 = vmatmul.msk.bf16.gmra.mxu2 %vm389_vm0, %v1526_v54 }
 0x496   : > { %4226 = vmatmul.msk.bf16.gmra.mxu3 %vm389_vm0, %v1526_v54 }
 0x498   : > { %v1472_v51 = vpop.f32.mrf.mxu2 }
 0x499   : > { %v1491_v0 = vpop.f32.mrf.mxu3 }
 0x49a   : > { %v6064_v50 = vadd.f32 %v1491_v0, %v1472_v51 }
 0x49c   : > { %8579 = vst [vmem:[#allocation70_spill] sm:$0xff] %v6064_v50 }
 0x4a0   : > { %v1474_v23 = vpop.f32.mrf.mxu2 }
 0x4a1   : > { %v1493_v60 = vpop.f32.mrf.mxu3 }
 0x4a2   : > { %v6066_v48 = vadd.f32 %v1493_v60, %v1474_v23 }
 0x4a4   : > { %8580 = vst [vmem:[#allocation71_spill] sm:$0xff] %v6066_v48 }
 0x4a5   : > { %4211 = vmatmul.msk.bf16.gmra.mxu2 %vm389_vm0, %v1513_v44 }
 0x4a6   : > { %4227 = vmatmul.msk.bf16.gmra.mxu3 %vm389_vm0, %v1513_v44 }
 0x4a8   : > { %v6072_v25 = vpop.f32.mrf.mxu2 }
 0x4a9   : > { %v6074_v43 = vpop.f32.mrf.mxu3 }
 0x4b0   : > { %v6076_v47 = vpop.f32.mrf.mxu2 }
 0x4b1   : > { %v6078_v49 = vpop.f32.mrf.mxu3 }
 0x4b5   : > { %4212 = vmatmul.msk.bf16.gmra.mxu2 %vm389_vm0, %v6022_v12 }
 0x4b6   : > { %4228 = vmatmul.msk.bf16.gmra.mxu3 %vm389_vm0, %v6022_v12 }
 0x4b8   : > { %v6084_v27 = vpop.f32.mrf.mxu2 }
 0x4b9   : > { %v6086_v40 = vpop.f32.mrf.mxu3  ;;  %v1754_v20 = vmax.f32 %v6072_v25, %v6084_v27 }
 0x4c0   : > { %v6088_v1 = vpop.f32.mrf.mxu2 }
 0x4c1   : > { %v6090_v32 = vpop.f32.mrf.mxu3  ;;  %v1755_v61 = vmax.f32 %v6076_v47, %v6088_v1 }
 0x4c5   : > { %4213 = vmatmul.msk.bf16.gmra.mxu2 %vm389_vm0, %v6028_v5 }
 0x4c6   : > { %4229 = vmatmul.msk.bf16.gmra.mxu3 %vm389_vm0, %v6028_v5 }
 0x4c8   : > { %v6096_v4 = vpop.f32.mrf.mxu2 }
 0x4c9   : > { %v6098_v34 = vpop.f32.mrf.mxu3  ;;  %v1756_v45 = vmax.f32 %v1754_v20, %v6096_v4 }
 0x4d0   : > { %v6100_v18 = vpop.f32.mrf.mxu2 }
 0x4d1   : > { %v6102_v9 = vpop.f32.mrf.mxu3  ;;  %v1757_v26 = vmax.f32 %v1755_v61, %v6100_v18 }
 0x4d5   : > { %4214 = vmatmul.msk.bf16.gmra.mxu2 %vm389_vm0, %v6032_v46 }
 0x4d6   : > { %4230 = vmatmul.msk.bf16.gmra.mxu3 %vm389_vm0, %v6032_v46  ;;  %v1527_v46 = vpop.trf.xlu1 }
 0x4d8   : > { %v6108_v38 = vpop.f32.mrf.mxu2 }
 0x4d9   : > { %v6110_v31 = vpop.f32.mrf.mxu3  ;;  %v1758_v48 = vmax.f32 %v1756_v45, %v6108_v38 }
 0x4e0   : > { %v6112_v2 = vpop.f32.mrf.mxu2 }
 0x4e1   : > { %v6114_v29 = vpop.f32.mrf.mxu3  ;;  %v1759_v19 = vmax.f32 %v1757_v26, %v6112_v2 }
 0x4e5   : > { %4215 = vmatmul.msk.bf16.gmra.mxu2 %vm389_vm0, %v6036_v16 }
 0x4e6   : > { %4231 = vmatmul.msk.bf16.gmra.mxu3 %vm389_vm0, %v6036_v16 }
 0x4e8   : > { %v6120_v11 = vpop.f32.mrf.mxu2 }
 0x4e9   : > { %v6122_v37 = vpop.f32.mrf.mxu3  ;;  %v1760_v13 = vmax.f32 %v1758_v48, %v6120_v11 }
 0x4f0   : > { %v6124_v62 = vpop.f32.mrf.mxu2 }
 0x4f1   : > { %v6126_v53 = vpop.f32.mrf.mxu3  ;;  %v1761_v41 = vmax.f32 %v1759_v19, %v6124_v62 }
 0x4f5   : > { %4216 = vmatmul.msk.bf16.gmra.mxu2 %vm389_vm0, %v1523_v17 }
 0x4f6   : > { %4232 = vmatmul.msk.bf16.gmra.mxu3 %vm389_vm0, %v1523_v17 }
 0x4f8   : > { %v6130_v56 = vpop.f32.mrf.mxu2 }
 0x4f9   : > { %v6132_v21 = vpop.f32.mrf.mxu3  ;;  %v1762_v58 = vmax.f32 %v1760_v13, %v6130_v56 }
 0x500   : > { %v6134_v44 = vpop.f32.mrf.mxu2 }
 0x501   : > { %v6136_v28 = vpop.f32.mrf.mxu3 }
 0x505   : > { %4217 = vmatmul.msk.bf16.gmra.mxu2 %vm389_vm0, %v1525_v52 }
 0x506   : > { %4233 = vmatmul.msk.bf16.gmra.mxu3 %vm389_vm0, %v1525_v52 }
 0x508   : > { %v6140_v12 = vpop.f32.mrf.mxu2 }
 0x509   : > { %8581 = vst [vmem:[#allocation29_spill] sm:$0xff] %v6140_v12  ;;  %v6142_v15 = vpop.f32.mrf.mxu3 }
 0x510   : > { %v6144_v5 = vpop.f32.mrf.mxu2 }
 0x511   : > { %8582 = vst [vmem:[#allocation30_spill] sm:$0xff] %v6144_v5  ;;  %v6146_v14 = vpop.f32.mrf.mxu3 }
 0x515   : > { %4218 = vmatmul.msk.bf16.gmra.mxu2 %vm389_vm0, %v1527_v46 }
 0x516   : > { %4234 = vmatmul.msk.bf16.gmra.mxu3 %vm389_vm0, %v1527_v46 }
 0x518   : > { %v6150_v59 = vpop.f32.mrf.mxu2 }
 0x519   : > { %8583 = vst [vmem:[#allocation31_spill] sm:$0xff] %v6150_v59  ;;  %v6152_v16 = vpop.f32.mrf.mxu3 }
 0x520   : > { %v6154_v57 = vpop.f32.mrf.mxu2 }
 0x521   : > { %v6156_v35 = vpop.f32.mrf.mxu3 }
 0x528   : > { %v6158_v30 = vpop.f32.mrf.mxu2 }
 0x529   : > { %v6160_v42 = vpop.f32.mrf.mxu3 }
 0x530   : > { %v6162_v55 = vpop.f32.mrf.mxu2 }
 0x531   : > { %v6164_v17 = vpop.f32.mrf.mxu3 }
 0x538   : > { %v6166_v8 = vpop.f32.mrf.mxu2 }
 0x539   : > { %v6168_v39 = vpop.f32.mrf.mxu3 }
 0x540   : > { %v6170_v7 = vpop.f32.mrf.mxu2 }
 0x541   : > { %v6174_v3 = vpop.f32.mrf.mxu3 }
 0x542   : > { %8584 = vst [vmem:[#allocation33_spill] sm:$0xff] %v6174_v3 }
 0x548   : > { %v6172_v63 = vpop.f32.mrf.mxu2 }
 0x549   : > { %v6178_v52 = vpop.f32.mrf.mxu3 }
 0x550   : > { %v6176_v24 = vpop.f32.mrf.mxu2 }
 0x551   : > { %v6182_v33 = vpop.f32.mrf.mxu3 }
 0x558   : > { %v6180_v36 = vpop.f32.mrf.mxu2 }
 0x559   : > { %8585 = vst [vmem:[#allocation69_spill] sm:$0xff] %v6180_v36  ;;  %v6186_v54 = vpop.f32.mrf.mxu3 }
 0x560   : > { %v6184_v6 = vpop.f32.mrf.mxu2 }
 0x561   : > { %8586 = vst [vmem:[#allocation72_spill] sm:$0xff] %v6184_v6  ;;  %v6192_v23 = vpop.f32.mrf.mxu3 }
 0x562   : > { %8587 = vst [vmem:[#allocation32_spill] sm:$0xff] %v6192_v23 }
 0x568   : > { %v6188_v51 = vpop.f32.mrf.mxu2 }
 0x569   : > { %v6196_v46 = vpop.f32.mrf.mxu3 }
 0x56a   : > { %8588 = vst [vmem:[#allocation34_spill] sm:$0xff] %v6196_v46  ;;  %v1763_v46 = vmax.f32 %v1761_v41, %v6134_v44 }
 0x56c   : > { %v1765_v20 = vmax.f32 %v1763_v46, %v6144_v5 }
 0x56e   : > { %v1767_v26 = vmax.f32 %v1765_v20, %v6154_v57 }
 0x570   : > { %v6190_v0 = vpop.f32.mrf.mxu2  ;;  %v1769_v19 = vmax.f32 %v1767_v26, %v6162_v55 }
 0x571   : > { %v6204_v22 = vpop.f32.mrf.mxu3 }
 0x572   : > { %8590 = vst [vmem:[#allocation38_spill] sm:$0xff] %v6204_v22  ;;  %v1764_v22 = vmax.f32 %v1762_v58, %v6140_v12  ;;  %v1771_v41 = vmax.f32 %v1769_v19, %v6170_v7 }
 0x574   : > { %v1766_v45 = vmax.f32 %v1764_v22, %v6150_v59  ;;  %v1773_v46 = vmax.f32 %v1771_v41, %v6176_v24 }
 0x576   : > { %v1768_v48 = vmax.f32 %v1766_v45, %v6158_v30  ;;  %v1775_v22 = vmax.f32 %v1773_v46, %v6184_v6 }
 0x578   : > { %v6194_v60 = vpop.f32.mrf.mxu2  ;;  %v1770_v13 = vmax.f32 %v1768_v48, %v6166_v8  ;;  %v1777_v45 = vmax.f32 %v1775_v22, %v6190_v0  ;;  %v1791_v22 = vmax.f32 %v6074_v43, %v6086_v40 }
 0x579   : > { %v6218_v23 = vpop.f32.mrf.mxu3 }
 0x57a   : > { %v1772_v58 = vmax.f32 %v1770_v13, %v6172_v63 }
 0x57c   : > { %v1774_v12 = vmax.f32 %v1772_v58, %v6180_v36 }
 0x57e   : > { %v1776_v20 = vmax.f32 %v1774_v12, %v6188_v51 }
 0x580   : > { %v6198_v10 = vpop.f32.mrf.mxu2  ;;  %v1778_v26 = vmax.f32 %v1776_v20, %v6194_v60 }
 0x581   : > { %8589 = vst [vmem:[#allocation35_spill] sm:$0xff] %v6198_v10  ;;  %v6234_v59 = vpop.f32.mrf.mxu3  ;;  %v1779_v48 = vmax.f32 %v1777_v45, %v6198_v10  ;;  %v1792_v45 = vmax.f32 %v6078_v49, %v6090_v32 }
 0x588   : > { %v6208_v50 = vpop.f32.mrf.mxu2 }
 0x589   : > { %8591 = vst [vmem:[#allocation65_spill] sm:$0xff] %v6208_v50  ;;  %v1780_v19 = vmax.f32 %v1778_v26, %v6208_v50  ;;  %v6246_v6 = vpop.f32.mrf.mxu3  ;;  %v1793_v26 = vmax.f32 %v1791_v22, %v6098_v34 }
 0x590   : > { %v6220_v61 = vpop.f32.mrf.mxu2 }
 0x591   : > { %8592 = vst [vmem:[#allocation67_spill] sm:$0xff] %v6220_v61  ;;  %v1781_v13 = vmax.f32 %v1779_v48, %v6220_v61  ;;  %v1794_v61 = vmax.f32 %v1792_v45, %v6102_v9 }
 0x598   : > { %v6230_v5 = vpop.f32.mrf.mxu2 }
 0x599   : > { %8593 = vst [vmem:[#allocation62_spill] sm:$0xff] %v6230_v5  ;;  %v1782_v58 = vmax.f32 %v1780_v19, %v6230_v5  ;;  %v1795_v19 = vmax.f32 %v1793_v26, %v6110_v31 }
 0x5a0   : > { %v6242_v41 = vpop.f32.mrf.mxu2 }
 0x5a1   : > { %8594 = vst [vmem:[#allocation73_spill] sm:$0xff] %v6242_v41  ;;  %v1783_v46 = vmax.f32 %v1781_v13, %v6242_v41  ;;  %v1796_v13 = vmax.f32 %v1794_v61, %v6114_v29 }
 0x5a3   : > { %v1784_v36 = vmax.f32 %v1782_v58, %v1783_v46  ;;  %v1797_v58 = vmax.f32 %v1795_v19, %v6122_v37  ;;  %v6257_v46 = vpop.f32.mrf.mxu3 }
 0x5a5   : > { %v1785_v12 = vrot.slane %v1784_v36, 4 }
 0x5a7   : > { %v1786_v20 = vmax.f32 %v1784_v36, %v1785_v12  ;;  %v1798_v36 = vmax.f32 %v1796_v13, %v6126_v53  ;;  %v1799_v12 = vmax.f32 %v1797_v58, %v6132_v21 }
 0x5a9   : > { %v1787_v48 = vrot.slane %v1786_v20, 2  ;;  %v1800_v50 = vmax.f32 %v1798_v36, %v6136_v28  ;;  %v1801_v22 = vmax.f32 %v1799_v12, %v6142_v15 }
 0x5ab   : > { %v1788_v5 = vmax.f32 %v1786_v20, %v1787_v48  ;;  %v1802_v45 = vmax.f32 %v1800_v50, %v6146_v14  ;;  %v1803_v20 = vmax.f32 %v1801_v22, %v6152_v16  ;;  %v6277_v50 = vpop.f32.mrf.mxu3 }
 0x5ad   : > { %v1789_v41 = vrot.slane %v1788_v5, 1  ;;  %v1804_v61 = vmax.f32 %v1802_v45, %v6156_v35  ;;  %v1805_v26 = vmax.f32 %v1803_v20, %v6160_v42 }
 0x5af   : > { %v6263_v10 = vmax.f32 %v1788_v5, %v1789_v41  ;;  %v1806_v13 = vmax.f32 %v1804_v61, %v6164_v17  ;;  %v1807_v41 = vmax.f32 %v1805_v26, %v6168_v39  ;;  %v8595_v61 = vld [vmem:[#allocation32_spill] sm:$0xff] }
 0x5b1   : > { %v1828_v48 = vsub.f32 %v6072_v25, %v6263_v10  ;;  %v1830_v19 = vsub.f32 %v6076_v47, %v6263_v10  ;;  %v1832_v5 = vsub.f32 %v6084_v27, %v6263_v10  ;;  %v1808_v58 = vmax.f32 %v1806_v13, %v6174_v3  ;;  %v8596_v3 = vld [vmem:[#allocation34_spill] sm:$0xff] }
 0x5b2   : > { %v1834_v36 = vsub.f32 %v6088_v1, %v6263_v10  ;;  %v1809_v12 = vmax.f32 %v1807_v41, %v6178_v52  ;;  %v1836_v45 = vsub.f32 %v6096_v4, %v6263_v10  ;;  %v1838_v13 = vsub.f32 %v6100_v18, %v6263_v10 }
 0x5b3   : > { %v1892_v25 = vmul.f32 1.442695, %v1828_v48  ;;  %v1896_v22 = vmul.f32 1.442695, %v1830_v19  ;;  %v1810_v47 = vmax.f32 %v1808_v58, %v6182_v33  ;;  %v1900_v20 = vmul.f32 1.442695, %v1832_v5 }
 0x5b4   : > { %v1811_v27 = vmax.f32 %v1809_v12, %v6186_v54  ;;  %v1904_v1 = vmul.f32 1.442695, %v1834_v36  ;;  %v8597_v48 = vld [vmem:[#allocation38_spill] sm:$0xff]  ;;  %v1840_v58 = vsub.f32 %v6108_v38, %v6263_v10  ;;  %v1908_v4 = vmul.f32 1.442695, %v1836_v45 }
 0x5b5   : > { %4525 = vpow2.f32 %v1892_v25  ;;  %v1812_v26 = vmax.f32 %v1810_v47, %v8595_v61  ;;  %v1842_v25 = vsub.f32 %v6112_v2, %v6263_v10  ;;  %v1912_v18 = vmul.f32 1.442695, %v1838_v13  ;;  %v6301_v47 = vpop.f32.mrf.mxu3 }
 0x5b6   : > { %4527 = vpow2.f32 %v1896_v22  ;;  %v1813_v41 = vmax.f32 %v1811_v27, %v8596_v3  ;;  %v1844_v45 = vsub.f32 %v6120_v11, %v6263_v10  ;;  %v1848_v11 = vsub.f32 %v6130_v56, %v6263_v10 }
 0x5b7   : > { %v1814_v19 = vmax.f32 %v1812_v26, %v8597_v48  ;;  %4529 = vpow2.f32 %v1900_v20  ;;  %v1916_v20 = vmul.f32 1.442695, %v1840_v58 }
 0x5b8   : > { %v1815_v5 = vmax.f32 %v1813_v41, %v6218_v23  ;;  %4531 = vpow2.f32 %v1904_v1  ;;  %v1846_v1 = vsub.f32 %v6124_v62, %v6263_v10  ;;  %v1920_v41 = vmul.f32 1.442695, %v1842_v25 }
 0x5b9   : > { %v1816_v12 = vmax.f32 %v1814_v19, %v6234_v59  ;;  %4533 = vpow2.f32 %v1908_v4  ;;  %v1924_v58 = vmul.f32 1.442695, %v1844_v45  ;;  %v1850_v62 = vsub.f32 %v6134_v44, %v6263_v10 }
 0x5ba   : > { %v1817_v36 = vmax.f32 %v1815_v5, %v6246_v6  ;;  %4535 = vpow2.f32 %v1912_v18  ;;  %v1928_v25 = vmul.f32 1.442695, %v1846_v1  ;;  %v1932_v45 = vmul.f32 1.442695, %v1848_v11 }
 0x5bb   : > { %v6298_v22 = vpop.eup %4525  ;;  %v1818_v38 = vmax.f32 %v1816_v12, %v6257_v46  ;;  %4537 = vpow2.f32 %v1916_v20  ;;  %v1936_v1 = vmul.f32 1.442695, %v1850_v62 }
 0x5bc   : > { %8598 = vst [vmem:[#allocation45_spill] sm:$0xff] %v6298_v22  ;;  %v6303_v27 = vpop.eup %4527  ;;  %v1819_v26 = vmax.f32 %v1817_v36, %v6277_v50  ;;  %4539 = vpow2.f32 %v1920_v41 }
 0x5bd   : > { %8599 = vst [vmem:[#allocation59_spill] sm:$0xff] %v6303_v27  ;;  %v2020_v2 = vadd.f32 %v6303_v27, %v6298_v22  ;;  %v6311_v13 = vpop.eup %4529  ;;  %v1820_v19 = vmax.f32 %v1818_v38, %v6301_v47  ;;  %v8603_v22 = vld [vmem:[#allocation29_spill] sm:$0xff]  ;;  %4541 = vpow2.f32 %v1924_v58 }
 0x5be   : > { %8600 = vst [vmem:[#allocation9_spill] sm:$0xff] %v6311_v13  ;;  %v6317_v12 = vpop.eup %4531  ;;  %v1852_v56 = vsub.f32 %v8603_v22, %v6263_v10  ;;  %4543 = vpow2.f32 %v1928_v25 }
 0x5bf   : > { %v2021_v5 = vadd.f32 %v6311_v13, %v2020_v2  ;;  %8601 = vst [vmem:[#allocation11_spill] sm:$0xff] %v6317_v12  ;;  %v1821_v4 = vmax.f32 %v1819_v26, %v1820_v19  ;;  %v6322_v27 = vpop.eup %4533  ;;  %v8605_v13 = vld [vmem:[#allocation31_spill] sm:$0xff]  ;;  %4545 = vpow2.f32 %v1932_v45 }
 0x5c0   : > { %v6327_v2 = vpop.eup %4535  ;;  %v1856_v22 = vsub.f32 %v8605_v13, %v6263_v10  ;;  %v1940_v11 = vmul.f32 1.442695, %v1852_v56  ;;  %4547 = vpow2.f32 %v1936_v1 }
 0x5c1   : > { %v2022_v36 = vadd.f32 %v6317_v12, %v2021_v5  ;;  %v1822_v18 = vrot.slane %v1821_v4, 4  ;;  %8602 = vst [vmem:[#allocation10_spill] sm:$0xff] %v6327_v2  ;;  %v6332_v19 = vpop.eup %4537  ;;  %v8604_v5 = vld [vmem:[#allocation30_spill] sm:$0xff] }
 0x5c2   : > { %v1854_v44 = vsub.f32 %v8604_v5, %v6263_v10  ;;  %v6337_v12 = vpop.eup %4539  ;;  %v1860_v5 = vsub.f32 %v6158_v30, %v6263_v10  ;;  %4549 = vpow2.f32 %v1940_v11  ;;  %v1948_v13 = vmul.f32 1.442695, %v1856_v22 }
 0x5c3   : > { %v2023_v38 = vadd.f32 %v6322_v27, %v2022_v36  ;;  %v1823_v20 = vmax.f32 %v1821_v4, %v1822_v18  ;;  %v6342_v18 = vpop.eup %4541  ;;  %v1866_v22 = vsub.f32 %v6170_v7, %v6263_v10 }
 0x5c4   : > { %v1944_v62 = vmul.f32 1.442695, %v1854_v44  ;;  %v1956_v30 = vmul.f32 1.442695, %v1860_v5 }
 0x5c5   : > { %v2024_v26 = vadd.f32 %v6327_v2, %v2023_v38  ;;  %v1824_v41 = vrot.slane %v1823_v20, 2  ;;  %v1858_v38 = vsub.f32 %v6154_v57, %v6263_v10  ;;  %v1968_v5 = vmul.f32 1.442695, %v1866_v22  ;;  %v8607_v22 = vld [vmem:[#allocation72_spill] sm:$0xff] }
 0x5c6   : > { %4551 = vpow2.f32 %v1944_v62 }
 0x5c7   : > { %v2025_v36 = vadd.f32 %v6332_v19, %v2024_v26  ;;  %v1825_v4 = vmax.f32 %v1823_v20, %v1824_v41  ;;  %v6347_v26 = vpop.eup %4543  ;;  %v1862_v41 = vsub.f32 %v6162_v55, %v6263_v10  ;;  %v1952_v57 = vmul.f32 1.442695, %v1858_v38 }
 0x5c8   : > { %v6352_v20 = vpop.eup %4545  ;;  %4553 = vpow2.f32 %v1948_v13  ;;  %v1868_v55 = vsub.f32 %v6172_v63, %v6263_v10  ;;  %v1870_v63 = vsub.f32 %v6176_v24, %v6263_v10 }
 0x5c9   : > { %v2026_v58 = vadd.f32 %v6337_v12, %v2025_v36  ;;  %v1826_v45 = vrot.slane %v1825_v4, 1  ;;  %v6357_v1 = vpop.eup %4547  ;;  %v1864_v36 = vsub.f32 %v6166_v8, %v6263_v10  ;;  %4555 = vpow2.f32 %v1952_v57  ;;  %v8606_v57 = vld [vmem:[#allocation69_spill] sm:$0xff] }
 0x5ca   : > { %v1960_v38 = vmul.f32 1.442695, %v1862_v41  ;;  %4557 = vpow2.f32 %v1956_v30  ;;  %v1972_v41 = vmul.f32 1.442695, %v1868_v55 }
 0x5cb   : > { %v2027_v25 = vadd.f32 %v6342_v18, %v2026_v58  ;;  %v6364_v58 = vmax.f32 %v1825_v4, %v1826_v45  ;;  %v1964_v8 = vmul.f32 1.442695, %v1864_v36 }
 0x5cc   : > { %4559 = vpow2.f32 %v1960_v38 }
 0x5cd   : > { %v2028_v56 = vadd.f32 %v6347_v26, %v2027_v25  ;;  %v6366_v25 = vpop.eup %4549  ;;  %v1829_v4 = vsub.f32 %v6074_v43, %v6364_v58  ;;  %v1831_v13 = vsub.f32 %v6078_v49, %v6364_v58  ;;  %v1874_v43 = vsub.f32 %v8607_v22, %v6263_v10 }
 0x5ce   : > { %4561 = vpow2.f32 %v1964_v8  ;;  %v1833_v49 = vsub.f32 %v6086_v40, %v6364_v58 }
 0x5cf   : > { %v2029_v44 = vadd.f32 %v6352_v20, %v2028_v56  ;;  %v6371_v56 = vpop.eup %4551  ;;  %4563 = vpow2.f32 %v1968_v5  ;;  %v1894_v24 = vmul.f32 1.442695, %v1829_v4  ;;  %v1898_v38 = vmul.f32 1.442695, %v1831_v13 }
 0x5d0   : > { %v6378_v45 = vpop.eup %4553  ;;  %4565 = vpow2.f32 %v1972_v41  ;;  %v1837_v5 = vsub.f32 %v6098_v34, %v6364_v58  ;;  %v1902_v4 = vmul.f32 1.442695, %v1833_v49  ;;  %v1878_v13 = vsub.f32 %v6190_v0, %v6263_v10 }
 0x5d1   : > { %v2030_v11 = vadd.f32 %v6357_v1, %v2029_v44  ;;  %v1872_v44 = vsub.f32 %v8606_v57, %v6263_v10  ;;  %v6385_v30 = vpop.eup %4555  ;;  %v1876_v57 = vsub.f32 %v6188_v51, %v6263_v10  ;;  %4567 = vpow2.f32 %v1894_v24 }
 0x5d2   : > { %v6392_v55 = vpop.eup %4557  ;;  %4569 = vpow2.f32 %v1898_v38  ;;  %v1839_v51 = vsub.f32 %v6102_v9, %v6364_v58  ;;  %v1880_v34 = vsub.f32 %v6194_v60, %v6263_v10  ;;  %v1910_v24 = vmul.f32 1.442695, %v1837_v5  ;;  %v8609_v9 = vld [vmem:[#allocation35_spill] sm:$0xff] }
 0x5d3   : > { %v2031_v62 = vadd.f32 %v6366_v25, %v2030_v11  ;;  %v1980_v22 = vmul.f32 1.442695, %v1872_v44  ;;  %v6399_v40 = vpop.eup %4559  ;;  %v1988_v49 = vmul.f32 1.442695, %v1876_v57  ;;  %v1843_v57 = vsub.f32 %v6114_v29, %v6364_v58 }
 0x5d4   : > { %v6406_v41 = vpop.eup %4561  ;;  %v1996_v5 = vmul.f32 1.442695, %v1880_v34 }
 0x5d5   : > { %v2032_v7 = vadd.f32 %v6371_v56, %v2031_v62  ;;  %v1976_v62 = vmul.f32 1.442695, %v1870_v63  ;;  %v1984_v63 = vmul.f32 1.442695, %v1874_v43  ;;  %v1841_v43 = vsub.f32 %v6110_v31, %v6364_v58  ;;  %v8611_v31 = vld [vmem:[#allocation65_spill] sm:$0xff] }
 0x5d7   : > { %v2033_v36 = vadd.f32 %v6378_v45, %v2032_v7  ;;  %v1835_v7 = vsub.f32 %v6090_v32, %v6364_v58  ;;  %4571 = vpow2.f32 %v1976_v62  ;;  %v1882_v62 = vsub.f32 %v8609_v9, %v6263_v10 }
 0x5d8   : > { %4573 = vpow2.f32 %v1980_v22  ;;  %v1918_v9 = vmul.f32 1.442695, %v1841_v43 }
 0x5d9   : > { %v2034_v11 = vadd.f32 %v6385_v30, %v2033_v36  ;;  %v1906_v44 = vmul.f32 1.442695, %v1835_v7  ;;  %v6410_v36 = vpop.eup %4563  ;;  %4575 = vpow2.f32 %v1902_v4  ;;  %v1992_v7 = vmul.f32 1.442695, %v1878_v13  ;;  %v8612_v13 = vld [vmem:[#allocation67_spill] sm:$0xff] }
 0x5da   : > { %v6415_v0 = vpop.eup %4565  ;;  %4577 = vpow2.f32 %v1984_v63  ;;  %v1884_v4 = vsub.f32 %v8611_v31, %v6263_v10  ;;  %v1886_v63 = vsub.f32 %v8612_v13, %v6263_v10  ;;  %v1847_v13 = vsub.f32 %v6126_v53, %v6364_v58 }
 0x5db   : > { %v2035_v8 = vadd.f32 %v6392_v55, %v2034_v11  ;;  %v6419_v38 = vpop.eup %4567  ;;  %4579 = vpow2.f32 %v1906_v44 }
 0x5dc   : > { %8608 = vst [vmem:[#allocation12_spill] sm:$0xff] %v6419_v38  ;;  %v6424_v22 = vpop.eup %4569  ;;  %4581 = vpow2.f32 %v1988_v49 }
 0x5dd   : > { %v2036_v32 = vadd.f32 %v6399_v40, %v2035_v8  ;;  %8610 = vst [vmem:[#allocation5_spill] sm:$0xff] %v6424_v22  ;;  %v1914_v8 = vmul.f32 1.442695, %v1839_v51  ;;  %v6431_v2 = vpop.eup %4571  ;;  %4583 = vpow2.f32 %v1910_v24  ;;  %v2000_v51 = vmul.f32 1.442695, %v1882_v62 }
 0x5de   : > { %v6437_v29 = vpop.eup %4573  ;;  %4585 = vpow2.f32 %v1992_v7  ;;  %v2057_v34 = vadd.f32 %v6424_v22, %v6419_v38  ;;  %v2004_v24 = vmul.f32 1.442695, %v1884_v4  ;;  %v8616_v22 = vld [vmem:[#allocation73_spill] sm:$0xff] }
 0x5df   : > { %v2037_v11 = vadd.f32 %v6406_v41, %v2036_v32  ;;  %v6442_v49 = vpop.eup %4575  ;;  %4587 = vpow2.f32 %v1914_v8  ;;  %v1890_v38 = vsub.f32 %v8616_v22, %v6263_v10 }
 0x5e0   : > { %8613 = vst [vmem:[#allocation7_spill] sm:$0xff] %v6442_v49  ;;  %v6448_v43 = vpop.eup %4577  ;;  %4589 = vpow2.f32 %v1996_v5  ;;  %v2058_v7 = vadd.f32 %v6442_v49, %v2057_v34  ;;  %v1851_v34 = vsub.f32 %v6136_v28, %v6364_v58 }
 0x5e1   : > { %v2038_v60 = vadd.f32 %v6410_v36, %v2037_v11  ;;  %v1845_v11 = vsub.f32 %v6122_v37, %v6364_v58  ;;  %v1922_v37 = vmul.f32 1.442695, %v1843_v57  ;;  %4591 = vpow2.f32 %v1918_v9 }
 0x5e2   : > { %4593 = vpow2.f32 %v2000_v51  ;;  %v2008_v57 = vmul.f32 1.442695, %v1886_v63  ;;  %v1853_v51 = vsub.f32 %v6142_v15, %v6364_v58  ;;  %v2016_v28 = vmul.f32 1.442695, %v1890_v38 }
 0x5e3   : > { %v2039_v32 = vadd.f32 %v6415_v0, %v2038_v60  ;;  %v8614_v60 = vld [vmem:[#allocation62_spill] sm:$0xff]  ;;  %v1926_v53 = vmul.f32 1.442695, %v1845_v11  ;;  %4595 = vpow2.f32 %v1922_v37  ;;  %v1857_v38 = vsub.f32 %v6152_v16, %v6364_v58 }
 0x5e4   : > { %v1888_v31 = vsub.f32 %v8614_v60, %v6263_v10  ;;  %v1849_v60 = vsub.f32 %v6132_v21, %v6364_v58  ;;  %v1930_v10 = vmul.f32 1.442695, %v1847_v13  ;;  %4597 = vpow2.f32 %v2004_v24 }
 0x5e5   : > { %v2040_v44 = vadd.f32 %v6431_v2, %v2039_v32  ;;  %v6452_v32 = vpop.eup %4579  ;;  %4599 = vpow2.f32 %v1926_v53  ;;  %v1855_v24 = vsub.f32 %v6146_v14, %v6364_v58 }
 0x5e6   : > { %8615 = vst [vmem:[#allocation6_spill] sm:$0xff] %v6452_v32  ;;  %v6458_v8 = vpop.eup %4581  ;;  %v2059_v5 = vadd.f32 %v6452_v32, %v2058_v7  ;;  %v2012_v21 = vmul.f32 1.442695, %v1888_v31  ;;  %4601 = vpow2.f32 %v2008_v57  ;;  %v1942_v57 = vmul.f32 1.442695, %v1853_v51 }
 0x5e7   : > { %v2041_v62 = vadd.f32 %v6437_v29, %v2040_v44  ;;  %v6462_v44 = vpop.eup %4583  ;;  %4603 = vpow2.f32 %v1930_v10 }
 0x5e8   : > { %8617 = vst [vmem:[#allocation8_spill] sm:$0xff] %v6462_v44  ;;  %v6466_v22 = vpop.eup %4585  ;;  %v2060_v9 = vadd.f32 %v6462_v44, %v2059_v5  ;;  %4605 = vpow2.f32 %v2012_v21  ;;  %v1859_v21 = vsub.f32 %v6156_v35, %v6364_v58 }
 0x5e9   : > { %v2042_v4 = vadd.f32 %v6448_v43, %v2041_v62  ;;  %v6470_v63 = vpop.eup %4587  ;;  %v1934_v62 = vmul.f32 1.442695, %v1849_v60 }
 0x5ea   : > { %8618 = vst [vmem:[#allocation32_spill] sm:$0xff] %v6470_v63  ;;  %v6474_v7 = vpop.eup %4589  ;;  %v2061_v37 = vadd.f32 %v6470_v63, %v2060_v9  ;;  %v1946_v9 = vmul.f32 1.442695, %v1855_v24 }
 0x5eb   : > { %v2043_v11 = vadd.f32 %v6458_v8, %v2042_v4  ;;  %v6478_v31 = vpop.eup %4591  ;;  %v1938_v4 = vmul.f32 1.442695, %v1851_v34  ;;  %4607 = vpow2.f32 %v1934_v62 }
 0x5ec   : > { %v6482_v5 = vpop.eup %4593  ;;  %v2062_v60 = vadd.f32 %v6478_v31, %v2061_v37  ;;  %4609 = vpow2.f32 %v2016_v28  ;;  %v1861_v28 = vsub.f32 %v6160_v42, %v6364_v58  ;;  %v1950_v37 = vmul.f32 1.442695, %v1857_v38 }
 0x5ed   : > { %v2044_v13 = vadd.f32 %v6466_v22, %v2043_v11  ;;  %v6486_v53 = vpop.eup %4595  ;;  %4611 = vpow2.f32 %v1938_v4  ;;  %v1863_v4 = vsub.f32 %v6164_v17, %v6364_v58 }
 0x5ee   : > { %8619 = vst [vmem:[#allocation34_spill] sm:$0xff] %v6486_v53  ;;  %v6490_v11 = vpop.eup %4597  ;;  %v2063_v34 = vadd.f32 %v6486_v53, %v2062_v60  ;;  %4613 = vpow2.f32 %v1942_v57  ;;  %v1865_v57 = vsub.f32 %v6168_v39, %v6364_v58  ;;  %v1869_v39 = vsub.f32 %v6178_v52, %v6364_v58 }
 0x5ef   : > { %v2045_v15 = vadd.f32 %v6474_v7, %v2044_v13  ;;  %v6494_v10 = vpop.eup %4599  ;;  %4615 = vpow2.f32 %v1946_v9  ;;  %v1873_v52 = vsub.f32 %v6186_v54, %v6364_v58  ;;  %v1877_v54 = vsub.f32 %v8596_v3, %v6364_v58 }
 0x5f0   : > { %v6498_v13 = vpop.eup %4601  ;;  %v2064_v51 = vadd.f32 %v6494_v10, %v2063_v34  ;;  %4617 = vpow2.f32 %v1950_v37 }
 0x5f1   : > { %v2046_v14 = vadd.f32 %v6482_v5, %v2045_v15  ;;  %v6502_v62 = vpop.eup %4603  ;;  %v1990_v3 = vmul.f32 1.442695, %v1877_v54  ;;  %v1887_v54 = vsub.f32 %v6257_v46, %v6364_v58 }
 0x5f2   : > { %v6506_v15 = vpop.eup %4605  ;;  %v2065_v35 = vadd.f32 %v6502_v62, %v2064_v51 }
 0x5f3   : > { %v2047_v16 = vadd.f32 %v6490_v11, %v2046_v14  ;;  %v6510_v24 = vpop.eup %4607  ;;  %v1954_v14 = vmul.f32 1.442695, %v1859_v21  ;;  %v8620_v21 = vld [vmem:[#allocation33_spill] sm:$0xff] }
 0x5f4   : > { %v6514_v34 = vpop.eup %4609  ;;  %v2066_v42 = vadd.f32 %v6510_v24, %v2065_v35  ;;  %v1867_v9 = vsub.f32 %v8620_v21, %v6364_v58  ;;  %v1871_v21 = vsub.f32 %v6182_v33, %v6364_v58  ;;  %v1875_v33 = vsub.f32 %v8595_v61, %v6364_v58 }
 0x5f5   : > { %v2048_v60 = vadd.f32 %v6498_v13, %v2047_v16  ;;  %v6518_v38 = vpop.eup %4611  ;;  %v1958_v16 = vmul.f32 1.442695, %v1861_v28  ;;  %4619 = vpow2.f32 %v1954_v14  ;;  %v1966_v28 = vmul.f32 1.442695, %v1865_v57 }
 0x5f6   : > { %v2067_v49 = vadd.f32 %v6518_v38, %v2066_v42  ;;  %v6524_v17 = vpop.eup %4613  ;;  %v1974_v57 = vmul.f32 1.442695, %v1869_v39  ;;  %v1982_v39 = vmul.f32 1.442695, %v1873_v52  ;;  %v1881_v61 = vsub.f32 %v6218_v23, %v6364_v58 }
 0x5f7   : > { %v2049_v32 = vadd.f32 %v6506_v15, %v2048_v60  ;;  %v1962_v60 = vmul.f32 1.442695, %v1863_v4  ;;  %v6529_v44 = vpop.eup %4615  ;;  %4621 = vpow2.f32 %v1958_v16  ;;  %v1970_v4 = vmul.f32 1.442695, %v1867_v9 }
 0x5f8   : > { %v2068_v35 = vadd.f32 %v6524_v17, %v2067_v49  ;;  %v6534_v42 = vpop.eup %4617  ;;  %v1978_v9 = vmul.f32 1.442695, %v1871_v21  ;;  %v1986_v21 = vmul.f32 1.442695, %v1875_v33  ;;  %v1885_v23 = vsub.f32 %v6246_v6, %v6364_v58 }
 0x5f9   : > { %v2050_v51 = vadd.f32 %v6514_v34, %v2049_v32  ;;  %4623 = vpow2.f32 %v1962_v60  ;;  %v1998_v33 = vmul.f32 1.442695, %v1881_v61  ;;  %v1891_v6 = vsub.f32 %v6301_v47, %v6364_v58 }
 0x5fa   : > { %v2069_v37 = vadd.f32 %v6529_v44, %v2068_v35  ;;  %4625 = vpow2.f32 %v1966_v28 }
 0x5fb   : > { %v2051_v63 = vrot.slane %v2050_v51, 4  ;;  %v6539_v53 = vpop.eup %4619  ;;  %4627 = vpow2.f32 %v1970_v4 }
 0x5fc   : > { %v2070_v49 = vadd.f32 %v6534_v42, %v2069_v37  ;;  %4629 = vpow2.f32 %v1974_v57 }
 0x5fd   : > { %v2052_v32 = vadd.f32 %v2051_v63, %v2050_v51  ;;  %v6544_v51 = vpop.eup %4621  ;;  %4631 = vpow2.f32 %v1978_v9 }
 0x5fe   : > { %v2071_v16 = vadd.f32 %v6539_v53, %v2070_v49 }
 0x5ff   : > { %v2053_v14 = vrot.slane %v2052_v32, 2  ;;  %v6549_v37 = vpop.eup %4623 }
 0x600   : > { %v2072_v35 = vadd.f32 %v6544_v51, %v2071_v16  ;;  %v6556_v49 = vpop.eup %4625 }
 0x601   : > { %v2054_v63 = vadd.f32 %v2053_v14, %v2052_v32  ;;  %v1879_v32 = vsub.f32 %v8597_v48, %v6364_v58  ;;  %v6561_v16 = vpop.eup %4627 }
 0x602   : > { %v2073_v14 = vadd.f32 %v6549_v37, %v2072_v35  ;;  %v6564_v48 = vpop.eup %4629 }
 0x603   : > { %v2055_v60 = vrot.slane %v2054_v63, 1  ;;  %v1994_v52 = vmul.f32 1.442695, %v1879_v32 }
 0x604   : > { %v2074_v4 = vadd.f32 %v6556_v49, %v2073_v14  ;;  %v2006_v14 = vmul.f32 1.442695, %v1885_v23 }
 0x605   : > { %v2056_v28 = vadd.f32 %v2055_v60, %v2054_v63  ;;  %v1883_v63 = vsub.f32 %v6234_v59, %v6364_v58  ;;  %v6571_v60 = vpop.eup %4631 }
 0x606   : > { %v2075_v57 = vadd.f32 %v6561_v16, %v2074_v4 }
 0x607   : > { %4633 = vrcp.f32 %v2056_v28  ;;  %v2002_v32 = vmul.f32 1.442695, %v1883_v63 }
 0x608   : > { %4635 = vpow2.f32 %v1982_v39  ;;  %v2076_v9 = vadd.f32 %v6564_v48, %v2075_v57  ;;  %v1889_v39 = vsub.f32 %v6277_v50, %v6364_v58 }
 0x609   : > { %4637 = vpow2.f32 %v1986_v21 }
 0x60a   : > { %4639 = vpow2.f32 %v1990_v3  ;;  %v2077_v59 = vadd.f32 %v6571_v60, %v2076_v9 }
 0x60b   : > { %4641 = vpow2.f32 %v1994_v52  ;;  %v2010_v52 = vmul.f32 1.442695, %v1887_v54 }
 0x60c   : > { %4643 = vpow2.f32 %v1998_v33 }
 0x60d   : > { %v6573_v35 = vpop.eup %4633  ;;  %4645 = vpow2.f32 %v2002_v32 }
 0x60e   : > { %v6580_v28 = vpop.eup %4635  ;;  %v2124_v21 = vmul.f32 %v6573_v35, %v6378_v45  ;;  %v2126_v46 = vmul.f32 %v6573_v35, %v6385_v30  ;;  %v2156_v50 = vmul.f32 %v6573_v35, %v6506_v15  ;;  %v2158_v3 = vmul.f32 %v6573_v35, %v6514_v34 }
 0x60f   : > { %v2078_v61 = vadd.f32 %v6580_v28, %v2077_v59  ;;  %v6591_v4 = vpop.eup %4637  ;;  %v2120_v47 = vmul.f32 %v6573_v35, %v6366_v25  ;;  %v2122_v58 = vmul.f32 %v6573_v35, %v6371_v56  ;;  %v2152_v45 = vmul.f32 %v6573_v35, %v6490_v11 }
 0x610   : > { %v2178_v57 = vpack.c.bf16 %v2126_v46, %v2124_v21  ;;  %v2154_v15 = vmul.f32 %v6573_v35, %v6498_v13  ;;  %v6604_v63 = vpop.eup %4639  ;;  %v2194_v34 = vpack.c.bf16 %v2158_v3, %v2156_v50  ;;  %v2148_v25 = vmul.f32 %v6573_v35, %v6474_v7 }
 0x611   : > { %v2079_v30 = vadd.f32 %v6591_v4, %v2078_v61  ;;  %v2176_v23 = vpack.c.bf16 %v2122_v58, %v2120_v47  ;;  %v6608_v33 = vpop.eup %4641  ;;  %v2014_v56 = vmul.f32 1.442695, %v1889_v39  ;;  %v2150_v54 = vmul.f32 %v6573_v35, %v6482_v5 }
 0x612   : > { %2196 = vmatpush.bf16.msra.mxu0 %v2178_v57  ;;  %v2192_v9 = vpack.c.bf16 %v2154_v15, %v2152_v45  ;;  %v6613_v59 = vpop.eup %4643  ;;  %4647 = vpow2.f32 %v2006_v14  ;;  %v2018_v13 = vmul.f32 1.442695, %v1891_v6  ;;  %2215 = vmatpush.bf16.msra.mxu1 %v2194_v34  ;;  %v2116_v7 = vmul.f32 %v6573_v35, %v6352_v20 }
 0x613   : > { %v2080_v11 = vadd.f32 %v6604_v63, %v2079_v30  ;;  %v2118_v39 = vmul.f32 %v6573_v35, %v6357_v1  ;;  %v2190_v61 = vpack.c.bf16 %v2150_v54, %v2148_v25  ;;  %4649 = vpow2.f32 %v2010_v52  ;;  %v6621_v5 = vpop.eup %4645  ;;  %v8621_v54 = vld [vmem:[#allocation10_spill] sm:$0xff] }
 0x614   : > { %4651 = vpow2.f32 %v2014_v56  ;;  %v2112_v6 = vmul.f32 %v6573_v35, %v6342_v18  ;;  %v2136_v14 = vmul.f32 %v6573_v35, %v6415_v0  ;;  %v2138_v20 = vmul.f32 %v6573_v35, %v6431_v2 }
 0x615   : > { %v2081_v32 = vadd.f32 %v6608_v33, %v2080_v11  ;;  %4653 = vpow2.f32 %v2018_v13  ;;  %v2174_v46 = vpack.c.bf16 %v2118_v39, %v2116_v7  ;;  %v2114_v50 = vmul.f32 %v6573_v35, %v6347_v26  ;;  %v8622_v39 = vld [vmem:[#allocation9_spill] sm:$0xff] }
 0x616   : > { %2197 = vmatpush.bf16.msra.mxu0 %v2176_v23  ;;  %2216 = vmatpush.bf16.msra.mxu1 %v2192_v9  ;;  %v2132_v3 = vmul.f32 %v6573_v35, %v6406_v41  ;;  %v2144_v18 = vmul.f32 %v6573_v35, %v6458_v8  ;;  %v2146_v0 = vmul.f32 %v6573_v35, %v6466_v22 }
 0x617   : > { %v2082_v21 = vadd.f32 %v6613_v59, %v2081_v32  ;;  %v2184_v58 = vpack.c.bf16 %v2138_v20, %v2136_v14  ;;  %v2134_v2 = vmul.f32 %v6573_v35, %v6410_v36  ;;  %v2128_v26 = vmul.f32 %v6573_v35, %v6392_v55  ;;  %v8624_v20 = vld [vmem:[#allocation45_spill] sm:$0xff] }
 0x618   : > { %v6634_v47 = vpop.eup %4647  ;;  %v2130_v41 = vmul.f32 %v6573_v35, %v6399_v40  ;;  %v2108_v8 = vmul.f32 %v6573_v35, %v6332_v19  ;;  %v2172_v15 = vpack.c.bf16 %v2114_v50, %v2112_v6  ;;  %v2110_v36 = vmul.f32 %v6573_v35, %v6337_v12 }
 0x619   : > { %v2083_v1 = vadd.f32 %v6621_v5, %v2082_v21  ;;  %v4650_v52 = vpop.eup %4649  ;;  %v2182_v30 = vpack.c.bf16 %v2134_v2, %v2132_v3  ;;  %v2188_v25 = vpack.c.bf16 %v2146_v0, %v2144_v18  ;;  %v2140_v55 = vmul.f32 %v6573_v35, %v6437_v29  ;;  %v8626_v2 = vld [vmem:[#allocation36_spill] sm:$0xff] }
 0x61a   : > { %2198 = vmatpush.bf16.msra.mxu0 %v2174_v46  ;;  %2217 = vmatpush.bf16.msra.mxu1 %v2190_v61  ;;  %v4652_v22 = vpop.eup %4651  ;;  %v2180_v34 = vpack.c.bf16 %v2130_v41, %v2128_v26  ;;  %v2142_v40 = vmul.f32 %v6573_v35, %v6448_v43  ;;  %v2170_v11 = vpack.c.bf16 %v2110_v36, %v2108_v8  ;;  %v8623_v61 = vld [vmem:[#allocation11_spill] sm:$0xff]  ;;  %v8629_v41 = vld [vmem:[#allocation42_spill] sm:$0xff] }
 0x61b   : > { %v2084_v45 = vadd.f32 %v6634_v47, %v2083_v1  ;;  %v4654_v23 = vpop.eup %4653  ;;  %v2104_v9 = vmul.f32 %v6573_v35, %v6322_v27  ;;  %v2106_v12 = vmul.f32 %v6573_v35, %v8621_v54  ;;  %v2100_v43 = vmul.f32 %v6573_v35, %v8622_v39  ;;  %v8625_v46 = vld [vmem:[#allocation59_spill] sm:$0xff] }
 0x61c   : > { %v2186_v13 = vpack.c.bf16 %v2142_v40, %v2140_v55  ;;  %v2102_v21 = vmul.f32 %v6573_v35, %v8623_v61  ;;  %v2096_v1 = vmul.f32 %v6573_v35, %v8624_v20  ;;  %v2098_v50 = vmul.f32 %v6573_v35, %v8625_v46  ;;  %v8634_v61 = vld [vmem:[#allocation34_spill] sm:$0xff]  ;;  %v8636_v20 = vld [vmem:[#allocation32_spill] sm:$0xff] }
 0x61d   : > { %v2085_v57 = vadd.f32 %v4650_v52, %v2084_v45  ;;  %v2168_v29 = vpack.c.bf16 %v2106_v12, %v2104_v9  ;;  %v8627_v45 = vld [vmem:[#allocation39_spill] sm:$0xff]  ;;  %v8630_v12 = vld [vmem:[#allocation41_spill] sm:$0xff] }
 0x61e   : > { %2199 = vmatpush.bf16.msra.mxu0 %v2172_v15  ;;  %2218 = vmatpush.bf16.msra.mxu1 %v2188_v25  ;;  %v2166_v27 = vpack.c.bf16 %v2102_v21, %v2100_v43  ;;  %v2164_v0 = vpack.c.bf16 %v2098_v50, %v2096_v1  ;;  %v6669_v26 = vpack.c.bf16 %v8627_v45, %v8626_v2  ;;  %v8637_v50 = vld [vmem:[#allocation7_spill] sm:$0xff]  ;;  %v8640_v45 = vld [vmem:[#allocation5_spill] sm:$0xff] }
 0x61f   : > { %v2086_v56 = vadd.f32 %v4652_v22, %v2085_v57 }
 0x621   : > { %v2087_v19 = vadd.f32 %v4654_v23, %v2086_v56 }
 0x622   : > { %2200 = vmatpush.bf16.msra.mxu0 %v2170_v11  ;;  %2219 = vmatpush.bf16.msra.mxu1 %v2186_v13  ;;  %v8631_v13 = vld [vmem:[#allocation43_spill] sm:$0xff] }
 0x623   : > { %v2088_v32 = vrot.slane %v2087_v19, 4 }
 0x625   : > { %v2089_v7 = vadd.f32 %v2088_v32, %v2087_v19  ;;  %v2162_v32 = vpack.c.bf16 %v8631_v13, %v8630_v12 }
 0x626   : > { %2201 = vmatpush.bf16.msra.mxu0 %v2168_v29  ;;  %2220 = vmatpush.bf16.msra.mxu1 %v2184_v58  ;;  %v8628_v58 = vld [vmem:[#allocation40_spill] sm:$0xff] }
 0x627   : > { %v2090_v6 = vrot.slane %v2089_v7, 2  ;;  %v6673_v8 = vpack.c.bf16 %v8629_v41, %v8628_v58 }
 0x629   : > { %v2091_v14 = vadd.f32 %v2090_v6, %v2089_v7  ;;  %v8633_v7 = vld [vmem:[#allocation47_spill] sm:$0xff] }
 0x62a   : > { %2202 = vmatpush.bf16.msra.mxu0 %v2166_v27  ;;  %2221 = vmatpush.bf16.msra.mxu1 %v2182_v30  ;;  %v8635_v27 = vld [vmem:[#allocation8_spill] sm:$0xff] }
 0x62b   : > { %v2092_v3 = vrot.slane %v2091_v14, 1 }
 0x62d   : > { %v2093_v18 = vadd.f32 %v2092_v3, %v2091_v14 }
 0x62e   : > { %2203 = vmatpush.bf16.msra.mxu0 %v2164_v0  ;;  %2222 = vmatpush.bf16.msra.mxu1 %v2180_v34  ;;  %v8639_v0 = vld [vmem:[#allocation12_spill] sm:$0xff] }
 0x62f   : > { %4655 = vrcp.f32 %v2093_v18 }
 0x631   : > { %2204 = vmatmul.bf16.vlgmr.msra.gmra.mxu0 %v6669_v26  ;;  %2223 = vmatmul.bf16.vlgmr.msra.gmra.mxu1 %v6673_v8 }
 0x635   : > { %v6677_v35 = vpop.eup %4655 }
 0x636   : > { %v2125_v30 = vmul.f32 %v6677_v35, %v6534_v42  ;;  %v2127_v57 = vmul.f32 %v6677_v35, %v6539_v53  ;;  %v2157_v15 = vmul.f32 %v6677_v35, %v4652_v22  ;;  %v2159_v36 = vmul.f32 %v6677_v35, %v4654_v23 }
 0x637   : > { %v2121_v34 = vmul.f32 %v6677_v35, %v6524_v17  ;;  %v2123_v25 = vmul.f32 %v6677_v35, %v6529_v44  ;;  %v2153_v56 = vmul.f32 %v6677_v35, %v6634_v47  ;;  %v2155_v42 = vmul.f32 %v6677_v35, %v4650_v52 }
 0x638   : > { %v2179_v55 = vpack.c.bf16 %v2127_v57, %v2125_v30  ;;  %v2195_v40 = vpack.c.bf16 %v2159_v36, %v2157_v15  ;;  %v2117_v53 = vmul.f32 %v6677_v35, %v6510_v24  ;;  %v2119_v22 = vmul.f32 %v6677_v35, %v6518_v38  ;;  %v8641_v30 = vld [vmem:[#allocation17_spill] sm:$0xff]  ;;  %v8642_v57 = vld [vmem:[#allocation19_spill] sm:$0xff]  ;;  %v8643_v36 = vld [vmem:[#allocation18_spill] sm:$0xff] }
 0x639   : > { %v2177_v19 = vpack.c.bf16 %v2123_v25, %v2121_v34  ;;  %v2149_v17 = vmul.f32 %v6677_v35, %v6613_v59  ;;  %v2151_v44 = vmul.f32 %v6677_v35, %v6621_v5  ;;  %v2193_v23 = vpack.c.bf16 %v2155_v42, %v2153_v56  ;;  %v8644_v34 = vld [vmem:[#allocation20_spill] sm:$0xff]  ;;  %v8647_v42 = vld [vmem:[#allocation14_spill] sm:$0xff] }
 0x63a   : > { %2234 = vmatpush.bf16.msrb.mxu0 %v2179_v55  ;;  %2253 = vmatpush.bf16.msrb.mxu1 %v2195_v40  ;;  %v2137_v47 = vmul.f32 %v6677_v35, %v6564_v48  ;;  %v2175_v52 = vpack.c.bf16 %v2119_v22, %v2117_v53  ;;  %v2139_v11 = vmul.f32 %v6677_v35, %v6571_v60  ;;  %v8645_v55 = vld [vmem:[#allocation13_spill] sm:$0xff]  ;;  %v8646_v40 = vld [vmem:[#allocation15_spill] sm:$0xff] }
 0x63b   : > { %v2191_v24 = vpack.c.bf16 %v2151_v44, %v2149_v17  ;;  %v2113_v38 = vmul.f32 %v6677_v35, %v6494_v10  ;;  %v2115_v59 = vmul.f32 %v6677_v35, %v6502_v62  ;;  %v2133_v5 = vmul.f32 %v6677_v35, %v6556_v49  ;;  %v8632_v10 = vld [vmem:[#allocation44_spill] sm:$0xff] }
 0x63c   : > { %v2145_v9 = vmul.f32 %v6677_v35, %v6604_v63  ;;  %v2147_v48 = vmul.f32 %v6677_v35, %v6608_v33  ;;  %v2185_v54 = vpack.c.bf16 %v2139_v11, %v2137_v47  ;;  %v2135_v60 = vmul.f32 %v6677_v35, %v6561_v16 }
 0x63d   : > { %v2163_v29 = vpack.c.bf16 %v8633_v7, %v8632_v10  ;;  %v2129_v62 = vmul.f32 %v6677_v35, %v6544_v51  ;;  %v2131_v49 = vmul.f32 %v6677_v35, %v6549_v37  ;;  %v2173_v33 = vpack.c.bf16 %v2115_v59, %v2113_v38 }
 0x63e   : > { %2235 = vmatpush.bf16.msrb.mxu0 %v2177_v19  ;;  %2254 = vmatpush.bf16.msrb.mxu1 %v2193_v23  ;;  %v2183_v63 = vpack.c.bf16 %v2135_v60, %v2133_v5  ;;  %v2109_v39 = vmul.f32 %v6677_v35, %v6478_v31  ;;  %v2189_v43 = vpack.c.bf16 %v2147_v48, %v2145_v9  ;;  %v8648_v19 = vld [vmem:[#allocation16_spill] sm:$0xff] }
 0x63f   : > { %v2181_v16 = vpack.c.bf16 %v2131_v49, %v2129_v62  ;;  %v2111_v21 = vmul.f32 %v6677_v35, %v8634_v61  ;;  %v2141_v51 = vmul.f32 %v6677_v35, %v6580_v28  ;;  %v2143_v37 = vmul.f32 %v6677_v35, %v6591_v4  ;;  %v8638_v28 = vld [vmem:[#allocation6_spill] sm:$0xff] }
 0x640   : > { %v2105_v31 = vmul.f32 %v6677_v35, %v8635_v27  ;;  %v2107_v1 = vmul.f32 %v6677_v35, %v8636_v20  ;;  %v2101_v3 = vmul.f32 %v6677_v35, %v8637_v50  ;;  %v2103_v18 = vmul.f32 %v6677_v35, %v8638_v28 }
 0x641   : > { %2209 = vmatmul.bf16.gmra.mxu0 %v2162_v32  ;;  %2228 = vmatmul.bf16.gmra.mxu1 %v2163_v29  ;;  %v2171_v6 = vpack.c.bf16 %v2111_v21, %v2109_v39  ;;  %v2187_v14 = vpack.c.bf16 %v2143_v37, %v2141_v51  ;;  %v2097_v2 = vmul.f32 %v6677_v35, %v8639_v0 }
 0x642   : > { %2236 = vmatpush.bf16.msrb.mxu0 %v2175_v52  ;;  %2255 = vmatpush.bf16.msrb.mxu1 %v2191_v24  ;;  %v2169_v46 = vpack.c.bf16 %v2107_v1, %v2105_v31  ;;  %v2167_v4 = vpack.c.bf16 %v2103_v18, %v2101_v3  ;;  %v2099_v58 = vmul.f32 %v6677_v35, %v8640_v45  ;;  %v2288_v35 = vpop.trf.xlu2 }
 0x643   : > { %v2278_v15 = vpack.c.bf16 %v8642_v57, %v8641_v30  ;;  %v2279_v25 = vpack.c.bf16 %v8644_v34, %v8643_v36  ;;  %v2276_v56 = vpack.c.bf16 %v8646_v40, %v8645_v55  ;;  %v2277_v53 = vpack.c.bf16 %v8648_v19, %v8647_v42 }
 0x644   : > { %v2165_v41 = vpack.c.bf16 %v2099_v58, %v2097_v2 }
 0x646   : > { %2237 = vmatpush.bf16.msrb.mxu0 %v2173_v33  ;;  %2256 = vmatpush.bf16.msrb.mxu1 %v2189_v43 }
 0x64a   : > { %2238 = vmatpush.bf16.msrb.mxu0 %v2171_v6  ;;  %2257 = vmatpush.bf16.msrb.mxu1 %v2187_v14  ;;  %v6754_v22 = vpop.trf.xlu2 }
 0x64e   : > { %2239 = vmatpush.bf16.msrb.mxu0 %v2169_v46  ;;  %2258 = vmatpush.bf16.msrb.mxu1 %v2185_v54 }
 0x652   : > { %2240 = vmatpush.bf16.msrb.mxu0 %v2167_v4  ;;  %2259 = vmatpush.bf16.msrb.mxu1 %v2183_v63  ;;  %v2290_v17 = vpop.trf.xlu2 }
 0x656   : > { %2241 = vmatpush.bf16.msrb.mxu0 %v2165_v41  ;;  %2260 = vmatpush.bf16.msrb.mxu1 %v2181_v16 }
 0x659   : > { %2242 = vmatmul.bf16.vlgmr.msrb.gmra.mxu0 %v6669_v26  ;;  %2261 = vmatmul.bf16.vlgmr.msrb.gmra.mxu1 %v6673_v8 }
 0x65a   : > { %2358 = vmatpush.bf16.msra.mxu0 %v2278_v15  ;;  %2447 = vmatpush.bf16.msra.mxu1 %v2279_v25  ;;  %v6756_v44 = vpop.trf.xlu2 }
 0x65e   : > { %2359 = vmatpush.bf16.msra.mxu0 %v2276_v56  ;;  %2448 = vmatpush.bf16.msra.mxu1 %v2277_v53 }
 0x662   : > { %v2292_v23 = vpop.trf.xlu2 }
 0x669   : > { %2247 = vmatmul.bf16.gmra.mxu0 %v2162_v32  ;;  %2266 = vmatmul.bf16.gmra.mxu1 %v2163_v29 }
 0x66a   : > { %v6762_v26 = vpop.trf.xlu2 }
 0x672   : > { %v2294_v8 = vpop.trf.xlu2 }
 0x679   : > { %4235 = vmatmul.msk.bf16.vlgmr.msra.gmra.mxu0 %vm389_vm0, %v2288_v35  ;;  %4251 = vmatmul.msk.bf16.vlgmr.msra.gmra.mxu1 %vm389_vm0, %v2288_v35 }
 0x67a   : > { %v6766_v47 = vpop.trf.xlu2 }
 0x682   : > { %v2296_v52 = vpop.trf.xlu2 }
 0x689   : > { %4236 = vmatmul.msk.bf16.gmra.mxu0 %vm389_vm0, %v2290_v17  ;;  %4252 = vmatmul.msk.bf16.gmra.mxu1 %vm389_vm0, %v2290_v17 }
 0x68a   : > { %v6772_v59 = vpop.trf.xlu2 }
 0x692   : > { %v2298_v60 = vpop.trf.xlu2 }
 0x699   : > { %4237 = vmatmul.msk.bf16.gmra.mxu0 %vm389_vm0, %v2292_v23  ;;  %4253 = vmatmul.msk.bf16.gmra.mxu1 %vm389_vm0, %v2292_v23 }
 0x69a   : > { %v2299_v10 = vpop.trf.xlu2 }
 0x6a2   : > { %v2300_v63 = vpop.trf.xlu2 }
 0x6a9   : > { %4238 = vmatmul.msk.bf16.gmra.mxu0 %vm389_vm0, %v2294_v8  ;;  %4254 = vmatmul.msk.bf16.gmra.mxu1 %vm389_vm0, %v2294_v8 }
 0x6aa   : > { %v2301_v43 = vpop.trf.xlu2 }
 0x6ae   : > { %v2205_v11 = vpop.f32.mrf.mxu0  ;;  %v2224_v24 = vpop.f32.mrf.mxu1 }
 0x6af   : > { %v6770_v38 = vadd.f32 %v2224_v24, %v2205_v11 }
 0x6b1   : > { %8649 = vst [vmem:[#allocation38_spill] sm:$0xff] %v6770_v38 }
 0x6b2   : > { %v2302_v6 = vpop.trf.xlu2 }
 0x6b6   : > { %v2207_v5 = vpop.f32.mrf.mxu0  ;;  %v2226_v9 = vpop.f32.mrf.mxu1 }
 0x6b7   : > { %v6776_v48 = vadd.f32 %v2226_v9, %v2207_v5 }
 0x6b9   : > { %4239 = vmatmul.msk.bf16.gmra.mxu0 %vm389_vm0, %v2296_v52  ;;  %4255 = vmatmul.msk.bf16.gmra.mxu1 %vm389_vm0, %v2296_v52  ;;  %8650 = vst [vmem:[#allocation29_spill] sm:$0xff] %v6776_v48 }
 0x6be   : > { %v2210_v12 = vpop.f32.mrf.mxu0  ;;  %v2229_v13 = vpop.f32.mrf.mxu1 }
 0x6bf   : > { %v6780_v32 = vadd.f32 %v2229_v13, %v2210_v12 }
 0x6c1   : > { %8651 = vst [vmem:[#allocation30_spill] sm:$0xff] %v6780_v32 }
 0x6c6   : > { %v2212_v7 = vpop.f32.mrf.mxu0  ;;  %v2231_v29 = vpop.f32.mrf.mxu1 }
 0x6c7   : > { %v6784_v62 = vadd.f32 %v2231_v29, %v2212_v7 }
 0x6c9   : > { %4240 = vmatmul.msk.bf16.gmra.mxu0 %vm389_vm0, %v2298_v60  ;;  %4256 = vmatmul.msk.bf16.gmra.mxu1 %vm389_vm0, %v2298_v60  ;;  %8652 = vst [vmem:[#allocation31_spill] sm:$0xff] %v6784_v62 }
 0x6d6   : > { %v2243_v33 = vpop.f32.mrf.mxu0  ;;  %v2262_v39 = vpop.f32.mrf.mxu1 }
 0x6d7   : > { %v6788_v16 = vadd.f32 %v2262_v39, %v2243_v33 }
 0x6d9   : > { %8653 = vst [vmem:[#allocation69_spill] sm:$0xff] %v6788_v16  ;;  %4241 = vmatmul.msk.bf16.gmra.mxu0 %vm389_vm0, %v2300_v63  ;;  %4257 = vmatmul.msk.bf16.gmra.mxu1 %vm389_vm0, %v2300_v63 }
 0x6de   : > { %v2245_v61 = vpop.f32.mrf.mxu0  ;;  %v2264_v21 = vpop.f32.mrf.mxu1 }
 0x6df   : > { %v6792_v51 = vadd.f32 %v2264_v21, %v2245_v61 }
 0x6e1   : > { %8654 = vst [vmem:[#allocation72_spill] sm:$0xff] %v6792_v51 }
 0x6e6   : > { %v2248_v14 = vpop.f32.mrf.mxu0  ;;  %v2267_v27 = vpop.f32.mrf.mxu1 }
 0x6e7   : > { %v6796_v31 = vadd.f32 %v2267_v27, %v2248_v14 }
 0x6e9   : > { %8655 = vst [vmem:[#allocation35_spill] sm:$0xff] %v6796_v31  ;;  %4242 = vmatmul.msk.bf16.gmra.mxu0 %vm389_vm0, %v2302_v6  ;;  %4258 = vmatmul.msk.bf16.gmra.mxu1 %vm389_vm0, %v2302_v6 }
 0x6ee   : > { %v2250_v20 = vpop.f32.mrf.mxu0  ;;  %v2269_v1 = vpop.f32.mrf.mxu1 }
 0x6ef   : > { %v6800_v46 = vadd.f32 %v2269_v1, %v2250_v20 }
 0x6f1   : > { %8656 = vst [vmem:[#allocation65_spill] sm:$0xff] %v6800_v46 }
 0x6f6   : > { %v6804_v3 = vpop.f32.mrf.mxu0  ;;  %v6806_v28 = vpop.f32.mrf.mxu1 }
 0x6f9   : > { %4243 = vmatmul.msk.bf16.gmra.mxu0 %vm389_vm0, %v6754_v22  ;;  %4259 = vmatmul.msk.bf16.gmra.mxu1 %vm389_vm0, %v6754_v22 }
 0x6fe   : > { %v6812_v18 = vpop.f32.mrf.mxu0  ;;  %v6814_v4 = vpop.f32.mrf.mxu1 }
 0x706   : > { %v6816_v0 = vpop.f32.mrf.mxu0  ;;  %v6818_v2 = vpop.f32.mrf.mxu1 }
 0x707   : > { %v2530_v50 = vmax.f32 %v6804_v3, %v6816_v0 }
 0x709   : > { %4244 = vmatmul.msk.bf16.gmra.mxu0 %vm389_vm0, %v6756_v44  ;;  %4260 = vmatmul.msk.bf16.gmra.mxu1 %vm389_vm0, %v6756_v44 }
 0x70e   : > { %v6824_v45 = vpop.f32.mrf.mxu0  ;;  %v6826_v58 = vpop.f32.mrf.mxu1 }
 0x70f   : > { %v2531_v54 = vmax.f32 %v6812_v18, %v6824_v45 }
 0x716   : > { %v6828_v41 = vpop.f32.mrf.mxu0  ;;  %v6830_v30 = vpop.f32.mrf.mxu1 }
 0x717   : > { %v2532_v16 = vmax.f32 %v2530_v50, %v6828_v41 }
 0x719   : > { %4245 = vmatmul.msk.bf16.gmra.mxu0 %vm389_vm0, %v6762_v26  ;;  %4261 = vmatmul.msk.bf16.gmra.mxu1 %vm389_vm0, %v6762_v26 }
 0x71e   : > { %v6836_v57 = vpop.f32.mrf.mxu0  ;;  %v6838_v15 = vpop.f32.mrf.mxu1 }
 0x71f   : > { %v2533_v51 = vmax.f32 %v2531_v54, %v6836_v57 }
 0x726   : > { %v6840_v36 = vpop.f32.mrf.mxu0  ;;  %v6842_v34 = vpop.f32.mrf.mxu1 }
 0x727   : > { %v2534_v46 = vmax.f32 %v2532_v16, %v6840_v36 }
 0x729   : > { %4246 = vmatmul.msk.bf16.gmra.mxu0 %vm389_vm0, %v6766_v47  ;;  %4262 = vmatmul.msk.bf16.gmra.mxu1 %vm389_vm0, %v6766_v47  ;;  %v2303_v47 = vpop.trf.xlu2 }
 0x72e   : > { %v6848_v25 = vpop.f32.mrf.mxu0  ;;  %v6850_v55 = vpop.f32.mrf.mxu1 }
 0x72f   : > { %v2535_v38 = vmax.f32 %v2533_v51, %v6848_v25 }
 0x736   : > { %v6852_v40 = vpop.f32.mrf.mxu0  ;;  %v6854_v56 = vpop.f32.mrf.mxu1 }
 0x737   : > { %v2536_v48 = vmax.f32 %v2534_v46, %v6852_v40 }
 0x739   : > { %4247 = vmatmul.msk.bf16.gmra.mxu0 %vm389_vm0, %v6772_v59  ;;  %4263 = vmatmul.msk.bf16.gmra.mxu1 %vm389_vm0, %v6772_v59 }
 0x73e   : > { %v6860_v42 = vpop.f32.mrf.mxu0  ;;  %v6862_v19 = vpop.f32.mrf.mxu1 }
 0x73f   : > { %v2537_v32 = vmax.f32 %v2535_v38, %v6860_v42 }
 0x746   : > { %v6864_v53 = vpop.f32.mrf.mxu0  ;;  %v6866_v35 = vpop.f32.mrf.mxu1 }
 0x747   : > { %v2538_v62 = vmax.f32 %v2536_v48, %v6864_v53 }
 0x749   : > { %4248 = vmatmul.msk.bf16.gmra.mxu0 %vm389_vm0, %v2299_v10  ;;  %4264 = vmatmul.msk.bf16.gmra.mxu1 %vm389_vm0, %v2299_v10 }
 0x74e   : > { %v6870_v22 = vpop.f32.mrf.mxu0  ;;  %v6872_v17 = vpop.f32.mrf.mxu1 }
 0x756   : > { %v6874_v44 = vpop.f32.mrf.mxu0  ;;  %v6876_v23 = vpop.f32.mrf.mxu1 }
 0x757   : > { %8657 = vst [vmem:[#allocation67_spill] sm:$0xff] %v6874_v44 }
 0x759   : > { %4249 = vmatmul.msk.bf16.gmra.mxu0 %vm389_vm0, %v2301_v43  ;;  %4265 = vmatmul.msk.bf16.gmra.mxu1 %vm389_vm0, %v2301_v43 }
 0x75e   : > { %v6880_v26 = vpop.f32.mrf.mxu0  ;;  %v6882_v8 = vpop.f32.mrf.mxu1 }
 0x75f   : > { %8658 = vst [vmem:[#allocation62_spill] sm:$0xff] %v6880_v26 }
 0x766   : > { %v6884_v52 = vpop.f32.mrf.mxu0  ;;  %v6886_v11 = vpop.f32.mrf.mxu1 }
 0x767   : > { %8659 = vst [vmem:[#allocation73_spill] sm:$0xff] %v6884_v52 }
 0x769   : > { %4250 = vmatmul.msk.bf16.gmra.mxu0 %vm389_vm0, %v2303_v47  ;;  %4266 = vmatmul.msk.bf16.gmra.mxu1 %vm389_vm0, %v2303_v47 }
 0x76e   : > { %v6890_v24 = vpop.f32.mrf.mxu0  ;;  %v6892_v59 = vpop.f32.mrf.mxu1 }
 0x776   : > { %v6894_v5 = vpop.f32.mrf.mxu0  ;;  %v6896_v9 = vpop.f32.mrf.mxu1 }
 0x77e   : > { %v6898_v60 = vpop.f32.mrf.mxu0  ;;  %v6900_v12 = vpop.f32.mrf.mxu1 }
 0x786   : > { %v6902_v13 = vpop.f32.mrf.mxu0  ;;  %v6904_v10 = vpop.f32.mrf.mxu1 }
 0x78e   : > { %v6906_v7 = vpop.f32.mrf.mxu0  ;;  %v6910_v63 = vpop.f32.mrf.mxu1 }
 0x78f   : > { %8660 = vst [vmem:[#allocation33_spill] sm:$0xff] %v6910_v63 }
 0x796   : > { %v6908_v29 = vpop.f32.mrf.mxu0  ;;  %v6914_v39 = vpop.f32.mrf.mxu1 }
 0x79e   : > { %v6912_v33 = vpop.f32.mrf.mxu0  ;;  %v6918_v61 = vpop.f32.mrf.mxu1 }
 0x7a6   : > { %v6916_v43 = vpop.f32.mrf.mxu0  ;;  %v6922_v6 = vpop.f32.mrf.mxu1 }
 0x7a7   : > { %8661 = vst [vmem:[#allocation10_spill] sm:$0xff] %v6916_v43 }
 0x7ae   : > { %v6920_v21 = vpop.f32.mrf.mxu0  ;;  %v6928_v20 = vpop.f32.mrf.mxu1 }
 0x7af   : > { %8662 = vst [vmem:[#allocation9_spill] sm:$0xff] %v6920_v21 }
 0x7b0   : > { %8663 = vst [vmem:[#allocation11_spill] sm:$0xff] %v6928_v20 }
 0x7b6   : > { %v6924_v14 = vpop.f32.mrf.mxu0  ;;  %v6932_v47 = vpop.f32.mrf.mxu1 }
 0x7b7   : > { %8664 = vst [vmem:[#allocation45_spill] sm:$0xff] %v6932_v47  ;;  %v2539_v47 = vmax.f32 %v2537_v32, %v6870_v22 }
 0x7b9   : > { %v2541_v50 = vmax.f32 %v2539_v47, %v6880_v26 }
 0x7bb   : > { %v2543_v51 = vmax.f32 %v2541_v50, %v6890_v24 }
 0x7bd   : > { %v2545_v38 = vmax.f32 %v2543_v51, %v6898_v60 }
 0x7be   : > { %v6926_v27 = vpop.f32.mrf.mxu0  ;;  %v6940_v49 = vpop.f32.mrf.mxu1 }
 0x7bf   : > { %8666 = vst [vmem:[#allocation36_spill] sm:$0xff] %v6940_v49  ;;  %v2540_v49 = vmax.f32 %v2538_v62, %v6874_v44  ;;  %v2547_v32 = vmax.f32 %v2545_v38, %v6906_v7 }
 0x7c1   : > { %v2542_v16 = vmax.f32 %v2540_v49, %v6884_v52  ;;  %v2549_v47 = vmax.f32 %v2547_v32, %v6912_v33 }
 0x7c3   : > { %v2544_v46 = vmax.f32 %v2542_v16, %v6894_v5  ;;  %v2551_v49 = vmax.f32 %v2549_v47, %v6920_v21 }
 0x7c5   : > { %v2546_v48 = vmax.f32 %v2544_v46, %v6902_v13  ;;  %v2553_v16 = vmax.f32 %v2551_v49, %v6926_v27  ;;  %v2567_v49 = vmax.f32 %v6806_v28, %v6818_v2 }
 0x7c6   : > { %v6930_v1 = vpop.f32.mrf.mxu0  ;;  %v6954_v20 = vpop.f32.mrf.mxu1 }
 0x7c7   : > { %v2548_v62 = vmax.f32 %v2546_v48, %v6908_v29 }
 0x7c9   : > { %v2550_v44 = vmax.f32 %v2548_v62, %v6916_v43 }
 0x7cb   : > { %v2552_v50 = vmax.f32 %v2550_v44, %v6924_v14 }
 0x7cd   : > { %v2554_v51 = vmax.f32 %v2552_v50, %v6930_v1 }
 0x7ce   : > { %v6934_v37 = vpop.f32.mrf.mxu0  ;;  %v6970_v52 = vpop.f32.mrf.mxu1 }
 0x7cf   : > { %8665 = vst [vmem:[#allocation59_spill] sm:$0xff] %v6934_v37  ;;  %v2555_v46 = vmax.f32 %v2553_v16, %v6934_v37  ;;  %v2568_v16 = vmax.f32 %v6814_v4, %v6826_v58 }
 0x7d6   : > { %v6944_v31 = vpop.f32.mrf.mxu0  ;;  %v6982_v21 = vpop.f32.mrf.mxu1 }
 0x7d7   : > { %8667 = vst [vmem:[#allocation39_spill] sm:$0xff] %v6944_v31  ;;  %v2556_v38 = vmax.f32 %v2554_v51, %v6944_v31  ;;  %v2569_v51 = vmax.f32 %v2567_v49, %v6830_v30 }
 0x7de   : > { %v6956_v54 = vpop.f32.mrf.mxu0 }
 0x7df   : > { %8668 = vst [vmem:[#allocation40_spill] sm:$0xff] %v6956_v54  ;;  %v2557_v48 = vmax.f32 %v2555_v46, %v6956_v54  ;;  %v2570_v54 = vmax.f32 %v2568_v16, %v6838_v15 }
 0x7e6   : > { %v6966_v26 = vpop.f32.mrf.mxu0 }
 0x7e7   : > { %8669 = vst [vmem:[#allocation42_spill] sm:$0xff] %v6966_v26  ;;  %v2558_v62 = vmax.f32 %v2556_v38, %v6966_v26  ;;  %v2571_v38 = vmax.f32 %v2569_v51, %v6842_v34 }
 0x7ee   : > { %v6978_v32 = vpop.f32.mrf.mxu0 }
 0x7ef   : > { %8670 = vst [vmem:[#allocation41_spill] sm:$0xff] %v6978_v32  ;;  %v2559_v47 = vmax.f32 %v2557_v48, %v6978_v32  ;;  %v2572_v48 = vmax.f32 %v2570_v54, %v6850_v55 }
 0x7f1   : > { %v2560_v43 = vmax.f32 %v2558_v62, %v2559_v47  ;;  %v2573_v62 = vmax.f32 %v2571_v38, %v6854_v56  ;;  %v6993_v47 = vpop.f32.mrf.mxu1 }
 0x7f3   : > { %v2561_v44 = vrot.slane %v2560_v43, 4 }
 0x7f5   : > { %v2562_v50 = vmax.f32 %v2560_v43, %v2561_v44  ;;  %v2574_v43 = vmax.f32 %v2572_v48, %v6862_v19  ;;  %v2575_v44 = vmax.f32 %v2573_v62, %v6866_v35 }
 0x7f7   : > { %v2563_v46 = vrot.slane %v2562_v50, 2  ;;  %v2576_v31 = vmax.f32 %v2574_v43, %v6872_v17  ;;  %v2577_v49 = vmax.f32 %v2575_v44, %v6876_v23 }
 0x7f9   : > { %v2564_v26 = vmax.f32 %v2562_v50, %v2563_v46  ;;  %v2578_v16 = vmax.f32 %v2576_v31, %v6882_v8  ;;  %v2579_v50 = vmax.f32 %v2577_v49, %v6886_v11  ;;  %v7013_v31 = vpop.f32.mrf.mxu1 }
 0x7fb   : > { %v2565_v32 = vrot.slane %v2564_v26, 1  ;;  %v2580_v54 = vmax.f32 %v2578_v16, %v6892_v59  ;;  %v2581_v51 = vmax.f32 %v2579_v50, %v6896_v9 }
 0x7fd   : > { %v6999_v37 = vmax.f32 %v2564_v26, %v2565_v32  ;;  %v2582_v48 = vmax.f32 %v2580_v54, %v6900_v12  ;;  %v2583_v32 = vmax.f32 %v2581_v51, %v6904_v10  ;;  %v8671_v54 = vld [vmem:[#allocation11_spill] sm:$0xff] }
 0x7ff   : > { %v2604_v46 = vsub.f32 %v6804_v3, %v6999_v37  ;;  %v2606_v38 = vsub.f32 %v6812_v18, %v6999_v37  ;;  %v2608_v26 = vsub.f32 %v6816_v0, %v6999_v37  ;;  %v2584_v62 = vmax.f32 %v2582_v48, %v6910_v63  ;;  %v8672_v63 = vld [vmem:[#allocation45_spill] sm:$0xff] }
 0x800   : > { %v2610_v43 = vsub.f32 %v6824_v45, %v6999_v37  ;;  %v2585_v44 = vmax.f32 %v2583_v32, %v6914_v39  ;;  %v2612_v16 = vsub.f32 %v6828_v41, %v6999_v37  ;;  %v2614_v48 = vsub.f32 %v6836_v57, %v6999_v37 }
 0x801   : > { %v2668_v3 = vmul.f32 1.442695, %v2604_v46  ;;  %v2672_v49 = vmul.f32 1.442695, %v2606_v38  ;;  %v2586_v18 = vmax.f32 %v2584_v62, %v6918_v61  ;;  %v2676_v50 = vmul.f32 1.442695, %v2608_v26 }
 0x802   : > { %v2587_v0 = vmax.f32 %v2585_v44, %v6922_v6  ;;  %v2680_v45 = vmul.f32 1.442695, %v2610_v43  ;;  %v8673_v46 = vld [vmem:[#allocation36_spill] sm:$0xff]  ;;  %v2616_v62 = vsub.f32 %v6840_v36, %v6999_v37  ;;  %v2684_v41 = vmul.f32 1.442695, %v2612_v16 }
 0x803   : > { %4657 = vpow2.f32 %v2668_v3  ;;  %v2588_v51 = vmax.f32 %v2586_v18, %v8671_v54  ;;  %v2618_v3 = vsub.f32 %v6848_v25, %v6999_v37  ;;  %v2688_v57 = vmul.f32 1.442695, %v2614_v48  ;;  %v7037_v18 = vpop.f32.mrf.mxu1 }
 0x804   : > { %4659 = vpow2.f32 %v2672_v49  ;;  %v2589_v32 = vmax.f32 %v2587_v0, %v8672_v63  ;;  %v2620_v16 = vsub.f32 %v6852_v40, %v6999_v37  ;;  %v2624_v40 = vsub.f32 %v6864_v53, %v6999_v37 }
 0x805   : > { %v2590_v38 = vmax.f32 %v2588_v51, %v8673_v46  ;;  %4661 = vpow2.f32 %v2676_v50  ;;  %v2692_v50 = vmul.f32 1.442695, %v2616_v62 }
 0x806   : > { %v2591_v26 = vmax.f32 %v2589_v32, %v6954_v20  ;;  %4663 = vpow2.f32 %v2680_v45  ;;  %v2622_v45 = vsub.f32 %v6860_v42, %v6999_v37  ;;  %v2696_v32 = vmul.f32 1.442695, %v2618_v3 }
 0x807   : > { %v2592_v44 = vmax.f32 %v2590_v38, %v6970_v52  ;;  %4665 = vpow2.f32 %v2684_v41  ;;  %v2700_v62 = vmul.f32 1.442695, %v2620_v16  ;;  %v2626_v42 = vsub.f32 %v6870_v22, %v6999_v37 }
 0x808   : > { %v2593_v43 = vmax.f32 %v2591_v26, %v6982_v21  ;;  %4667 = vpow2.f32 %v2688_v57  ;;  %v2704_v3 = vmul.f32 1.442695, %v2622_v45  ;;  %v2708_v16 = vmul.f32 1.442695, %v2624_v40 }
 0x809   : > { %v7034_v49 = vpop.eup %4657  ;;  %v2594_v36 = vmax.f32 %v2592_v44, %v6993_v47  ;;  %4669 = vpow2.f32 %v2692_v50  ;;  %v2712_v45 = vmul.f32 1.442695, %v2626_v42 }
 0x80a   : > { %8674 = vst [vmem:[#allocation43_spill] sm:$0xff] %v7034_v49  ;;  %v7039_v0 = vpop.eup %4659  ;;  %v2595_v51 = vmax.f32 %v2593_v43, %v7013_v31  ;;  %4671 = vpow2.f32 %v2696_v32 }
 0x80b   : > { %8675 = vst [vmem:[#allocation44_spill] sm:$0xff] %v7039_v0  ;;  %v2796_v25 = vadd.f32 %v7039_v0, %v7034_v49  ;;  %v7047_v48 = vpop.eup %4661  ;;  %v2596_v38 = vmax.f32 %v2594_v36, %v7037_v18  ;;  %v8679_v49 = vld [vmem:[#allocation67_spill] sm:$0xff]  ;;  %4673 = vpow2.f32 %v2700_v62 }
 0x80c   : > { %8676 = vst [vmem:[#allocation47_spill] sm:$0xff] %v7047_v48  ;;  %v7053_v44 = vpop.eup %4663  ;;  %v2628_v53 = vsub.f32 %v8679_v49, %v6999_v37  ;;  %4675 = vpow2.f32 %v2704_v3 }
 0x80d   : > { %v2797_v26 = vadd.f32 %v7047_v48, %v2796_v25  ;;  %8677 = vst [vmem:[#allocation34_spill] sm:$0xff] %v7053_v44  ;;  %v2597_v41 = vmax.f32 %v2595_v51, %v2596_v38  ;;  %v7058_v0 = vpop.eup %4665  ;;  %v8681_v48 = vld [vmem:[#allocation73_spill] sm:$0xff]  ;;  %4677 = vpow2.f32 %v2708_v16 }
 0x80e   : > { %v7063_v25 = vpop.eup %4667  ;;  %v2632_v49 = vsub.f32 %v8681_v48, %v6999_v37  ;;  %v2716_v40 = vmul.f32 1.442695, %v2628_v53  ;;  %4679 = vpow2.f32 %v2712_v45 }
 0x80f   : > { %v2798_v43 = vadd.f32 %v7053_v44, %v2797_v26  ;;  %v2598_v57 = vrot.slane %v2597_v41, 4  ;;  %8678 = vst [vmem:[#allocation8_spill] sm:$0xff] %v7063_v25  ;;  %v7068_v38 = vpop.eup %4669  ;;  %v8680_v26 = vld [vmem:[#allocation62_spill] sm:$0xff] }
 0x810   : > { %v2630_v22 = vsub.f32 %v8680_v26, %v6999_v37  ;;  %v7073_v44 = vpop.eup %4671  ;;  %v2636_v26 = vsub.f32 %v6894_v5, %v6999_v37  ;;  %4681 = vpow2.f32 %v2716_v40  ;;  %v2724_v48 = vmul.f32 1.442695, %v2632_v49 }
 0x811   : > { %v2799_v36 = vadd.f32 %v7058_v0, %v2798_v43  ;;  %v2599_v50 = vmax.f32 %v2597_v41, %v2598_v57  ;;  %v7078_v57 = vpop.eup %4673  ;;  %v2642_v49 = vsub.f32 %v6906_v7, %v6999_v37 }
 0x812   : > { %v2720_v42 = vmul.f32 1.442695, %v2630_v22  ;;  %v2732_v5 = vmul.f32 1.442695, %v2636_v26 }
 0x813   : > { %v2800_v51 = vadd.f32 %v7063_v25, %v2799_v36  ;;  %v2600_v32 = vrot.slane %v2599_v50, 2  ;;  %v2634_v36 = vsub.f32 %v6890_v24, %v6999_v37  ;;  %v2744_v26 = vmul.f32 1.442695, %v2642_v49  ;;  %v8683_v49 = vld [vmem:[#allocation9_spill] sm:$0xff] }
 0x814   : > { %4683 = vpow2.f32 %v2720_v42 }
 0x815   : > { %v2801_v43 = vadd.f32 %v7068_v38, %v2800_v51  ;;  %v2601_v41 = vmax.f32 %v2599_v50, %v2600_v32  ;;  %v7083_v51 = vpop.eup %4675  ;;  %v2638_v32 = vsub.f32 %v6898_v60, %v6999_v37  ;;  %v2728_v24 = vmul.f32 1.442695, %v2634_v36 }
 0x816   : > { %v7088_v50 = vpop.eup %4677  ;;  %4685 = vpow2.f32 %v2724_v48  ;;  %v2644_v60 = vsub.f32 %v6908_v29, %v6999_v37  ;;  %v2646_v29 = vsub.f32 %v6912_v33, %v6999_v37 }
 0x817   : > { %v2802_v62 = vadd.f32 %v7073_v44, %v2801_v43  ;;  %v2602_v16 = vrot.slane %v2601_v41, 1  ;;  %v7093_v45 = vpop.eup %4679  ;;  %v2640_v43 = vsub.f32 %v6902_v13, %v6999_v37  ;;  %4687 = vpow2.f32 %v2728_v24  ;;  %v8682_v24 = vld [vmem:[#allocation10_spill] sm:$0xff] }
 0x818   : > { %v2736_v36 = vmul.f32 1.442695, %v2638_v32  ;;  %4689 = vpow2.f32 %v2732_v5  ;;  %v2748_v32 = vmul.f32 1.442695, %v2644_v60 }
 0x819   : > { %v2803_v3 = vadd.f32 %v7078_v57, %v2802_v62  ;;  %v7100_v62 = vmax.f32 %v2601_v41, %v2602_v16  ;;  %v2740_v13 = vmul.f32 1.442695, %v2640_v43 }
 0x81a   : > { %4691 = vpow2.f32 %v2736_v36 }
 0x81b   : > { %v2804_v53 = vadd.f32 %v7083_v51, %v2803_v3  ;;  %v7102_v3 = vpop.eup %4681  ;;  %v2605_v41 = vsub.f32 %v6806_v28, %v7100_v62  ;;  %v2607_v48 = vsub.f32 %v6814_v4, %v7100_v62  ;;  %v2650_v28 = vsub.f32 %v8683_v49, %v6999_v37 }
 0x81c   : > { %4693 = vpow2.f32 %v2740_v13  ;;  %v2609_v4 = vsub.f32 %v6818_v2, %v7100_v62 }
 0x81d   : > { %v2805_v22 = vadd.f32 %v7088_v50, %v2804_v53  ;;  %v7107_v53 = vpop.eup %4683  ;;  %4695 = vpow2.f32 %v2744_v26  ;;  %v2670_v33 = vmul.f32 1.442695, %v2605_v41  ;;  %v2674_v36 = vmul.f32 1.442695, %v2607_v48 }
 0x81e   : > { %v7114_v16 = vpop.eup %4685  ;;  %4697 = vpow2.f32 %v2748_v32  ;;  %v2613_v26 = vsub.f32 %v6830_v30, %v7100_v62  ;;  %v2678_v41 = vmul.f32 1.442695, %v2609_v4  ;;  %v2654_v48 = vsub.f32 %v6926_v27, %v6999_v37 }
 0x81f   : > { %v2806_v40 = vadd.f32 %v7093_v45, %v2805_v22  ;;  %v2648_v22 = vsub.f32 %v8682_v24, %v6999_v37  ;;  %v7121_v5 = vpop.eup %4687  ;;  %v2652_v24 = vsub.f32 %v6924_v14, %v6999_v37  ;;  %4699 = vpow2.f32 %v2670_v33 }
 0x820   : > { %v7128_v60 = vpop.eup %4689  ;;  %4701 = vpow2.f32 %v2674_v36  ;;  %v2615_v14 = vsub.f32 %v6838_v15, %v7100_v62  ;;  %v2656_v30 = vsub.f32 %v6930_v1, %v6999_v37  ;;  %v2686_v33 = vmul.f32 1.442695, %v2613_v26  ;;  %v8685_v15 = vld [vmem:[#allocation59_spill] sm:$0xff] }
 0x821   : > { %v2807_v42 = vadd.f32 %v7102_v3, %v2806_v40  ;;  %v2756_v49 = vmul.f32 1.442695, %v2648_v22  ;;  %v7135_v2 = vpop.eup %4691  ;;  %v2764_v4 = vmul.f32 1.442695, %v2652_v24  ;;  %v2619_v24 = vsub.f32 %v6850_v55, %v7100_v62 }
 0x822   : > { %v7142_v32 = vpop.eup %4693  ;;  %v2772_v26 = vmul.f32 1.442695, %v2656_v30 }
 0x823   : > { %v2808_v7 = vadd.f32 %v7107_v53, %v2807_v42  ;;  %v2752_v42 = vmul.f32 1.442695, %v2646_v29  ;;  %v2760_v29 = vmul.f32 1.442695, %v2650_v28  ;;  %v2617_v28 = vsub.f32 %v6842_v34, %v7100_v62  ;;  %v8687_v34 = vld [vmem:[#allocation39_spill] sm:$0xff] }
 0x825   : > { %v2809_v43 = vadd.f32 %v7114_v16, %v2808_v7  ;;  %v2611_v7 = vsub.f32 %v6826_v58, %v7100_v62  ;;  %4703 = vpow2.f32 %v2752_v42  ;;  %v2658_v42 = vsub.f32 %v8685_v15, %v6999_v37 }
 0x826   : > { %4705 = vpow2.f32 %v2756_v49  ;;  %v2694_v15 = vmul.f32 1.442695, %v2617_v28 }
 0x827   : > { %v2810_v40 = vadd.f32 %v7121_v5, %v2809_v43  ;;  %v2682_v22 = vmul.f32 1.442695, %v2611_v7  ;;  %v7146_v43 = vpop.eup %4695  ;;  %4707 = vpow2.f32 %v2678_v41  ;;  %v2768_v7 = vmul.f32 1.442695, %v2654_v48  ;;  %v8688_v48 = vld [vmem:[#allocation40_spill] sm:$0xff] }
 0x828   : > { %v7151_v27 = vpop.eup %4697  ;;  %4709 = vpow2.f32 %v2760_v29  ;;  %v2660_v41 = vsub.f32 %v8687_v34, %v6999_v37  ;;  %v2662_v29 = vsub.f32 %v8688_v48, %v6999_v37  ;;  %v2623_v48 = vsub.f32 %v6862_v19, %v7100_v62 }
 0x829   : > { %v2811_v13 = vadd.f32 %v7128_v60, %v2810_v40  ;;  %v7155_v36 = vpop.eup %4699  ;;  %4711 = vpow2.f32 %v2682_v22 }
 0x82a   : > { %8684 = vst [vmem:[#allocation32_spill] sm:$0xff] %v7155_v36  ;;  %v7160_v49 = vpop.eup %4701  ;;  %4713 = vpow2.f32 %v2764_v4 }
 0x82b   : > { %v2812_v58 = vadd.f32 %v7135_v2, %v2811_v13  ;;  %8686 = vst [vmem:[#allocation7_spill] sm:$0xff] %v7160_v49  ;;  %v2690_v13 = vmul.f32 1.442695, %v2615_v14  ;;  %v7167_v25 = vpop.eup %4703  ;;  %4715 = vpow2.f32 %v2686_v33  ;;  %v2776_v14 = vmul.f32 1.442695, %v2658_v42 }
 0x82c   : > { %v7173_v55 = vpop.eup %4705  ;;  %4717 = vpow2.f32 %v2768_v7  ;;  %v2833_v30 = vadd.f32 %v7160_v49, %v7155_v36  ;;  %v2780_v33 = vmul.f32 1.442695, %v2660_v41  ;;  %v8692_v49 = vld [vmem:[#allocation41_spill] sm:$0xff] }
 0x82d   : > { %v2813_v40 = vadd.f32 %v7142_v32, %v2812_v58  ;;  %v7178_v4 = vpop.eup %4707  ;;  %4719 = vpow2.f32 %v2690_v13  ;;  %v2666_v36 = vsub.f32 %v8692_v49, %v6999_v37 }
 0x82e   : > { %8689 = vst [vmem:[#allocation6_spill] sm:$0xff] %v7178_v4  ;;  %v7184_v28 = vpop.eup %4709  ;;  %4721 = vpow2.f32 %v2772_v26  ;;  %v2834_v7 = vadd.f32 %v7178_v4, %v2833_v30  ;;  %v2627_v30 = vsub.f32 %v6872_v17, %v7100_v62 }
 0x82f   : > { %v2814_v1 = vadd.f32 %v7146_v43, %v2813_v40  ;;  %v2621_v40 = vsub.f32 %v6854_v56, %v7100_v62  ;;  %v2698_v56 = vmul.f32 1.442695, %v2619_v24  ;;  %4723 = vpow2.f32 %v2694_v15 }
 0x830   : > { %4725 = vpow2.f32 %v2776_v14  ;;  %v2784_v24 = vmul.f32 1.442695, %v2662_v29  ;;  %v2629_v14 = vsub.f32 %v6876_v23, %v7100_v62  ;;  %v2792_v17 = vmul.f32 1.442695, %v2666_v36 }
 0x831   : > { %v2815_v58 = vadd.f32 %v7151_v27, %v2814_v1  ;;  %v8690_v1 = vld [vmem:[#allocation42_spill] sm:$0xff]  ;;  %v2702_v19 = vmul.f32 1.442695, %v2621_v40  ;;  %4727 = vpow2.f32 %v2698_v56  ;;  %v2633_v36 = vsub.f32 %v6886_v11, %v7100_v62 }
 0x832   : > { %v2664_v34 = vsub.f32 %v8690_v1, %v6999_v37  ;;  %v2625_v1 = vsub.f32 %v6866_v35, %v7100_v62  ;;  %v2706_v37 = vmul.f32 1.442695, %v2623_v48  ;;  %4729 = vpow2.f32 %v2780_v33 }
 0x833   : > { %v2816_v22 = vadd.f32 %v7167_v25, %v2815_v58  ;;  %v7188_v58 = vpop.eup %4711  ;;  %4731 = vpow2.f32 %v2702_v19  ;;  %v2631_v33 = vsub.f32 %v6882_v8, %v7100_v62 }
 0x834   : > { %8691 = vst [vmem:[#allocation12_spill] sm:$0xff] %v7188_v58  ;;  %v7194_v13 = vpop.eup %4713  ;;  %v2835_v26 = vadd.f32 %v7188_v58, %v2834_v7  ;;  %v2788_v35 = vmul.f32 1.442695, %v2664_v34  ;;  %4733 = vpow2.f32 %v2784_v24  ;;  %v2718_v24 = vmul.f32 1.442695, %v2629_v14 }
 0x835   : > { %v2817_v42 = vadd.f32 %v7173_v55, %v2816_v22  ;;  %v7198_v22 = vpop.eup %4715  ;;  %4735 = vpow2.f32 %v2706_v37 }
 0x836   : > { %8693 = vst [vmem:[#allocation5_spill] sm:$0xff] %v7198_v22  ;;  %v7202_v49 = vpop.eup %4717  ;;  %v2836_v15 = vadd.f32 %v7198_v22, %v2835_v26  ;;  %4737 = vpow2.f32 %v2788_v35  ;;  %v2635_v35 = vsub.f32 %v6892_v59, %v7100_v62 }
 0x837   : > { %v2818_v41 = vadd.f32 %v7184_v28, %v2817_v42  ;;  %v7206_v29 = vpop.eup %4719  ;;  %v2710_v42 = vmul.f32 1.442695, %v2625_v1 }
 0x838   : > { %8694 = vst [vmem:[#allocation17_spill] sm:$0xff] %v7206_v29  ;;  %v7210_v7 = vpop.eup %4721  ;;  %v2837_v56 = vadd.f32 %v7206_v29, %v2836_v15  ;;  %v2722_v15 = vmul.f32 1.442695, %v2631_v33 }
 0x839   : > { %v2819_v40 = vadd.f32 %v7194_v13, %v2818_v41  ;;  %v7214_v34 = vpop.eup %4723  ;;  %v2714_v41 = vmul.f32 1.442695, %v2627_v30  ;;  %4739 = vpow2.f32 %v2710_v42 }
 0x83a   : > { %v7218_v26 = vpop.eup %4725  ;;  %v2838_v1 = vadd.f32 %v7214_v34, %v2837_v56  ;;  %4741 = vpow2.f32 %v2792_v17  ;;  %v2637_v17 = vsub.f32 %v6896_v9, %v7100_v62  ;;  %v2726_v56 = vmul.f32 1.442695, %v2633_v36 }
 0x83b   : > { %v2820_v48 = vadd.f32 %v7202_v49, %v2819_v40  ;;  %v7222_v19 = vpop.eup %4727  ;;  %4743 = vpow2.f32 %v2714_v41  ;;  %v2639_v41 = vsub.f32 %v6900_v12, %v7100_v62 }
 0x83c   : > { %8695 = vst [vmem:[#allocation19_spill] sm:$0xff] %v7222_v19  ;;  %v7226_v40 = vpop.eup %4729  ;;  %v2839_v30 = vadd.f32 %v7222_v19, %v2838_v1  ;;  %4745 = vpow2.f32 %v2718_v24  ;;  %v2641_v24 = vsub.f32 %v6904_v10, %v7100_v62  ;;  %v2645_v10 = vsub.f32 %v6914_v39, %v7100_v62 }
 0x83d   : > { %v2821_v23 = vadd.f32 %v7210_v7, %v2820_v48  ;;  %v7230_v37 = vpop.eup %4731  ;;  %4747 = vpow2.f32 %v2722_v15  ;;  %v2649_v39 = vsub.f32 %v6922_v6, %v7100_v62  ;;  %v2653_v6 = vsub.f32 %v8672_v63, %v7100_v62 }
 0x83e   : > { %v7234_v48 = vpop.eup %4733  ;;  %v2840_v14 = vadd.f32 %v7230_v37, %v2839_v30  ;;  %4749 = vpow2.f32 %v2726_v56 }
 0x83f   : > { %v2822_v8 = vadd.f32 %v7218_v26, %v2821_v23  ;;  %v7238_v42 = vpop.eup %4735  ;;  %v2766_v63 = vmul.f32 1.442695, %v2653_v6  ;;  %v2663_v6 = vsub.f32 %v6993_v47, %v7100_v62 }
 0x840   : > { %v7242_v23 = vpop.eup %4737  ;;  %v2841_v59 = vadd.f32 %v7238_v42, %v2840_v14 }
 0x841   : > { %v2823_v11 = vadd.f32 %v7226_v40, %v2822_v8  ;;  %v7246_v33 = vpop.eup %4739  ;;  %v2730_v8 = vmul.f32 1.442695, %v2635_v35  ;;  %v8696_v35 = vld [vmem:[#allocation33_spill] sm:$0xff] }
 0x842   : > { %v7250_v30 = vpop.eup %4741  ;;  %v2842_v9 = vadd.f32 %v7246_v33, %v2841_v59  ;;  %v2643_v15 = vsub.f32 %v8696_v35, %v7100_v62  ;;  %v2647_v35 = vsub.f32 %v6918_v61, %v7100_v62  ;;  %v2651_v61 = vsub.f32 %v8671_v54, %v7100_v62 }
 0x843   : > { %v2824_v1 = vadd.f32 %v7234_v48, %v2823_v11  ;;  %v7254_v36 = vpop.eup %4743  ;;  %v2734_v11 = vmul.f32 1.442695, %v2637_v17  ;;  %4751 = vpow2.f32 %v2730_v8  ;;  %v2742_v17 = vmul.f32 1.442695, %v2641_v24 }
 0x844   : > { %v2843_v4 = vadd.f32 %v7254_v36, %v2842_v9  ;;  %v7260_v12 = vpop.eup %4745  ;;  %v2750_v24 = vmul.f32 1.442695, %v2645_v10  ;;  %v2758_v10 = vmul.f32 1.442695, %v2649_v39  ;;  %v2657_v54 = vsub.f32 %v6954_v20, %v7100_v62 }
 0x845   : > { %v2825_v58 = vadd.f32 %v7242_v23, %v2824_v1  ;;  %v2738_v1 = vmul.f32 1.442695, %v2639_v41  ;;  %v7265_v22 = vpop.eup %4747  ;;  %4753 = vpow2.f32 %v2734_v11  ;;  %v2746_v41 = vmul.f32 1.442695, %v2643_v15 }
 0x846   : > { %v2844_v59 = vadd.f32 %v7260_v12, %v2843_v4  ;;  %v7270_v9 = vpop.eup %4749  ;;  %v2754_v15 = vmul.f32 1.442695, %v2647_v35  ;;  %v2762_v35 = vmul.f32 1.442695, %v2651_v61  ;;  %v2661_v20 = vsub.f32 %v6982_v21, %v7100_v62 }
 0x847   : > { %v2826_v14 = vadd.f32 %v7250_v30, %v2825_v58  ;;  %4755 = vpow2.f32 %v2738_v1  ;;  %v2774_v61 = vmul.f32 1.442695, %v2657_v54  ;;  %v2667_v21 = vsub.f32 %v7037_v18, %v7100_v62 }
 0x848   : > { %v2845_v56 = vadd.f32 %v7265_v22, %v2844_v59  ;;  %4757 = vpow2.f32 %v2742_v17 }
 0x849   : > { %v2827_v29 = vrot.slane %v2826_v14, 4  ;;  %v7275_v19 = vpop.eup %4751  ;;  %4759 = vpow2.f32 %v2746_v41 }
 0x84a   : > { %v2846_v4 = vadd.f32 %v7270_v9, %v2845_v56  ;;  %4761 = vpow2.f32 %v2750_v24 }
 0x84b   : > { %v2828_v58 = vadd.f32 %v2827_v29, %v2826_v14  ;;  %v7280_v14 = vpop.eup %4753  ;;  %4763 = vpow2.f32 %v2754_v15 }
 0x84c   : > { %v2847_v11 = vadd.f32 %v7275_v19, %v2846_v4 }
 0x84d   : > { %v2829_v8 = vrot.slane %v2828_v58, 2  ;;  %v7285_v56 = vpop.eup %4755 }
 0x84e   : > { %v2848_v59 = vadd.f32 %v7280_v14, %v2847_v11  ;;  %v7292_v4 = vpop.eup %4757 }
 0x84f   : > { %v2830_v29 = vadd.f32 %v2829_v8, %v2828_v58  ;;  %v2655_v58 = vsub.f32 %v8673_v46, %v7100_v62  ;;  %v7297_v11 = vpop.eup %4759 }
 0x850   : > { %v2849_v8 = vadd.f32 %v7285_v56, %v2848_v59  ;;  %v7300_v46 = vpop.eup %4761 }
 0x851   : > { %v2831_v1 = vrot.slane %v2830_v29, 1  ;;  %v2770_v39 = vmul.f32 1.442695, %v2655_v58 }
 0x852   : > { %v2850_v41 = vadd.f32 %v7292_v4, %v2849_v8  ;;  %v2782_v8 = vmul.f32 1.442695, %v2661_v20 }
 0x853   : > { %v2832_v17 = vadd.f32 %v2831_v1, %v2830_v29  ;;  %v2659_v29 = vsub.f32 %v6970_v52, %v7100_v62  ;;  %v7307_v1 = vpop.eup %4763 }
 0x854   : > { %v2851_v24 = vadd.f32 %v7297_v11, %v2850_v41 }
 0x855   : > { %4765 = vrcp.f32 %v2832_v17  ;;  %v2778_v58 = vmul.f32 1.442695, %v2659_v29 }
 0x856   : > { %4767 = vpow2.f32 %v2758_v10  ;;  %v2852_v15 = vadd.f32 %v7300_v46, %v2851_v24  ;;  %v2665_v10 = vsub.f32 %v7013_v31, %v7100_v62 }
 0x857   : > { %4769 = vpow2.f32 %v2762_v35 }
 0x858   : > { %4771 = vpow2.f32 %v2766_v63  ;;  %v2853_v52 = vadd.f32 %v7307_v1, %v2852_v15 }
 0x859   : > { %4773 = vpow2.f32 %v2770_v39  ;;  %v2786_v39 = vmul.f32 1.442695, %v2663_v6 }
 0x85a   : > { %4775 = vpow2.f32 %v2774_v61 }
 0x85b   : > { %v7309_v59 = vpop.eup %4765  ;;  %4777 = vpow2.f32 %v2778_v58 }
 0x85c   : > { %v7316_v17 = vpop.eup %4767  ;;  %v2900_v35 = vmul.f32 %v7309_v59, %v7114_v16  ;;  %v2902_v47 = vmul.f32 %v7309_v59, %v7121_v5  ;;  %v2932_v31 = vmul.f32 %v7309_v59, %v7242_v23  ;;  %v2934_v63 = vmul.f32 %v7309_v59, %v7250_v30 }
 0x85d   : > { %v2854_v54 = vadd.f32 %v7316_v17, %v2853_v52  ;;  %v7327_v41 = vpop.eup %4769  ;;  %v2896_v18 = vmul.f32 %v7309_v59, %v7102_v3  ;;  %v2898_v62 = vmul.f32 %v7309_v59, %v7107_v53  ;;  %v2928_v16 = vmul.f32 %v7309_v59, %v7226_v40 }
 0x85e   : > { %v2954_v24 = vpack.c.bf16 %v2902_v47, %v2900_v35  ;;  %v2930_v23 = vmul.f32 %v7309_v59, %v7234_v48  ;;  %v7340_v29 = vpop.eup %4771  ;;  %v2970_v30 = vpack.c.bf16 %v2934_v63, %v2932_v31  ;;  %v2924_v3 = vmul.f32 %v7309_v59, %v7210_v7 }
 0x85f   : > { %v2855_v5 = vadd.f32 %v7327_v41, %v2854_v54  ;;  %v2952_v20 = vpack.c.bf16 %v2898_v62, %v2896_v18  ;;  %v7344_v61 = vpop.eup %4773  ;;  %v2790_v53 = vmul.f32 1.442695, %v2665_v10  ;;  %v2926_v6 = vmul.f32 %v7309_v59, %v7218_v26 }
 0x860   : > { %2972 = vmatpush.bf16.msra.mxu2 %v2954_v24  ;;  %v2968_v15 = vpack.c.bf16 %v2930_v23, %v2928_v16  ;;  %v7349_v52 = vpop.eup %4775  ;;  %4779 = vpow2.f32 %v2782_v8  ;;  %v2794_v48 = vmul.f32 1.442695, %v2667_v21  ;;  %2991 = vmatpush.bf16.msra.mxu3 %v2970_v30  ;;  %v2892_v7 = vmul.f32 %v7309_v59, %v7088_v50 }
 0x861   : > { %v2856_v40 = vadd.f32 %v7340_v29, %v2855_v5  ;;  %v2894_v10 = vmul.f32 %v7309_v59, %v7093_v45  ;;  %v2966_v54 = vpack.c.bf16 %v2926_v6, %v2924_v3  ;;  %4781 = vpow2.f32 %v2786_v39  ;;  %v7357_v26 = vpop.eup %4777  ;;  %v8697_v6 = vld [vmem:[#allocation8_spill] sm:$0xff] }
 0x862   : > { %4783 = vpow2.f32 %v2790_v53  ;;  %v2888_v21 = vmul.f32 %v7309_v59, %v7078_v57  ;;  %v2912_v8 = vmul.f32 %v7309_v59, %v7151_v27  ;;  %v2914_v50 = vmul.f32 %v7309_v59, %v7167_v25 }
 0x863   : > { %v2857_v58 = vadd.f32 %v7344_v61, %v2856_v40  ;;  %4785 = vpow2.f32 %v2794_v48  ;;  %v2950_v47 = vpack.c.bf16 %v2894_v10, %v2892_v7  ;;  %v2890_v31 = vmul.f32 %v7309_v59, %v7083_v51  ;;  %v8698_v10 = vld [vmem:[#allocation47_spill] sm:$0xff] }
 0x864   : > { %2973 = vmatpush.bf16.msra.mxu2 %v2952_v20  ;;  %2992 = vmatpush.bf16.msra.mxu3 %v2968_v15  ;;  %v2908_v63 = vmul.f32 %v7309_v59, %v7142_v32  ;;  %v2920_v57 = vmul.f32 %v7309_v59, %v7194_v13  ;;  %v2922_v27 = vmul.f32 %v7309_v59, %v7202_v49 }
 0x865   : > { %v2858_v35 = vadd.f32 %v7349_v52, %v2857_v58  ;;  %v2960_v62 = vpack.c.bf16 %v2914_v50, %v2912_v8  ;;  %v2910_v25 = vmul.f32 %v7309_v59, %v7146_v43  ;;  %v2904_v51 = vmul.f32 %v7309_v59, %v7128_v60  ;;  %v8700_v50 = vld [vmem:[#allocation43_spill] sm:$0xff] }
 0x866   : > { %v7370_v18 = vpop.eup %4779  ;;  %v2906_v32 = vmul.f32 %v7309_v59, %v7135_v2  ;;  %v2884_v13 = vmul.f32 %v7309_v59, %v7068_v38  ;;  %v2948_v23 = vpack.c.bf16 %v2890_v31, %v2888_v21  ;;  %v2886_v43 = vmul.f32 %v7309_v59, %v7073_v44 }
 0x867   : > { %v2859_v45 = vadd.f32 %v7357_v26, %v2858_v35  ;;  %v4782_v39 = vpop.eup %4781  ;;  %v2958_v5 = vpack.c.bf16 %v2910_v25, %v2908_v63  ;;  %v2964_v3 = vpack.c.bf16 %v2922_v27, %v2920_v57  ;;  %v2916_v60 = vmul.f32 %v7309_v59, %v7173_v55  ;;  %v8702_v25 = vld [vmem:[#allocation46_spill] sm:$0xff] }
 0x868   : > { %2974 = vmatpush.bf16.msra.mxu2 %v2950_v47  ;;  %2993 = vmatpush.bf16.msra.mxu3 %v2966_v54  ;;  %v4784_v49 = vpop.eup %4783  ;;  %v2956_v30 = vpack.c.bf16 %v2906_v32, %v2904_v51  ;;  %v2918_v2 = vmul.f32 %v7309_v59, %v7184_v28  ;;  %v2946_v40 = vpack.c.bf16 %v2886_v43, %v2884_v13  ;;  %v8699_v54 = vld [vmem:[#allocation34_spill] sm:$0xff]  ;;  %v8701_v47 = vld [vmem:[#allocation44_spill] sm:$0xff] }
 0x869   : > { %v2860_v16 = vadd.f32 %v7370_v18, %v2859_v45  ;;  %v4786_v20 = vpop.eup %4785  ;;  %v2880_v15 = vmul.f32 %v7309_v59, %v7058_v0  ;;  %v2882_v44 = vmul.f32 %v7309_v59, %v8697_v6  ;;  %v2876_v28 = vmul.f32 %v7309_v59, %v8698_v10  ;;  %v8705_v32 = vld [vmem:[#allocation52_spill] sm:$0xff] }
 0x86a   : > { %v2962_v48 = vpack.c.bf16 %v2918_v2, %v2916_v60  ;;  %v2878_v35 = vmul.f32 %v7309_v59, %v8699_v54  ;;  %v2872_v45 = vmul.f32 %v7309_v59, %v8700_v50  ;;  %v2874_v31 = vmul.f32 %v7309_v59, %v8701_v47  ;;  %v8710_v54 = vld [vmem:[#allocation19_spill] sm:$0xff]  ;;  %v8712_v50 = vld [vmem:[#allocation17_spill] sm:$0xff] }
 0x86b   : > { %v2861_v24 = vadd.f32 %v4782_v39, %v2860_v16  ;;  %v2944_v55 = vpack.c.bf16 %v2882_v44, %v2880_v15  ;;  %v8703_v16 = vld [vmem:[#allocation48_spill] sm:$0xff]  ;;  %v8706_v44 = vld [vmem:[#allocation51_spill] sm:$0xff] }
 0x86c   : > { %2975 = vmatpush.bf16.msra.mxu2 %v2948_v23  ;;  %2994 = vmatpush.bf16.msra.mxu3 %v2964_v3  ;;  %v2942_v0 = vpack.c.bf16 %v2878_v35, %v2876_v28  ;;  %v2940_v27 = vpack.c.bf16 %v2874_v31, %v2872_v45  ;;  %v7405_v51 = vpack.c.bf16 %v8703_v16, %v8702_v25  ;;  %v8713_v31 = vld [vmem:[#allocation6_spill] sm:$0xff]  ;;  %v8716_v16 = vld [vmem:[#allocation7_spill] sm:$0xff] }
 0x86d   : > { %v2862_v53 = vadd.f32 %v4784_v49, %v2861_v24 }
 0x86f   : > { %v2863_v38 = vadd.f32 %v4786_v20, %v2862_v53 }
 0x870   : > { %2976 = vmatpush.bf16.msra.mxu2 %v2946_v40  ;;  %2995 = vmatpush.bf16.msra.mxu3 %v2962_v48  ;;  %v8707_v48 = vld [vmem:[#allocation53_spill] sm:$0xff] }
 0x871   : > { %v2864_v58 = vrot.slane %v2863_v38, 4 }
 0x873   : > { %v2865_v7 = vadd.f32 %v2864_v58, %v2863_v38  ;;  %v2938_v58 = vpack.c.bf16 %v8707_v48, %v8706_v44 }
 0x874   : > { %2977 = vmatpush.bf16.msra.mxu2 %v2944_v55  ;;  %2996 = vmatpush.bf16.msra.mxu3 %v2960_v62  ;;  %v8704_v62 = vld [vmem:[#allocation50_spill] sm:$0xff] }
 0x875   : > { %v2866_v21 = vrot.slane %v2865_v7, 2  ;;  %v7409_v13 = vpack.c.bf16 %v8705_v32, %v8704_v62 }
 0x877   : > { %v2867_v8 = vadd.f32 %v2866_v21, %v2865_v7  ;;  %v8709_v7 = vld [vmem:[#allocation57_spill] sm:$0xff] }
 0x878   : > { %2978 = vmatpush.bf16.msra.mxu2 %v2942_v0  ;;  %2997 = vmatpush.bf16.msra.mxu3 %v2958_v5  ;;  %v8711_v0 = vld [vmem:[#allocation5_spill] sm:$0xff] }
 0x879   : > { %v2868_v63 = vrot.slane %v2867_v8, 1 }
 0x87b   : > { %v2869_v57 = vadd.f32 %v2868_v63, %v2867_v8 }
 0x87c   : > { %2979 = vmatpush.bf16.msra.mxu2 %v2940_v27  ;;  %2998 = vmatpush.bf16.msra.mxu3 %v2956_v30  ;;  %v8715_v27 = vld [vmem:[#allocation32_spill] sm:$0xff] }
 0x87d   : > { %4787 = vrcp.f32 %v2869_v57 }
 0x87f   : > { %2980 = vmatmul.bf16.vlgmr.msra.gmra.mxu2 %v7405_v51  ;;  %2999 = vmatmul.bf16.vlgmr.msra.gmra.mxu3 %v7409_v13 }
 0x883   : > { %v7413_v59 = vpop.eup %4787 }
 0x884   : > { %v2901_v5 = vmul.f32 %v7413_v59, %v7270_v9  ;;  %v2903_v24 = vmul.f32 %v7413_v59, %v7275_v19  ;;  %v2933_v23 = vmul.f32 %v7413_v59, %v4784_v49  ;;  %v2935_v43 = vmul.f32 %v7413_v59, %v4786_v20 }
 0x885   : > { %v2897_v30 = vmul.f32 %v7413_v59, %v7260_v12  ;;  %v2899_v3 = vmul.f32 %v7413_v59, %v7265_v22  ;;  %v2929_v53 = vmul.f32 %v7413_v59, %v7370_v18  ;;  %v2931_v9 = vmul.f32 %v7413_v59, %v4782_v39 }
 0x886   : > { %v2955_v60 = vpack.c.bf16 %v2903_v24, %v2901_v5  ;;  %v2971_v2 = vpack.c.bf16 %v2935_v43, %v2933_v23  ;;  %v2893_v19 = vmul.f32 %v7413_v59, %v7246_v33  ;;  %v2895_v49 = vmul.f32 %v7413_v59, %v7254_v36  ;;  %v8717_v5 = vld [vmem:[#allocation25_spill] sm:$0xff]  ;;  %v8718_v24 = vld [vmem:[#allocation27_spill] sm:$0xff]  ;;  %v8719_v43 = vld [vmem:[#allocation26_spill] sm:$0xff] }
 0x887   : > { %v2953_v38 = vpack.c.bf16 %v2899_v3, %v2897_v30  ;;  %v2925_v12 = vmul.f32 %v7413_v59, %v7349_v52  ;;  %v2927_v22 = vmul.f32 %v7413_v59, %v7357_v26  ;;  %v2969_v20 = vpack.c.bf16 %v2931_v9, %v2929_v53  ;;  %v8720_v30 = vld [vmem:[#allocation28_spill] sm:$0xff]  ;;  %v8723_v9 = vld [vmem:[#allocation22_spill] sm:$0xff] }
 0x888   : > { %3010 = vmatpush.bf16.msrb.mxu2 %v2955_v60  ;;  %3029 = vmatpush.bf16.msrb.mxu3 %v2971_v2  ;;  %v2913_v18 = vmul.f32 %v7413_v59, %v7300_v46  ;;  %v2951_v39 = vpack.c.bf16 %v2895_v49, %v2893_v19  ;;  %v2915_v40 = vmul.f32 %v7413_v59, %v7307_v1  ;;  %v8721_v60 = vld [vmem:[#allocation21_spill] sm:$0xff]  ;;  %v8722_v2 = vld [vmem:[#allocation23_spill] sm:$0xff] }
 0x889   : > { %v2967_v33 = vpack.c.bf16 %v2927_v22, %v2925_v12  ;;  %v2889_v36 = vmul.f32 %v7413_v59, %v7230_v37  ;;  %v2891_v52 = vmul.f32 %v7413_v59, %v7238_v42  ;;  %v2909_v26 = vmul.f32 %v7413_v59, %v7292_v4  ;;  %v8708_v37 = vld [vmem:[#allocation54_spill] sm:$0xff] }
 0x88a   : > { %v2921_v15 = vmul.f32 %v7413_v59, %v7340_v29  ;;  %v2923_v46 = vmul.f32 %v7413_v59, %v7344_v61  ;;  %v2961_v6 = vpack.c.bf16 %v2915_v40, %v2913_v18  ;;  %v2911_v1 = vmul.f32 %v7413_v59, %v7297_v11 }
 0x88b   : > { %v2939_v55 = vpack.c.bf16 %v8709_v7, %v8708_v37  ;;  %v2905_v42 = vmul.f32 %v7413_v59, %v7280_v14  ;;  %v2907_v4 = vmul.f32 %v7413_v59, %v7285_v56  ;;  %v2949_v61 = vpack.c.bf16 %v2891_v52, %v2889_v36 }
 0x88c   : > { %3011 = vmatpush.bf16.msrb.mxu2 %v2953_v38  ;;  %3030 = vmatpush.bf16.msrb.mxu3 %v2969_v20  ;;  %v2959_v29 = vpack.c.bf16 %v2911_v1, %v2909_v26  ;;  %v2885_v10 = vmul.f32 %v7413_v59, %v7214_v34  ;;  %v2965_v28 = vpack.c.bf16 %v2923_v46, %v2921_v15  ;;  %v8724_v38 = vld [vmem:[#allocation24_spill] sm:$0xff] }
 0x88d   : > { %v2957_v11 = vpack.c.bf16 %v2907_v4, %v2905_v42  ;;  %v2887_v35 = vmul.f32 %v7413_v59, %v8710_v54  ;;  %v2917_v14 = vmul.f32 %v7413_v59, %v7316_v17  ;;  %v2919_v56 = vmul.f32 %v7413_v59, %v7327_v41  ;;  %v8714_v17 = vld [vmem:[#allocation12_spill] sm:$0xff] }
 0x88e   : > { %v2881_v34 = vmul.f32 %v7413_v59, %v8711_v0  ;;  %v2883_v45 = vmul.f32 %v7413_v59, %v8712_v50  ;;  %v2877_v63 = vmul.f32 %v7413_v59, %v8713_v31  ;;  %v2879_v57 = vmul.f32 %v7413_v59, %v8714_v17 }
 0x88f   : > { %2985 = vmatmul.bf16.gmra.mxu2 %v2938_v58  ;;  %3004 = vmatmul.bf16.gmra.mxu3 %v2939_v55  ;;  %v2947_v21 = vpack.c.bf16 %v2887_v35, %v2885_v10  ;;  %v2963_v8 = vpack.c.bf16 %v2919_v56, %v2917_v14  ;;  %v2873_v25 = vmul.f32 %v7413_v59, %v8715_v27 }
 0x890   : > { %3012 = vmatpush.bf16.msrb.mxu2 %v2951_v39  ;;  %3031 = vmatpush.bf16.msrb.mxu3 %v2967_v33  ;;  %v2945_v47 = vpack.c.bf16 %v2883_v45, %v2881_v34  ;;  %v2943_v41 = vpack.c.bf16 %v2879_v57, %v2877_v63  ;;  %v2875_v62 = vmul.f32 %v7413_v59, %v8716_v16  ;;  %v3064_v59 = vpop.trf.xlu0 }
 0x891   : > { %v3054_v23 = vpack.c.bf16 %v8718_v24, %v8717_v5  ;;  %v3055_v3 = vpack.c.bf16 %v8720_v30, %v8719_v43  ;;  %v3052_v53 = vpack.c.bf16 %v8722_v2, %v8721_v60  ;;  %v3053_v19 = vpack.c.bf16 %v8724_v38, %v8723_v9 }
 0x892   : > { %v2941_v32 = vpack.c.bf16 %v2875_v62, %v2873_v25 }
 0x894   : > { %3013 = vmatpush.bf16.msrb.mxu2 %v2949_v61  ;;  %3032 = vmatpush.bf16.msrb.mxu3 %v2965_v28 }
 0x898   : > { %3014 = vmatpush.bf16.msrb.mxu2 %v2947_v21  ;;  %3033 = vmatpush.bf16.msrb.mxu3 %v2963_v8  ;;  %v3065_v49 = vpop.trf.xlu0 }
 0x89c   : > { %3015 = vmatpush.bf16.msrb.mxu2 %v2945_v47  ;;  %3034 = vmatpush.bf16.msrb.mxu3 %v2961_v6 }
 0x8a0   : > { %3016 = vmatpush.bf16.msrb.mxu2 %v2943_v41  ;;  %3035 = vmatpush.bf16.msrb.mxu3 %v2959_v29  ;;  %v3066_v12 = vpop.trf.xlu0 }
 0x8a4   : > { %3017 = vmatpush.bf16.msrb.mxu2 %v2941_v32  ;;  %3036 = vmatpush.bf16.msrb.mxu3 %v2957_v11 }
 0x8a7   : > { %3018 = vmatmul.bf16.vlgmr.msrb.gmra.mxu2 %v7405_v51  ;;  %3037 = vmatmul.bf16.vlgmr.msrb.gmra.mxu3 %v7409_v13 }
 0x8a8   : > { %3134 = vmatpush.bf16.msra.mxu2 %v3054_v23  ;;  %3223 = vmatpush.bf16.msra.mxu3 %v3055_v3  ;;  %v7490_v22 = vpop.trf.xlu0 }
 0x8ac   : > { %3135 = vmatpush.bf16.msra.mxu2 %v3052_v53  ;;  %3224 = vmatpush.bf16.msra.mxu3 %v3053_v19 }
 0x8b0   : > { %v3068_v20 = vpop.trf.xlu0 }
 0x8b7   : > { %3023 = vmatmul.bf16.gmra.mxu2 %v2938_v58  ;;  %3042 = vmatmul.bf16.gmra.mxu3 %v2939_v55 }
 0x8b8   : > { %v7496_v51 = vpop.trf.xlu0 }
 0x8c0   : > { %v3070_v13 = vpop.trf.xlu0 }
 0x8c7   : > { %4267 = vmatmul.msk.bf16.vlgmr.msra.gmra.mxu2 %vm389_vm0, %v3064_v59  ;;  %4283 = vmatmul.msk.bf16.vlgmr.msra.gmra.mxu3 %vm389_vm0, %v3064_v59 }
 0x8c8   : > { %v7500_v18 = vpop.trf.xlu0 }
 0x8d0   : > { %v3072_v39 = vpop.trf.xlu0 }
 0x8d7   : > { %4268 = vmatmul.msk.bf16.gmra.mxu2 %vm389_vm0, %v3066_v12  ;;  %4284 = vmatmul.msk.bf16.gmra.mxu3 %vm389_vm0, %v3066_v12 }
 0x8d8   : > { %v7504_v40 = vpop.trf.xlu0 }
 0x8e0   : > { %v3074_v15 = vpop.trf.xlu0 }
 0x8e7   : > { %4269 = vmatmul.msk.bf16.gmra.mxu2 %vm389_vm0, %v3068_v20  ;;  %4285 = vmatmul.msk.bf16.gmra.mxu3 %vm389_vm0, %v3068_v20 }
 0x8e8   : > { %v3075_v37 = vpop.trf.xlu0 }
 0x8f0   : > { %v3076_v29 = vpop.trf.xlu0 }
 0x8f7   : > { %4270 = vmatmul.msk.bf16.gmra.mxu2 %vm389_vm0, %v3070_v13  ;;  %4286 = vmatmul.msk.bf16.gmra.mxu3 %vm389_vm0, %v3070_v13 }
 0x8f8   : > { %v3077_v61 = vpop.trf.xlu0 }
 0x900   : > { %v3078_v56 = vpop.trf.xlu0 }
 0x902   : > { %v2981_v33 = vpop.f32.mrf.mxu2  ;;  %v3000_v36 = vpop.f32.mrf.mxu3 }
 0x903   : > { %v7506_v52 = vadd.f32 %v3000_v36, %v2981_v33 }
 0x905   : > { %8725 = vst [vmem:[#allocation18_spill] sm:$0xff] %v7506_v52 }
 0x907   : > { %4271 = vmatmul.msk.bf16.gmra.mxu2 %vm389_vm0, %v3072_v39  ;;  %4287 = vmatmul.msk.bf16.gmra.mxu3 %vm389_vm0, %v3072_v39 }
 0x90a   : > { %v2983_v26 = vpop.f32.mrf.mxu2  ;;  %v3002_v46 = vpop.f32.mrf.mxu3 }
 0x90b   : > { %v7510_v6 = vadd.f32 %v3002_v46, %v2983_v26 }
 0x90d   : > { %8726 = vst [vmem:[#allocation20_spill] sm:$0xff] %v7510_v6 }
 0x912   : > { %v2986_v44 = vpop.f32.mrf.mxu2  ;;  %v3005_v48 = vpop.f32.mrf.mxu3 }
 0x913   : > { %v7514_v58 = vadd.f32 %v3005_v48, %v2986_v44 }
 0x915   : > { %8727 = vst [vmem:[#allocation13_spill] sm:$0xff] %v7514_v58 }
 0x917   : > { %4272 = vmatmul.msk.bf16.gmra.mxu2 %vm389_vm0, %v3074_v15  ;;  %4288 = vmatmul.msk.bf16.gmra.mxu3 %vm389_vm0, %v3074_v15 }
 0x91a   : > { %v2988_v7 = vpop.f32.mrf.mxu2  ;;  %v3007_v55 = vpop.f32.mrf.mxu3 }
 0x91b   : > { %v7518_v42 = vadd.f32 %v3007_v55, %v2988_v7 }
 0x91d   : > { %8728 = vst [vmem:[#allocation15_spill] sm:$0xff] %v7518_v42 }
 0x927   : > { %4273 = vmatmul.msk.bf16.gmra.mxu2 %vm389_vm0, %v3076_v29  ;;  %4289 = vmatmul.msk.bf16.gmra.mxu3 %vm389_vm0, %v3076_v29 }
 0x92a   : > { %v3019_v10 = vpop.f32.mrf.mxu2  ;;  %v3038_v11 = vpop.f32.mrf.mxu3 }
 0x92b   : > { %v7524_v28 = vadd.f32 %v3038_v11, %v3019_v10 }
 0x92d   : > { %8729 = vst [vmem:[#allocation14_spill] sm:$0xff] %v7524_v28 }
 0x932   : > { %v3021_v54 = vpop.f32.mrf.mxu2  ;;  %v3040_v35 = vpop.f32.mrf.mxu3 }
 0x933   : > { %v7526_v14 = vadd.f32 %v3040_v35, %v3021_v54 }
 0x935   : > { %8730 = vst [vmem:[#allocation16_spill] sm:$0xff] %v7526_v14 }
 0x937   : > { %4274 = vmatmul.msk.bf16.gmra.mxu2 %vm389_vm0, %v3078_v56  ;;  %4290 = vmatmul.msk.bf16.gmra.mxu3 %vm389_vm0, %v3078_v56 }
 0x93a   : > { %v3024_v8 = vpop.f32.mrf.mxu2  ;;  %v3043_v0 = vpop.f32.mrf.mxu3 }
 0x93b   : > { %v7532_v34 = vadd.f32 %v3043_v0, %v3024_v8 }
 0x93d   : > { %8731 = vst [vmem:[#allocation11_spill] sm:$0xff] %v7532_v34 }
 0x942   : > { %v3026_v50 = vpop.f32.mrf.mxu2  ;;  %v3045_v45 = vpop.f32.mrf.mxu3 }
 0x943   : > { %v7534_v47 = vadd.f32 %v3045_v45, %v3026_v50 }
 0x945   : > { %8732 = vst [vmem:[#allocation45_spill] sm:$0xff] %v7534_v47 }
 0x947   : > { %4275 = vmatmul.msk.bf16.gmra.mxu2 %vm389_vm0, %v3065_v49  ;;  %4291 = vmatmul.msk.bf16.gmra.mxu3 %vm389_vm0, %v3065_v49 }
 0x94a   : > { %v7540_v63 = vpop.f32.mrf.mxu2  ;;  %v7542_v17 = vpop.f32.mrf.mxu3 }
 0x952   : > { %v7544_v57 = vpop.f32.mrf.mxu2  ;;  %v7546_v41 = vpop.f32.mrf.mxu3 }
 0x957   : > { %4276 = vmatmul.msk.bf16.gmra.mxu2 %vm389_vm0, %v7490_v22  ;;  %4292 = vmatmul.msk.bf16.gmra.mxu3 %vm389_vm0, %v7490_v22 }
 0x95a   : > { %v7552_v27 = vpop.f32.mrf.mxu2  ;;  %v7554_v25 = vpop.f32.mrf.mxu3 }
 0x95b   : > { %v3306_v31 = vmax.f32 %v7540_v63, %v7552_v27 }
 0x962   : > { %v7556_v16 = vpop.f32.mrf.mxu2  ;;  %v7558_v62 = vpop.f32.mrf.mxu3 }
 0x963   : > { %v3307_v1 = vmax.f32 %v7544_v57, %v7556_v16 }
 0x967   : > { %4277 = vmatmul.msk.bf16.gmra.mxu2 %vm389_vm0, %v7496_v51  ;;  %4293 = vmatmul.msk.bf16.gmra.mxu3 %vm389_vm0, %v7496_v51 }
 0x96a   : > { %v7564_v32 = vpop.f32.mrf.mxu2  ;;  %v7566_v5 = vpop.f32.mrf.mxu3 }
 0x96b   : > { %v3308_v28 = vmax.f32 %v3306_v31, %v7564_v32 }
 0x972   : > { %v7568_v24 = vpop.f32.mrf.mxu2  ;;  %v7570_v23 = vpop.f32.mrf.mxu3 }
 0x973   : > { %v3309_v14 = vmax.f32 %v3307_v1, %v7568_v24 }
 0x977   : > { %4278 = vmatmul.msk.bf16.gmra.mxu2 %vm389_vm0, %v7500_v18  ;;  %4294 = vmatmul.msk.bf16.gmra.mxu3 %vm389_vm0, %v7500_v18  ;;  %v3079_v18 = vpop.trf.xlu0 }
 0x97a   : > { %v7576_v43 = vpop.f32.mrf.mxu2  ;;  %v7578_v30 = vpop.f32.mrf.mxu3 }
 0x97b   : > { %v3310_v47 = vmax.f32 %v3308_v28, %v7576_v43 }
 0x982   : > { %v7580_v3 = vpop.f32.mrf.mxu2  ;;  %v7582_v60 = vpop.f32.mrf.mxu3 }
 0x983   : > { %v3311_v52 = vmax.f32 %v3309_v14, %v7580_v3 }
 0x987   : > { %4279 = vmatmul.msk.bf16.gmra.mxu2 %vm389_vm0, %v7504_v40  ;;  %4295 = vmatmul.msk.bf16.gmra.mxu3 %vm389_vm0, %v7504_v40 }
 0x98a   : > { %v7588_v2 = vpop.f32.mrf.mxu2  ;;  %v7590_v53 = vpop.f32.mrf.mxu3 }
 0x98b   : > { %v3312_v6 = vmax.f32 %v3310_v47, %v7588_v2 }
 0x992   : > { %v7592_v9 = vpop.f32.mrf.mxu2  ;;  %v7594_v38 = vpop.f32.mrf.mxu3 }
 0x993   : > { %v3313_v58 = vmax.f32 %v3311_v52, %v7592_v9 }
 0x997   : > { %4280 = vmatmul.msk.bf16.gmra.mxu2 %vm389_vm0, %v3075_v37  ;;  %4296 = vmatmul.msk.bf16.gmra.mxu3 %vm389_vm0, %v3075_v37 }
 0x99a   : > { %v7598_v19 = vpop.f32.mrf.mxu2  ;;  %v7600_v59 = vpop.f32.mrf.mxu3 }
 0x99b   : > { %v3314_v42 = vmax.f32 %v3312_v6, %v7598_v19 }
 0x9a2   : > { %v7602_v49 = vpop.f32.mrf.mxu2  ;;  %v7604_v12 = vpop.f32.mrf.mxu3 }
 0x9a7   : > { %4281 = vmatmul.msk.bf16.gmra.mxu2 %vm389_vm0, %v3077_v61  ;;  %4297 = vmatmul.msk.bf16.gmra.mxu3 %vm389_vm0, %v3077_v61 }
 0x9aa   : > { %v7608_v22 = vpop.f32.mrf.mxu2  ;;  %v7610_v20 = vpop.f32.mrf.mxu3 }
 0x9ab   : > { %8733 = vst [vmem:[#allocation36_spill] sm:$0xff] %v7608_v22 }
 0x9b2   : > { %v7612_v51 = vpop.f32.mrf.mxu2  ;;  %v7614_v13 = vpop.f32.mrf.mxu3 }
 0x9b3   : > { %8734 = vst [vmem:[#allocation67_spill] sm:$0xff] %v7612_v51 }
 0x9b7   : > { %4282 = vmatmul.msk.bf16.gmra.mxu2 %vm389_vm0, %v3079_v18  ;;  %4298 = vmatmul.msk.bf16.gmra.mxu3 %vm389_vm0, %v3079_v18 }
 0x9ba   : > { %v7618_v39 = vpop.f32.mrf.mxu2  ;;  %v7620_v40 = vpop.f32.mrf.mxu3 }
 0x9bb   : > { %8735 = vst [vmem:[#allocation62_spill] sm:$0xff] %v7618_v39 }
 0x9c2   : > { %v7622_v33 = vpop.f32.mrf.mxu2  ;;  %v7624_v36 = vpop.f32.mrf.mxu3 }
 0x9ca   : > { %v7626_v26 = vpop.f32.mrf.mxu2  ;;  %v7628_v15 = vpop.f32.mrf.mxu3 }
 0x9d2   : > { %v7630_v46 = vpop.f32.mrf.mxu2  ;;  %v7632_v44 = vpop.f32.mrf.mxu3 }
 0x9da   : > { %v7634_v48 = vpop.f32.mrf.mxu2  ;;  %v7636_v37 = vpop.f32.mrf.mxu3 }
 0x9e2   : > { %v7638_v7 = vpop.f32.mrf.mxu2  ;;  %v7642_v29 = vpop.f32.mrf.mxu3 }
 0x9e3   : > { %8736 = vst [vmem:[#allocation73_spill] sm:$0xff] %v7642_v29 }
 0x9ea   : > { %v7640_v55 = vpop.f32.mrf.mxu2  ;;  %v7646_v10 = vpop.f32.mrf.mxu3 }
 0x9f2   : > { %v7644_v61 = vpop.f32.mrf.mxu2  ;;  %v7650_v54 = vpop.f32.mrf.mxu3 }
 0x9fa   : > { %v7648_v11 = vpop.f32.mrf.mxu2  ;;  %v7654_v56 = vpop.f32.mrf.mxu3 }
 0x9fb   : > { %8737 = vst [vmem:[#allocation10_spill] sm:$0xff] %v7648_v11 }
 0xa02   : > { %v7652_v35 = vpop.f32.mrf.mxu2  ;;  %v7660_v50 = vpop.f32.mrf.mxu3 }
 0xa03   : > { %8738 = vst [vmem:[#allocation9_spill] sm:$0xff] %v7652_v35 }
 0xa04   : > { %8739 = vst [vmem:[#allocation59_spill] sm:$0xff] %v7660_v50 }
 0xa0a   : > { %v7656_v8 = vpop.f32.mrf.mxu2  ;;  %v7664_v18 = vpop.f32.mrf.mxu3 }
 0xa0b   : > { %8740 = vst [vmem:[#allocation39_spill] sm:$0xff] %v7664_v18  ;;  %v3315_v18 = vmax.f32 %v3313_v58, %v7602_v49 }
 0xa0d   : > { %v3317_v31 = vmax.f32 %v3315_v18, %v7612_v51 }
 0xa0f   : > { %v3319_v14 = vmax.f32 %v3317_v31, %v7622_v33 }
 0xa11   : > { %v3321_v52 = vmax.f32 %v3319_v14, %v7630_v46 }
 0xa12   : > { %v7658_v0 = vpop.f32.mrf.mxu2  ;;  %v7672_v4 = vpop.f32.mrf.mxu3 }
 0xa13   : > { %8742 = vst [vmem:[#allocation42_spill] sm:$0xff] %v7672_v4  ;;  %v3316_v4 = vmax.f32 %v3314_v42, %v7608_v22  ;;  %v3323_v58 = vmax.f32 %v3321_v52, %v7638_v7 }
 0xa15   : > { %v3318_v28 = vmax.f32 %v3316_v4, %v7618_v39  ;;  %v3325_v18 = vmax.f32 %v3323_v58, %v7644_v61 }
 0xa17   : > { %v3320_v47 = vmax.f32 %v3318_v28, %v7626_v26  ;;  %v3327_v4 = vmax.f32 %v3325_v18, %v7652_v35 }
 0xa19   : > { %v3322_v6 = vmax.f32 %v3320_v47, %v7634_v48  ;;  %v3329_v28 = vmax.f32 %v3327_v4, %v7658_v0  ;;  %v3343_v4 = vmax.f32 %v7542_v17, %v7554_v25 }
 0xa1a   : > { %v7662_v45 = vpop.f32.mrf.mxu2  ;;  %v7686_v50 = vpop.f32.mrf.mxu3 }
 0xa1b   : > { %v3324_v42 = vmax.f32 %v3322_v6, %v7640_v55 }
 0xa1d   : > { %v3326_v22 = vmax.f32 %v3324_v42, %v7648_v11 }
 0xa1f   : > { %v3328_v31 = vmax.f32 %v3326_v22, %v7656_v8 }
 0xa21   : > { %v3330_v14 = vmax.f32 %v3328_v31, %v7662_v45 }
 0xa22   : > { %v7666_v21 = vpop.f32.mrf.mxu2  ;;  %v7702_v39 = vpop.f32.mrf.mxu3 }
 0xa23   : > { %8741 = vst [vmem:[#allocation40_spill] sm:$0xff] %v7666_v21  ;;  %v3331_v47 = vmax.f32 %v3329_v28, %v7666_v21  ;;  %v3344_v28 = vmax.f32 %v7546_v41, %v7558_v62 }
 0xa2a   : > { %v7676_v34 = vpop.f32.mrf.mxu2  ;;  %v7714_v35 = vpop.f32.mrf.mxu3 }
 0xa2b   : > { %8743 = vst [vmem:[#allocation41_spill] sm:$0xff] %v7676_v34  ;;  %v3332_v52 = vmax.f32 %v3330_v14, %v7676_v34  ;;  %v3345_v14 = vmax.f32 %v3343_v4, %v7566_v5 }
 0xa32   : > { %v7688_v1 = vpop.f32.mrf.mxu2 }
 0xa33   : > { %8744 = vst [vmem:[#allocation33_spill] sm:$0xff] %v7688_v1  ;;  %v3333_v6 = vmax.f32 %v3331_v47, %v7688_v1  ;;  %v3346_v1 = vmax.f32 %v3344_v28, %v7570_v23 }
 0xa3a   : > { %v7698_v51 = vpop.f32.mrf.mxu2 }
 0xa3b   : > { %8745 = vst [vmem:[#allocation8_spill] sm:$0xff] %v7698_v51  ;;  %v3334_v42 = vmax.f32 %v3332_v52, %v7698_v51  ;;  %v3347_v52 = vmax.f32 %v3345_v14, %v7578_v30 }
 0xa42   : > { %v7710_v58 = vpop.f32.mrf.mxu2 }
 0xa43   : > { %8746 = vst [vmem:[#allocation47_spill] sm:$0xff] %v7710_v58  ;;  %v3335_v18 = vmax.f32 %v3333_v6, %v7710_v58  ;;  %v3348_v6 = vmax.f32 %v3346_v1, %v7582_v60 }
 0xa45   : > { %v3336_v11 = vmax.f32 %v3334_v42, %v3335_v18  ;;  %v3349_v42 = vmax.f32 %v3347_v52, %v7590_v53  ;;  %v7725_v18 = vpop.f32.mrf.mxu3 }
 0xa47   : > { %v3337_v22 = vrot.slane %v3336_v11, 4 }
 0xa49   : > { %v3338_v31 = vmax.f32 %v3336_v11, %v3337_v22  ;;  %v3350_v11 = vmax.f32 %v3348_v6, %v7594_v38  ;;  %v3351_v22 = vmax.f32 %v3349_v42, %v7600_v59 }
 0xa4b   : > { %v3339_v47 = vrot.slane %v3338_v31, 2  ;;  %v3352_v34 = vmax.f32 %v3350_v11, %v7604_v12  ;;  %v3353_v4 = vmax.f32 %v3351_v22, %v7610_v20 }
 0xa4d   : > { %v3340_v51 = vmax.f32 %v3338_v31, %v3339_v47  ;;  %v3354_v28 = vmax.f32 %v3352_v34, %v7614_v13  ;;  %v3355_v31 = vmax.f32 %v3353_v4, %v7620_v40  ;;  %v7745_v34 = vpop.f32.mrf.mxu3 }
 0xa4f   : > { %v3341_v58 = vrot.slane %v3340_v51, 1  ;;  %v3356_v1 = vmax.f32 %v3354_v28, %v7624_v36  ;;  %v3357_v14 = vmax.f32 %v3355_v31, %v7628_v15 }
 0xa51   : > { %v7731_v21 = vmax.f32 %v3340_v51, %v3341_v58  ;;  %v3358_v6 = vmax.f32 %v3356_v1, %v7632_v44  ;;  %v3359_v58 = vmax.f32 %v3357_v14, %v7636_v37  ;;  %v8747_v1 = vld [vmem:[#allocation59_spill] sm:$0xff] }
 0xa53   : > { %v3380_v47 = vsub.f32 %v7540_v63, %v7731_v21  ;;  %v3382_v52 = vsub.f32 %v7544_v57, %v7731_v21  ;;  %v3384_v51 = vsub.f32 %v7552_v27, %v7731_v21  ;;  %v3360_v42 = vmax.f32 %v3358_v6, %v7642_v29  ;;  %v8748_v29 = vld [vmem:[#allocation39_spill] sm:$0xff] }
 0xa54   : > { %v3386_v11 = vsub.f32 %v7556_v16, %v7731_v21  ;;  %v3361_v22 = vmax.f32 %v3359_v58, %v7646_v10  ;;  %v3388_v28 = vsub.f32 %v7564_v32, %v7731_v21  ;;  %v3390_v6 = vsub.f32 %v7568_v24, %v7731_v21 }
 0xa55   : > { %v3444_v63 = vmul.f32 1.442695, %v3380_v47  ;;  %v3448_v4 = vmul.f32 1.442695, %v3382_v52  ;;  %v3362_v57 = vmax.f32 %v3360_v42, %v7650_v54  ;;  %v3452_v31 = vmul.f32 1.442695, %v3384_v51 }
 0xa56   : > { %v3363_v27 = vmax.f32 %v3361_v22, %v7654_v56  ;;  %v3456_v16 = vmul.f32 1.442695, %v3386_v11  ;;  %v8749_v47 = vld [vmem:[#allocation42_spill] sm:$0xff]  ;;  %v3392_v42 = vsub.f32 %v7576_v43, %v7731_v21  ;;  %v3460_v32 = vmul.f32 1.442695, %v3388_v28 }
 0xa57   : > { %4789 = vpow2.f32 %v3444_v63  ;;  %v3364_v14 = vmax.f32 %v3362_v57, %v8747_v1  ;;  %v3394_v63 = vsub.f32 %v7580_v3, %v7731_v21  ;;  %v3464_v24 = vmul.f32 1.442695, %v3390_v6  ;;  %v7769_v57 = vpop.f32.mrf.mxu3 }
 0xa58   : > { %4791 = vpow2.f32 %v3448_v4  ;;  %v3365_v58 = vmax.f32 %v3363_v27, %v8748_v29  ;;  %v3396_v28 = vsub.f32 %v7588_v2, %v7731_v21  ;;  %v3400_v2 = vsub.f32 %v7598_v19, %v7731_v21 }
 0xa59   : > { %v3366_v52 = vmax.f32 %v3364_v14, %v8749_v47  ;;  %4793 = vpow2.f32 %v3452_v31  ;;  %v3468_v31 = vmul.f32 1.442695, %v3392_v42 }
 0xa5a   : > { %v3367_v51 = vmax.f32 %v3365_v58, %v7686_v50  ;;  %4795 = vpow2.f32 %v3456_v16  ;;  %v3398_v16 = vsub.f32 %v7592_v9, %v7731_v21  ;;  %v3472_v58 = vmul.f32 1.442695, %v3394_v63 }
 0xa5b   : > { %v3368_v22 = vmax.f32 %v3366_v52, %v7702_v39  ;;  %4797 = vpow2.f32 %v3460_v32  ;;  %v3476_v42 = vmul.f32 1.442695, %v3396_v28  ;;  %v3402_v9 = vsub.f32 %v7602_v49, %v7731_v21 }
 0xa5c   : > { %v3369_v11 = vmax.f32 %v3367_v51, %v7714_v35  ;;  %4799 = vpow2.f32 %v3464_v24  ;;  %v3480_v63 = vmul.f32 1.442695, %v3398_v16  ;;  %v3484_v28 = vmul.f32 1.442695, %v3400_v2 }
 0xa5d   : > { %v7766_v4 = vpop.eup %4789  ;;  %v3370_v43 = vmax.f32 %v3368_v22, %v7725_v18  ;;  %4801 = vpow2.f32 %v3468_v31  ;;  %v3488_v16 = vmul.f32 1.442695, %v3402_v9 }
 0xa5e   : > { %8750 = vst [vmem:[#allocation34_spill] sm:$0xff] %v7766_v4  ;;  %v7771_v27 = vpop.eup %4791  ;;  %v3371_v14 = vmax.f32 %v3369_v11, %v7745_v34  ;;  %4803 = vpow2.f32 %v3472_v58 }
 0xa5f   : > { %8751 = vst [vmem:[#allocation43_spill] sm:$0xff] %v7771_v27  ;;  %v3572_v3 = vadd.f32 %v7771_v27, %v7766_v4  ;;  %v7779_v6 = vpop.eup %4793  ;;  %v3372_v52 = vmax.f32 %v3370_v43, %v7769_v57  ;;  %v8754_v4 = vld [vmem:[#allocation36_spill] sm:$0xff]  ;;  %4805 = vpow2.f32 %v3476_v42 }
 0xa60   : > { %8752 = vst [vmem:[#allocation44_spill] sm:$0xff] %v7779_v6  ;;  %v7785_v22 = vpop.eup %4795  ;;  %v3404_v19 = vsub.f32 %v8754_v4, %v7731_v21  ;;  %4807 = vpow2.f32 %v3480_v63 }
 0xa61   : > { %v3573_v51 = vadd.f32 %v7779_v6, %v3572_v3  ;;  %8753 = vst [vmem:[#allocation46_spill] sm:$0xff] %v7785_v22  ;;  %v3373_v32 = vmax.f32 %v3371_v14, %v3372_v52  ;;  %v7790_v27 = vpop.eup %4797  ;;  %v8756_v6 = vld [vmem:[#allocation62_spill] sm:$0xff]  ;;  %4809 = vpow2.f32 %v3484_v28 }
 0xa62   : > { %v7795_v3 = vpop.eup %4799  ;;  %v3408_v4 = vsub.f32 %v8756_v6, %v7731_v21  ;;  %v3492_v2 = vmul.f32 1.442695, %v3404_v19  ;;  %4811 = vpow2.f32 %v3488_v16 }
 0xa63   : > { %v3574_v11 = vadd.f32 %v7785_v22, %v3573_v51  ;;  %v3374_v24 = vrot.slane %v3373_v32, 4  ;;  %v7800_v52 = vpop.eup %4801  ;;  %v8755_v51 = vld [vmem:[#allocation67_spill] sm:$0xff] }
 0xa64   : > { %v3406_v49 = vsub.f32 %v8755_v51, %v7731_v21  ;;  %v7805_v22 = vpop.eup %4803  ;;  %v3412_v51 = vsub.f32 %v7626_v26, %v7731_v21  ;;  %4813 = vpow2.f32 %v3492_v2  ;;  %v3500_v6 = vmul.f32 1.442695, %v3408_v4 }
 0xa65   : > { %v3575_v43 = vadd.f32 %v7790_v27, %v3574_v11  ;;  %v3375_v31 = vmax.f32 %v3373_v32, %v3374_v24  ;;  %v7810_v24 = vpop.eup %4805  ;;  %v3418_v4 = vsub.f32 %v7638_v7, %v7731_v21 }
 0xa66   : > { %v3496_v9 = vmul.f32 1.442695, %v3406_v49  ;;  %v3508_v26 = vmul.f32 1.442695, %v3412_v51 }
 0xa67   : > { %v3576_v14 = vadd.f32 %v7795_v3, %v3575_v43  ;;  %v3376_v58 = vrot.slane %v3375_v31, 2  ;;  %v3410_v43 = vsub.f32 %v7622_v33, %v7731_v21  ;;  %v3520_v51 = vmul.f32 1.442695, %v3418_v4  ;;  %v8758_v4 = vld [vmem:[#allocation9_spill] sm:$0xff] }
 0xa68   : > { %4815 = vpow2.f32 %v3496_v9 }
 0xa69   : > { %v3577_v11 = vadd.f32 %v7800_v52, %v3576_v14  ;;  %v3377_v32 = vmax.f32 %v3375_v31, %v3376_v58  ;;  %v7815_v14 = vpop.eup %4807  ;;  %v3414_v58 = vsub.f32 %v7630_v46, %v7731_v21  ;;  %v3504_v33 = vmul.f32 1.442695, %v3410_v43 }
 0xa6a   : > { %v7820_v31 = vpop.eup %4809  ;;  %4817 = vpow2.f32 %v3500_v6  ;;  %v3420_v46 = vsub.f32 %v7640_v55, %v7731_v21  ;;  %v3422_v55 = vsub.f32 %v7644_v61, %v7731_v21 }
 0xa6b   : > { %v3578_v42 = vadd.f32 %v7805_v22, %v3577_v11  ;;  %v3378_v28 = vrot.slane %v3377_v32, 1  ;;  %v7825_v16 = vpop.eup %4811  ;;  %v3416_v11 = vsub.f32 %v7634_v48, %v7731_v21  ;;  %4819 = vpow2.f32 %v3504_v33  ;;  %v8757_v33 = vld [vmem:[#allocation10_spill] sm:$0xff] }
 0xa6c   : > { %v3512_v43 = vmul.f32 1.442695, %v3414_v58  ;;  %4821 = vpow2.f32 %v3508_v26  ;;  %v3524_v58 = vmul.f32 1.442695, %v3420_v46 }
 0xa6d   : > { %v3579_v63 = vadd.f32 %v7810_v24, %v3578_v42  ;;  %v7832_v42 = vmax.f32 %v3377_v32, %v3378_v28  ;;  %v3516_v48 = vmul.f32 1.442695, %v3416_v11 }
 0xa6e   : > { %4823 = vpow2.f32 %v3512_v43 }
 0xa6f   : > { %v3580_v19 = vadd.f32 %v7815_v14, %v3579_v63  ;;  %v7834_v63 = vpop.eup %4813  ;;  %v3381_v32 = vsub.f32 %v7542_v17, %v7832_v42  ;;  %v3383_v6 = vsub.f32 %v7546_v41, %v7832_v42  ;;  %v3426_v17 = vsub.f32 %v8758_v4, %v7731_v21 }
 0xa70   : > { %4825 = vpow2.f32 %v3516_v48  ;;  %v3385_v41 = vsub.f32 %v7554_v25, %v7832_v42 }
 0xa71   : > { %v3581_v49 = vadd.f32 %v7820_v31, %v3580_v19  ;;  %v7839_v19 = vpop.eup %4815  ;;  %4827 = vpow2.f32 %v3520_v51  ;;  %v3446_v61 = vmul.f32 1.442695, %v3381_v32  ;;  %v3450_v43 = vmul.f32 1.442695, %v3383_v6 }
 0xa72   : > { %v7846_v28 = vpop.eup %4817  ;;  %4829 = vpow2.f32 %v3524_v58  ;;  %v3389_v51 = vsub.f32 %v7566_v5, %v7832_v42  ;;  %v3454_v32 = vmul.f32 1.442695, %v3385_v41  ;;  %v3430_v6 = vsub.f32 %v7658_v0, %v7731_v21 }
 0xa73   : > { %v3582_v2 = vadd.f32 %v7825_v16, %v3581_v49  ;;  %v3424_v49 = vsub.f32 %v8757_v33, %v7731_v21  ;;  %v7853_v26 = vpop.eup %4819  ;;  %v3428_v33 = vsub.f32 %v7656_v8, %v7731_v21  ;;  %4831 = vpow2.f32 %v3446_v61 }
 0xa74   : > { %v7860_v46 = vpop.eup %4821  ;;  %4833 = vpow2.f32 %v3450_v43  ;;  %v3391_v8 = vsub.f32 %v7570_v23, %v7832_v42  ;;  %v3432_v5 = vsub.f32 %v7662_v45, %v7731_v21  ;;  %v3462_v61 = vmul.f32 1.442695, %v3389_v51  ;;  %v8761_v23 = vld [vmem:[#allocation40_spill] sm:$0xff] }
 0xa75   : > { %v3583_v9 = vadd.f32 %v7834_v63, %v3582_v2  ;;  %v3532_v4 = vmul.f32 1.442695, %v3424_v49  ;;  %v7867_v25 = vpop.eup %4823  ;;  %v3540_v41 = vmul.f32 1.442695, %v3428_v33  ;;  %v3395_v33 = vsub.f32 %v7582_v60, %v7832_v42 }
 0xa76   : > { %8759 = vst [vmem:[#allocation48_spill] sm:$0xff] %v7867_v25  ;;  %v7874_v58 = vpop.eup %4825  ;;  %v3548_v51 = vmul.f32 1.442695, %v3432_v5 }
 0xa77   : > { %v3584_v7 = vadd.f32 %v7839_v19, %v3583_v9  ;;  %v3528_v9 = vmul.f32 1.442695, %v3422_v55  ;;  %v3536_v55 = vmul.f32 1.442695, %v3426_v17  ;;  %v3393_v17 = vsub.f32 %v7578_v30, %v7832_v42  ;;  %v8763_v30 = vld [vmem:[#allocation41_spill] sm:$0xff] }
 0xa79   : > { %v3585_v11 = vadd.f32 %v7846_v28, %v3584_v7  ;;  %v3387_v7 = vsub.f32 %v7558_v62, %v7832_v42  ;;  %4835 = vpow2.f32 %v3528_v9  ;;  %v3434_v9 = vsub.f32 %v8761_v23, %v7731_v21 }
 0xa7a   : > { %4837 = vpow2.f32 %v3532_v4  ;;  %v3470_v23 = vmul.f32 1.442695, %v3393_v17 }
 0xa7b   : > { %v3586_v2 = vadd.f32 %v7853_v26, %v3585_v11  ;;  %v3458_v49 = vmul.f32 1.442695, %v3387_v7  ;;  %v7878_v11 = vpop.eup %4827  ;;  %4839 = vpow2.f32 %v3454_v32  ;;  %v3544_v7 = vmul.f32 1.442695, %v3430_v6  ;;  %v8764_v6 = vld [vmem:[#allocation33_spill] sm:$0xff] }
 0xa7c   : > { %v7883_v0 = vpop.eup %4829  ;;  %4841 = vpow2.f32 %v3536_v55  ;;  %v3436_v32 = vsub.f32 %v8763_v30, %v7731_v21  ;;  %v3438_v55 = vsub.f32 %v8764_v6, %v7731_v21  ;;  %v3399_v6 = vsub.f32 %v7594_v38, %v7832_v42 }
 0xa7d   : > { %v3587_v48 = vadd.f32 %v7860_v46, %v3586_v2  ;;  %v7887_v43 = vpop.eup %4831  ;;  %4843 = vpow2.f32 %v3458_v49 }
 0xa7e   : > { %8760 = vst [vmem:[#allocation50_spill] sm:$0xff] %v7887_v43  ;;  %v7892_v4 = vpop.eup %4833  ;;  %4845 = vpow2.f32 %v3540_v41 }
 0xa7f   : > { %v3588_v62 = vadd.f32 %v7867_v25, %v3587_v48  ;;  %8762 = vst [vmem:[#allocation52_spill] sm:$0xff] %v7892_v4  ;;  %v3466_v48 = vmul.f32 1.442695, %v3391_v8  ;;  %v7899_v25 = vpop.eup %4835  ;;  %4847 = vpow2.f32 %v3462_v61  ;;  %v3552_v8 = vmul.f32 1.442695, %v3434_v9 }
 0xa80   : > { %v7905_v60 = vpop.eup %4837  ;;  %4849 = vpow2.f32 %v3544_v7  ;;  %v3609_v5 = vadd.f32 %v7892_v4, %v7887_v43  ;;  %v3556_v61 = vmul.f32 1.442695, %v3436_v32  ;;  %v8768_v4 = vld [vmem:[#allocation47_spill] sm:$0xff] }
 0xa81   : > { %v3589_v2 = vadd.f32 %v7874_v58, %v3588_v62  ;;  %v7910_v41 = vpop.eup %4839  ;;  %4851 = vpow2.f32 %v3466_v48  ;;  %v3442_v43 = vsub.f32 %v8768_v4, %v7731_v21 }
 0xa82   : > { %8765 = vst [vmem:[#allocation51_spill] sm:$0xff] %v7910_v41  ;;  %v7916_v17 = vpop.eup %4841  ;;  %4853 = vpow2.f32 %v3548_v51  ;;  %v3610_v7 = vadd.f32 %v7910_v41, %v3609_v5  ;;  %v3403_v5 = vsub.f32 %v7604_v12, %v7832_v42 }
 0xa83   : > { %v3590_v45 = vadd.f32 %v7878_v11, %v3589_v2  ;;  %v3397_v2 = vsub.f32 %v7590_v53, %v7832_v42  ;;  %v3474_v53 = vmul.f32 1.442695, %v3395_v33  ;;  %4855 = vpow2.f32 %v3470_v23 }
 0xa84   : > { %4857 = vpow2.f32 %v3552_v8  ;;  %v3560_v33 = vmul.f32 1.442695, %v3438_v55  ;;  %v3405_v8 = vsub.f32 %v7610_v20, %v7832_v42  ;;  %v3568_v12 = vmul.f32 1.442695, %v3442_v43 }
 0xa85   : > { %v3591_v62 = vadd.f32 %v7883_v0, %v3590_v45  ;;  %v8766_v45 = vld [vmem:[#allocation8_spill] sm:$0xff]  ;;  %v3478_v38 = vmul.f32 1.442695, %v3397_v2  ;;  %4859 = vpow2.f32 %v3474_v53  ;;  %v3409_v43 = vsub.f32 %v7620_v40, %v7832_v42 }
 0xa86   : > { %v3440_v30 = vsub.f32 %v8766_v45, %v7731_v21  ;;  %v3401_v45 = vsub.f32 %v7600_v59, %v7832_v42  ;;  %v3482_v21 = vmul.f32 1.442695, %v3399_v6  ;;  %4861 = vpow2.f32 %v3556_v61 }
 0xa87   : > { %v3592_v49 = vadd.f32 %v7899_v25, %v3591_v62  ;;  %v7920_v62 = vpop.eup %4843  ;;  %4863 = vpow2.f32 %v3478_v38  ;;  %v3407_v61 = vsub.f32 %v7614_v13, %v7832_v42 }
 0xa88   : > { %8767 = vst [vmem:[#allocation53_spill] sm:$0xff] %v7920_v62  ;;  %v7926_v48 = vpop.eup %4845  ;;  %v3611_v51 = vadd.f32 %v7920_v62, %v3610_v7  ;;  %v3564_v59 = vmul.f32 1.442695, %v3440_v30  ;;  %4865 = vpow2.f32 %v3560_v33  ;;  %v3494_v33 = vmul.f32 1.442695, %v3405_v8 }
 0xa89   : > { %v3593_v9 = vadd.f32 %v7905_v60, %v3592_v49  ;;  %v7930_v49 = vpop.eup %4847  ;;  %4867 = vpow2.f32 %v3482_v21 }
 0xa8a   : > { %8769 = vst [vmem:[#allocation54_spill] sm:$0xff] %v7930_v49  ;;  %v7934_v4 = vpop.eup %4849  ;;  %v3612_v23 = vadd.f32 %v7930_v49, %v3611_v51  ;;  %4869 = vpow2.f32 %v3564_v59  ;;  %v3411_v59 = vsub.f32 %v7624_v36, %v7832_v42 }
 0xa8b   : > { %v3594_v32 = vadd.f32 %v7916_v17, %v3593_v9  ;;  %v7938_v55 = vpop.eup %4851  ;;  %v3486_v9 = vmul.f32 1.442695, %v3401_v45 }
 0xa8c   : > { %8770 = vst [vmem:[#allocation57_spill] sm:$0xff] %v7938_v55  ;;  %v7942_v7 = vpop.eup %4853  ;;  %v3613_v53 = vadd.f32 %v7938_v55, %v3612_v23  ;;  %v3498_v23 = vmul.f32 1.442695, %v3407_v61 }
 0xa8d   : > { %v3595_v2 = vadd.f32 %v7926_v48, %v3594_v32  ;;  %v7946_v30 = vpop.eup %4855  ;;  %v3490_v32 = vmul.f32 1.442695, %v3403_v5  ;;  %4871 = vpow2.f32 %v3486_v9 }
 0xa8e   : > { %v7950_v51 = vpop.eup %4857  ;;  %v3614_v45 = vadd.f32 %v7946_v30, %v3613_v53  ;;  %4873 = vpow2.f32 %v3568_v12  ;;  %v3413_v12 = vsub.f32 %v7628_v15, %v7832_v42  ;;  %v3502_v53 = vmul.f32 1.442695, %v3409_v43 }
 0xa8f   : > { %v3596_v6 = vadd.f32 %v7934_v4, %v3595_v2  ;;  %v7954_v38 = vpop.eup %4859  ;;  %4875 = vpow2.f32 %v3490_v32  ;;  %v3415_v32 = vsub.f32 %v7632_v44, %v7832_v42 }
 0xa90   : > { %8771 = vst [vmem:[#allocation19_spill] sm:$0xff] %v7954_v38  ;;  %v7958_v2 = vpop.eup %4861  ;;  %v3615_v5 = vadd.f32 %v7954_v38, %v3614_v45  ;;  %4877 = vpow2.f32 %v3494_v33  ;;  %v3417_v33 = vsub.f32 %v7636_v37, %v7832_v42  ;;  %v3421_v37 = vsub.f32 %v7646_v10, %v7832_v42 }
 0xa91   : > { %v3597_v20 = vadd.f32 %v7942_v7, %v3596_v6  ;;  %v7962_v21 = vpop.eup %4863  ;;  %4879 = vpow2.f32 %v3498_v23  ;;  %v3425_v10 = vsub.f32 %v7654_v56, %v7832_v42  ;;  %v3429_v56 = vsub.f32 %v8748_v29, %v7832_v42 }
 0xa92   : > { %v7966_v6 = vpop.eup %4865  ;;  %v3616_v8 = vadd.f32 %v7962_v21, %v3615_v5  ;;  %4881 = vpow2.f32 %v3502_v53  ;;  %v3433_v29 = vsub.f32 %v7686_v50, %v7832_v42 }
 0xa93   : > { %v3598_v13 = vadd.f32 %v7950_v51, %v3597_v20  ;;  %v7970_v9 = vpop.eup %4867 }
 0xa94   : > { %v7974_v20 = vpop.eup %4869  ;;  %v3617_v36 = vadd.f32 %v7970_v9, %v3616_v8  ;;  %v3550_v50 = vmul.f32 1.442695, %v3433_v29 }
 0xa95   : > { %v3599_v40 = vadd.f32 %v7958_v2, %v3598_v13  ;;  %v7978_v61 = vpop.eup %4871  ;;  %v3506_v13 = vmul.f32 1.442695, %v3411_v59  ;;  %v8772_v59 = vld [vmem:[#allocation73_spill] sm:$0xff] }
 0xa96   : > { %v7982_v5 = vpop.eup %4873  ;;  %v3618_v15 = vadd.f32 %v7978_v61, %v3617_v36  ;;  %v3419_v23 = vsub.f32 %v8772_v59, %v7832_v42  ;;  %v3423_v59 = vsub.f32 %v7650_v54, %v7832_v42  ;;  %v3427_v54 = vsub.f32 %v8747_v1, %v7832_v42 }
 0xa97   : > { %v3600_v45 = vadd.f32 %v7966_v6, %v3599_v40  ;;  %v7986_v43 = vpop.eup %4875  ;;  %v3510_v40 = vmul.f32 1.442695, %v3413_v12  ;;  %4883 = vpow2.f32 %v3506_v13  ;;  %v3518_v12 = vmul.f32 1.442695, %v3417_v33 }
 0xa98   : > { %v3619_v41 = vadd.f32 %v7986_v43, %v3618_v15  ;;  %v7992_v44 = vpop.eup %4877  ;;  %v3526_v33 = vmul.f32 1.442695, %v3421_v37  ;;  %v3534_v37 = vmul.f32 1.442695, %v3425_v10  ;;  %v3431_v1 = vsub.f32 %v8749_v47, %v7832_v42 }
 0xa99   : > { %v3601_v62 = vadd.f32 %v7974_v20, %v3600_v45  ;;  %v3514_v45 = vmul.f32 1.442695, %v3415_v32  ;;  %v7997_v49 = vpop.eup %4879  ;;  %4885 = vpow2.f32 %v3510_v40  ;;  %v3522_v32 = vmul.f32 1.442695, %v3419_v23 }
 0xa9a   : > { %v3620_v36 = vadd.f32 %v7992_v44, %v3619_v41  ;;  %v8002_v15 = vpop.eup %4881  ;;  %v3530_v23 = vmul.f32 1.442695, %v3423_v59  ;;  %v3538_v59 = vmul.f32 1.442695, %v3427_v54  ;;  %v3542_v10 = vmul.f32 1.442695, %v3429_v56 }
 0xa9b   : > { %v3602_v8 = vadd.f32 %v7982_v5, %v3601_v62  ;;  %4887 = vpow2.f32 %v3514_v45  ;;  %v3546_v47 = vmul.f32 1.442695, %v3431_v1  ;;  %v3439_v56 = vsub.f32 %v7725_v18, %v7832_v42 }
 0xa9c   : > { %v3621_v53 = vadd.f32 %v7997_v49, %v3620_v36  ;;  %4889 = vpow2.f32 %v3518_v12  ;;  %v3443_v18 = vsub.f32 %v7769_v57, %v7832_v42 }
 0xa9d   : > { %v3603_v55 = vrot.slane %v3602_v8, 4  ;;  %v8007_v38 = vpop.eup %4883  ;;  %4891 = vpow2.f32 %v3522_v32  ;;  %v3562_v29 = vmul.f32 1.442695, %v3439_v56 }
 0xa9e   : > { %v3622_v41 = vadd.f32 %v8002_v15, %v3621_v53  ;;  %4893 = vpow2.f32 %v3526_v33 }
 0xa9f   : > { %v3604_v62 = vadd.f32 %v3603_v55, %v3602_v8  ;;  %v8012_v8 = vpop.eup %4885  ;;  %4895 = vpow2.f32 %v3530_v23 }
 0xaa0   : > { %v3623_v40 = vadd.f32 %v8007_v38, %v3622_v41 }
 0xaa1   : > { %v3605_v13 = vrot.slane %v3604_v62, 2  ;;  %v8017_v53 = vpop.eup %4887 }
 0xaa2   : > { %v3624_v36 = vadd.f32 %v8012_v8, %v3623_v40  ;;  %v3435_v40 = vsub.f32 %v7702_v39, %v7832_v42 }
 0xaa3   : > { %v3606_v55 = vadd.f32 %v3605_v13, %v3604_v62  ;;  %v8022_v13 = vpop.eup %4889 }
 0xaa4   : > { %v3625_v62 = vadd.f32 %v8017_v53, %v3624_v36  ;;  %v8027_v41 = vpop.eup %4891 }
 0xaa5   : > { %v3607_v45 = vrot.slane %v3606_v55, 1 }
 0xaa6   : > { %v3626_v32 = vadd.f32 %v8022_v13, %v3625_v62  ;;  %v3554_v62 = vmul.f32 1.442695, %v3435_v40 }
 0xaa7   : > { %v3608_v12 = vadd.f32 %v3607_v45, %v3606_v55  ;;  %v8032_v55 = vpop.eup %4893  ;;  %v3437_v45 = vsub.f32 %v7714_v35, %v7832_v42  ;;  %v3441_v35 = vsub.f32 %v7745_v34, %v7832_v42 }
 0xaa8   : > { %v3627_v33 = vadd.f32 %v8027_v41, %v3626_v32  ;;  %v8037_v23 = vpop.eup %4895 }
 0xaa9   : > { %4897 = vrcp.f32 %v3608_v12  ;;  %v3558_v32 = vmul.f32 1.442695, %v3437_v45 }
 0xaaa   : > { %4899 = vpow2.f32 %v3534_v37  ;;  %v3628_v54 = vadd.f32 %v8032_v55, %v3627_v33 }
 0xaab   : > { %4901 = vpow2.f32 %v3538_v59 }
 0xaac   : > { %4903 = vpow2.f32 %v3542_v10  ;;  %v3629_v37 = vadd.f32 %v8037_v23, %v3628_v54  ;;  %v3570_v54 = vmul.f32 1.442695, %v3443_v18 }
 0xaad   : > { %4905 = vpow2.f32 %v3546_v47  ;;  %v3566_v47 = vmul.f32 1.442695, %v3441_v35 }
 0xaae   : > { %4907 = vpow2.f32 %v3550_v50 }
 0xaaf   : > { %v8041_v36 = vpop.eup %4897  ;;  %4909 = vpow2.f32 %v3554_v62 }
 0xab0   : > { %v8046_v12 = vpop.eup %4899  ;;  %v3710_v39 = vmul.f32 %v8041_v36, %v7982_v5  ;;  %4911 = vpow2.f32 %v3558_v32  ;;  %v3676_v57 = vmul.f32 %v8041_v36, %v7846_v28  ;;  %v3678_v42 = vmul.f32 %v8041_v36, %v7853_v26 }
 0xab1   : > { %v3630_v1 = vadd.f32 %v8046_v12, %v3629_v37  ;;  %v8051_v59 = vpop.eup %4901  ;;  %4913 = vpow2.f32 %v3562_v29  ;;  %v3708_v50 = vmul.f32 %v8041_v36, %v7974_v20  ;;  %v3672_v56 = vmul.f32 %v8041_v36, %v7834_v63 }
 0xab2   : > { %v8058_v33 = vpop.eup %4903  ;;  %v3674_v62 = vmul.f32 %v8041_v36, %v7839_v19  ;;  %v3706_v28 = vmul.f32 %v8041_v36, %v7966_v6  ;;  %4915 = vpow2.f32 %v3566_v47  ;;  %v3730_v26 = vpack.c.bf16 %v3678_v42, %v3676_v57 }
 0xab3   : > { %v3631_v10 = vadd.f32 %v8051_v59, %v3630_v1  ;;  %v8061_v40 = vpop.eup %4905  ;;  %v3704_v1 = vmul.f32 %v8041_v36, %v7958_v2  ;;  %v3746_v32 = vpack.c.bf16 %v3710_v39, %v3708_v50  ;;  %v3700_v29 = vmul.f32 %v8041_v36, %v7942_v7 }
 0xab4   : > { %v8064_v45 = vpop.eup %4907  ;;  %v3728_v18 = vpack.c.bf16 %v3674_v62, %v3672_v56  ;;  %4917 = vpow2.f32 %v3570_v54  ;;  %3748 = vmatpush.bf16.msrb.mxu0 %v3730_v26  ;;  %v3668_v19 = vmul.f32 %v8041_v36, %v7820_v31  ;;  %v3670_v2 = vmul.f32 %v8041_v36, %v7825_v16 }
 0xab5   : > { %v3632_v5 = vadd.f32 %v8058_v33, %v3631_v10  ;;  %v8081_v35 = vpop.eup %4909  ;;  %v3744_v63 = vpack.c.bf16 %v3706_v28, %v3704_v1  ;;  %3767 = vmatpush.bf16.msrb.mxu1 %v3746_v32  ;;  %v3702_v6 = vmul.f32 %v8041_v36, %v7950_v51  ;;  %v3664_v31 = vmul.f32 %v8041_v36, %v7810_v24 }
 0xab6   : > { %v8086_v10 = vpop.eup %4911  ;;  %v3726_v54 = vpack.c.bf16 %v3670_v2, %v3668_v19  ;;  %v3688_v16 = vmul.f32 %v8041_v36, %v7883_v0  ;;  %v3690_v51 = vmul.f32 %v8041_v36, %v7899_v25  ;;  %v3666_v50 = vmul.f32 %v8041_v36, %v7815_v14  ;;  %v8773_v2 = vld [vmem:[#allocation44_spill] sm:$0xff] }
 0xab7   : > { %v3633_v34 = vadd.f32 %v8061_v40, %v3632_v5  ;;  %v8094_v39 = vpop.eup %4913  ;;  %v3742_v47 = vpack.c.bf16 %v3702_v6, %v3700_v29  ;;  %v3696_v56 = vmul.f32 %v8041_v36, %v7926_v48  ;;  %v3684_v62 = vmul.f32 %v8041_v36, %v7874_v58  ;;  %v8774_v6 = vld [vmem:[#allocation46_spill] sm:$0xff] }
 0xab8   : > { %3749 = vmatpush.bf16.msrb.mxu0 %v3728_v18  ;;  %v3736_v1 = vpack.c.bf16 %v3690_v51, %v3688_v16  ;;  %v3686_v0 = vmul.f32 %v8041_v36, %v7878_v11  ;;  %v3660_v14 = vmul.f32 %v8041_v36, %v7800_v52  ;;  %v3662_v48 = vmul.f32 %v8041_v36, %v7805_v22  ;;  %v8777_v16 = vld [vmem:[#allocation48_spill] sm:$0xff] }
 0xab9   : > { %v3634_v37 = vadd.f32 %v8064_v45, %v3633_v34  ;;  %v4916_v34 = vpop.eup %4915  ;;  %3768 = vmatpush.bf16.msrb.mxu1 %v3744_v63  ;;  %v3724_v26 = vpack.c.bf16 %v3666_v50, %v3664_v31  ;;  %v3692_v58 = vmul.f32 %v8041_v36, %v7905_v60  ;;  %v3694_v32 = vmul.f32 %v8041_v36, %v7916_v17 }
 0xaba   : > { %v4918_v42 = vpop.eup %4917  ;;  %v3734_v28 = vpack.c.bf16 %v3686_v0, %v3684_v62  ;;  %v3722_v18 = vpack.c.bf16 %v3662_v48, %v3660_v14  ;;  %v3656_v52 = vmul.f32 %v8041_v36, %v7790_v27  ;;  %v3658_v22 = vmul.f32 %v8041_v36, %v7795_v3  ;;  %v8776_v3 = vld [vmem:[#allocation43_spill] sm:$0xff] }
 0xabb   : > { %v3635_v20 = vadd.f32 %v8081_v35, %v3634_v37  ;;  %v3698_v37 = vmul.f32 %v8041_v36, %v7934_v4  ;;  %v3738_v63 = vpack.c.bf16 %v3694_v32, %v3692_v58  ;;  %v3652_v17 = vmul.f32 %v8041_v36, %v8773_v2  ;;  %v8778_v62 = vld [vmem:[#allocation55_spill] sm:$0xff]  ;;  %v8784_v2 = vld [vmem:[#allocation64_spill] sm:$0xff] }
 0xabc   : > { %3750 = vmatpush.bf16.msrb.mxu0 %v3726_v54  ;;  %v3720_v60 = vpack.c.bf16 %v3658_v22, %v3656_v52  ;;  %v3680_v31 = vmul.f32 %v8041_v36, %v7860_v46  ;;  %v3682_v51 = vmul.f32 %v8041_v36, %v8777_v16  ;;  %v8781_v14 = vld [vmem:[#allocation63_spill] sm:$0xff]  ;;  %v8790_v16 = vld [vmem:[#allocation53_spill] sm:$0xff] }
 0xabd   : > { %v3636_v5 = vadd.f32 %v8086_v10, %v3635_v20  ;;  %3769 = vmatpush.bf16.msrb.mxu1 %v3742_v47  ;;  %v3740_v4 = vpack.c.bf16 %v3698_v37, %v3696_v56 }
 0xabe   : > { %v3732_v56 = vpack.c.bf16 %v3682_v51, %v3680_v31 }
 0xabf   : > { %v3637_v7 = vadd.f32 %v8094_v39, %v3636_v5  ;;  %v3654_v5 = vmul.f32 %v8041_v36, %v8774_v6  ;;  %v8785_v6 = vld [vmem:[#allocation66_spill] sm:$0xff] }
 0xac0   : > { %3751 = vmatpush.bf16.msrb.mxu0 %v3724_v26 }
 0xac1   : > { %v3638_v57 = vadd.f32 %v4916_v34, %v3637_v7  ;;  %3770 = vmatpush.bf16.msrb.mxu1 %v3740_v4  ;;  %v8775_v7 = vld [vmem:[#allocation34_spill] sm:$0xff]  ;;  %v3718_v54 = vpack.c.bf16 %v3654_v5, %v3652_v17  ;;  %v8786_v5 = vld [vmem:[#allocation68_spill] sm:$0xff] }
 0xac2   : > { %v3648_v27 = vmul.f32 %v8041_v36, %v8775_v7 }
 0xac3   : > { %v3639_v24 = vadd.f32 %v4918_v42, %v3638_v57  ;;  %v3650_v57 = vmul.f32 %v8041_v36, %v8776_v3 }
 0xac4   : > { %3752 = vmatpush.bf16.msrb.mxu0 %v3722_v18 }
 0xac5   : > { %v3640_v25 = vrot.slane %v3639_v24, 4  ;;  %3771 = vmatpush.bf16.msrb.mxu1 %v3738_v63  ;;  %v3716_v50 = vpack.c.bf16 %v3650_v57, %v3648_v27 }
 0xac7   : > { %v3641_v20 = vadd.f32 %v3640_v25, %v3639_v24  ;;  %v8779_v24 = vld [vmem:[#allocation58_spill] sm:$0xff]  ;;  %v8780_v25 = vld [vmem:[#allocation60_spill] sm:$0xff] }
 0xac8   : > { %3753 = vmatpush.bf16.msrb.mxu0 %v3720_v60  ;;  %v8151_v48 = vpack.c.bf16 %v8781_v14, %v8780_v25 }
 0xac9   : > { %v3642_v11 = vrot.slane %v3641_v20, 2  ;;  %3772 = vmatpush.bf16.msrb.mxu1 %v3736_v1  ;;  %v8142_v1 = vpack.c.bf16 %v8779_v24, %v8778_v62  ;;  %v8792_v24 = vld [vmem:[#allocation52_spill] sm:$0xff] }
 0xacb   : > { %v3643_v29 = vadd.f32 %v3642_v11, %v3641_v20 }
 0xacc   : > { %3754 = vmatpush.bf16.msrb.mxu0 %v3718_v54  ;;  %v8788_v54 = vld [vmem:[#allocation57_spill] sm:$0xff] }
 0xacd   : > { %v3644_v19 = vrot.slane %v3643_v29, 1  ;;  %3773 = vmatpush.bf16.msrb.mxu1 %v3734_v28 }
 0xacf   : > { %v3645_v47 = vadd.f32 %v3644_v19, %v3643_v29  ;;  %v8782_v19 = vld [vmem:[#allocation19_spill] sm:$0xff] }
 0xad0   : > { %3755 = vmatpush.bf16.msrb.mxu0 %v3716_v50 }
 0xad1   : > { %4919 = vrcp.f32 %v3645_v47  ;;  %3774 = vmatpush.bf16.msrb.mxu1 %v3732_v56  ;;  %v3715_v47 = vpack.c.bf16 %v8786_v5, %v8785_v6  ;;  %v8791_v56 = vld [vmem:[#allocation50_spill] sm:$0xff] }
 0xad3   : > { %3756 = vmatmul.bf16.vlgmr.msrb.gmra.mxu0 %v8142_v1 }
 0xad4   : > { %3775 = vmatmul.bf16.vlgmr.msrb.gmra.mxu1 %v8151_v48 }
 0xad7   : > { %v8138_v37 = vpop.eup %4919 }
 0xad8   : > { %v3711_v0 = vmul.f32 %v8138_v37, %v4918_v42  ;;  %v3677_v46 = vmul.f32 %v8138_v37, %v8002_v15  ;;  %v3679_v36 = vmul.f32 %v8138_v37, %v8007_v38  ;;  %v3709_v28 = vmul.f32 %v8138_v37, %v4916_v34 }
 0xad9   : > { %v3673_v26 = vmul.f32 %v8138_v37, %v7992_v44  ;;  %v3675_v42 = vmul.f32 %v8138_v37, %v7997_v49  ;;  %v3705_v58 = vmul.f32 %v8138_v37, %v8086_v10  ;;  %v3669_v15 = vmul.f32 %v8138_v37, %v7978_v61 }
 0xada   : > { %v3731_v4 = vpack.c.bf16 %v3679_v36, %v3677_v46  ;;  %v3671_v38 = vmul.f32 %v8138_v37, %v7986_v43  ;;  %v3747_v32 = vpack.c.bf16 %v3711_v0, %v3709_v28  ;;  %v3707_v44 = vmul.f32 %v8138_v37, %v8094_v39 }
 0xadb   : > { %v3729_v34 = vpack.c.bf16 %v3675_v42, %v3673_v26  ;;  %v3701_v10 = vmul.f32 %v8138_v37, %v8064_v45  ;;  %v3703_v61 = vmul.f32 %v8138_v37, %v8081_v35  ;;  %v3689_v43 = vmul.f32 %v8138_v37, %v8032_v55 }
 0xadc   : > { %3786 = vmatpush.bf16.msra.mxu0 %v3731_v4  ;;  %v3727_v49 = vpack.c.bf16 %v3671_v38, %v3669_v15  ;;  %3805 = vmatpush.bf16.msra.mxu1 %v3747_v32  ;;  %v3745_v20 = vpack.c.bf16 %v3707_v44, %v3705_v58  ;;  %v3691_v11 = vmul.f32 %v8138_v37, %v8037_v23 }
 0xadd   : > { %v3665_v39 = vmul.f32 %v8138_v37, %v7962_v21  ;;  %v3685_v18 = vmul.f32 %v8138_v37, %v8022_v13  ;;  %v3667_v45 = vmul.f32 %v8138_v37, %v7970_v9  ;;  %v3697_v35 = vmul.f32 %v8138_v37, %v8058_v33 }
 0xade   : > { %v3737_v63 = vpack.c.bf16 %v3691_v11, %v3689_v43  ;;  %v3687_v55 = vmul.f32 %v8138_v37, %v8027_v41  ;;  %v3743_v52 = vpack.c.bf16 %v3703_v61, %v3701_v10  ;;  %v3699_v23 = vmul.f32 %v8138_v37, %v8061_v40  ;;  %v8796_v11 = vld [vmem:[#allocation20_spill] sm:$0xff] }
 0xadf   : > { %v3681_v21 = vmul.f32 %v8138_v37, %v8012_v8  ;;  %v3683_v13 = vmul.f32 %v8138_v37, %v8017_v53  ;;  %v3725_v29 = vpack.c.bf16 %v3667_v45, %v3665_v39  ;;  %v3661_v33 = vmul.f32 %v8138_v37, %v7946_v30  ;;  %v8783_v53 = vld [vmem:[#allocation61_spill] sm:$0xff]  ;;  %v8787_v30 = vld [vmem:[#allocation54_spill] sm:$0xff]  ;;  %v8799_v45 = vld [vmem:[#allocation31_spill] sm:$0xff] }
 0xae0   : > { %3787 = vmatpush.bf16.msra.mxu0 %v3729_v34  ;;  %3806 = vmatpush.bf16.msra.mxu1 %v3745_v20  ;;  %v3735_v22 = vpack.c.bf16 %v3687_v55, %v3685_v18  ;;  %v3663_v41 = vmul.f32 %v8138_v37, %v8782_v19  ;;  %v3741_v60 = vpack.c.bf16 %v3699_v23, %v3697_v35  ;;  %v8794_v20 = vld [vmem:[#allocation13_spill] sm:$0xff]  ;;  %v8797_v39 = vld [vmem:[#allocation18_spill] sm:$0xff] }
 0xae1   : > { %v3733_v9 = vpack.c.bf16 %v3683_v13, %v3681_v21  ;;  %v3693_v40 = vmul.f32 %v8138_v37, %v8046_v12  ;;  %v3695_v8 = vmul.f32 %v8138_v37, %v8051_v59  ;;  %v3714_v17 = vpack.c.bf16 %v8784_v2, %v8783_v53  ;;  %v8789_v59 = vld [vmem:[#allocation51_spill] sm:$0xff]  ;;  %v8800_v35 = vld [vmem:[#allocation30_spill] sm:$0xff]  ;;  %v8802_v23 = vld [vmem:[#allocation29_spill] sm:$0xff] }
 0xae2   : > { %v3723_v7 = vpack.c.bf16 %v3663_v41, %v3661_v33  ;;  %v3657_v27 = vmul.f32 %v8138_v37, %v8787_v30  ;;  %v3659_v3 = vmul.f32 %v8138_v37, %v8788_v54  ;;  %v3653_v31 = vmul.f32 %v8138_v37, %v8789_v59  ;;  %v8803_v21 = vld [vmem:[#allocation38_spill] sm:$0xff]  ;;  %v8808_v41 = vld [vmem:[#allocation49_spill] sm:$0xff]  ;;  %v8812_v30 = vld [vmem:[#allocation11_spill] sm:$0xff] }
 0xae3   : > { %v3739_v57 = vpack.c.bf16 %v3695_v8, %v3693_v40  ;;  %3761 = vmatmul.bf16.gmra.mxu0 %v3714_v17  ;;  %v3655_v51 = vmul.f32 %v8138_v37, %v8790_v16  ;;  %v3649_v62 = vmul.f32 %v8138_v37, %v8791_v56  ;;  %v3651_v0 = vmul.f32 %v8138_v37, %v8792_v24  ;;  %v4341_v2 = vld [vmem:[%s8310_s2] sm:$0xff]  ;;  %v4342_v54 = vld [vmem:[%s8310_s2 + $0x8] sm:$0xff]  ;;  %v8820_v24 = vld [vmem:[#allocation72_spill] sm:$0xff] }
 0xae4   : > { %3788 = vmatpush.bf16.msra.mxu0 %v3727_v49  ;;  %3807 = vmatpush.bf16.msra.mxu1 %v3743_v52  ;;  %v3721_v12 = vpack.c.bf16 %v3659_v3, %v3657_v27  ;;  %v8798_v18 = vpack.c.bf16 %v8796_v11, %v8797_v39  ;;  %v8804_v13 = vpack.c.bf16 %v8802_v23, %v8803_v21  ;;  %v8814_v3 = vld [vmem:[#allocation16_spill] sm:$0xff]  ;;  %v3844_v59 = vld [vmem:[%s8311_s3] sm:$0xff]  ;;  %v4985_v56 = vmov 0  }
 0xae5   : > { %3780 = vmatmul.bf16.gmra.mxu1 %v3715_v47  ;;  %v3719_v50 = vpack.c.bf16 %v3655_v51, %v3653_v31  ;;  %v3717_v46 = vpack.c.bf16 %v3651_v0, %v3649_v62  ;;  %v3846_v31 = vld [vmem:[%s8311_s3 + $0x10] sm:$0xff]  ;;  %v8817_v16 = vld [vmem:[#allocation65_spill] sm:$0xff]  ;;  %4390 = vset.pattern.permute.xlu1 %v4985_v56  ;;  %v3845_v62 = vld [vmem:[%s8311_s3 + $0x8] sm:$0xff] }
 0xae6   : > { %v8818_v51 = vld [vmem:[#allocation35_spill] sm:$0xff]  ;;  %3850 = vperm.xlu1 %4390, %v3844_v59   ;;  %4392 = vset.pattern.permute.xlu0 %v4985_v56  ;;  %v8821_v0 = vld [vmem:[#allocation69_spill] sm:$0xff] }
 0xae7   : > { %3860 = vperm.xlu0 %4392, %v3846_v31   ;;  %4391 = vset.pattern.permute.xlu2 %v4985_v56 }
 0xae8   : > { %3789 = vmatpush.bf16.msra.mxu0 %v3725_v29  ;;  %3808 = vmatpush.bf16.msra.mxu1 %v3741_v60  ;;  %v8809_v60 = vld [vmem:[#allocation75_spill] sm:$0xff] }
 0xae9   : > { %v8810_v40 = vpack.c.bf16 %v8808_v41, %v8809_v60  ;;  %3855 = vperm.xlu2 %4391, %v3845_v62  }
 0xaec   : > { %3790 = vmatpush.bf16.msra.mxu0 %v3723_v7  ;;  %3809 = vmatpush.bf16.msra.mxu1 %v3739_v57  ;;  %v8811_v7 = vld [vmem:[#allocation45_spill] sm:$0xff]  ;;  %v8815_v57 = vld [vmem:[#allocation14_spill] sm:$0xff] }
 0xaed   : > { %v8813_v27 = vpack.c.bf16 %v8811_v7, %v8812_v30 }
 0xaf0   : > { %3791 = vmatpush.bf16.msra.mxu0 %v3721_v12  ;;  %3810 = vmatpush.bf16.msra.mxu1 %v3737_v63  ;;  %v8801_v63 = vpack.c.bf16 %v8799_v45, %v8800_v35  ;;  %v8816_v12 = vpack.c.bf16 %v8814_v3, %v8815_v57 }
 0xaf4   : > { %3792 = vmatpush.bf16.msra.mxu0 %v3719_v50  ;;  %3811 = vmatpush.bf16.msra.mxu1 %v3735_v22  ;;  %v8805_v22 = vld [vmem:[#allocation76_spill] sm:$0xff]  ;;  %v8819_v50 = vpack.c.bf16 %v8817_v16, %v8818_v51 }
 0xaf8   : > { %3793 = vmatpush.bf16.msra.mxu0 %v3717_v46  ;;  %3812 = vmatpush.bf16.msra.mxu1 %v3733_v9  ;;  %v8806_v9 = vld [vmem:[#allocation56_spill] sm:$0xff]  ;;  %v8822_v46 = vpack.c.bf16 %v8820_v24, %v8821_v0 }
 0xaf9   : > { %v8807_v29 = vpack.c.bf16 %v8805_v22, %v8806_v9 }
 0xafb   : > { %3794 = vmatmul.bf16.vlgmr.msra.gmra.mxu0 %v8142_v1  ;;  %3813 = vmatmul.bf16.vlgmr.msra.gmra.mxu1 %v8151_v48  ;;  %v8793_v48 = vld [vmem:[#allocation15_spill] sm:$0xff] }
 0xafc   : > { %v8795_v10 = vpack.c.bf16 %v8793_v48, %v8794_v20 }
 0xb0b   : > { %3799 = vmatmul.bf16.gmra.mxu0 %v3714_v17  ;;  %3818 = vmatmul.bf16.gmra.mxu1 %v3715_v47 }
 0xb50   : > { %v3757_v36 = vpop.f32.mrf.mxu0 }
 0xb51   : > { %v3776_v25 = vpop.f32.mrf.mxu1 }
 0xb52   : > { %v3777_v34 = vadd.f32 %v3776_v25, %v3757_v36  ;;  %v3847_v36 = vld [vmem:[%s8311_s3 + $0x18] sm:$0xff]  ;;  %v8823_v25 = vld [vmem:[#allocation71_spill] sm:$0xff] }
 0xb53   : > { %3865 = vperm.xlu1 %4390, %v3847_v36  }
 0xb58   : > { %v3759_v14 = vpop.f32.mrf.mxu0 }
 0xb59   : > { %v3778_v28 = vpop.f32.mrf.mxu1 }
 0xb5a   : > { %v3779_v38 = vadd.f32 %v3778_v28, %v3759_v14  ;;  %v8824_v14 = vld [vmem:[#allocation70_spill] sm:$0xff] }
 0xb5b   : > { %v8825_v28 = vpack.c.bf16 %v8823_v25, %v8824_v14 }
 0xb5c   : > { %v3836_v44 = vpack.c.bf16 %v3779_v38, %v3777_v34 }
 0xb60   : > { %v3762_v26 = vpop.f32.mrf.mxu0 }
 0xb62   : > { %v3781_v42 = vpop.f32.mrf.mxu1 }
 0xb63   : > { %v3782_v37 = vadd.f32 %v3781_v42, %v3762_v26  ;;  %v8826_v26 = vld [vmem:[#allocation37_spill] sm:$0xff]  ;;  %v8827_v42 = vld [vmem:[#allocation74_spill] sm:$0xff] }
 0xb68   : > { %v3764_v4 = vpop.f32.mrf.mxu0 }
 0xb6a   : > { %v3783_v58 = vpop.f32.mrf.mxu1 }
 0xb6b   : > { %v3784_v15 = vadd.f32 %v3783_v58, %v3764_v4  ;;  %v8828_v4 = vpack.c.bf16 %v8826_v26, %v8827_v42 }
 0xb6d   : > { %v3838_v32 = vpack.c.bf16 %v3784_v15, %v3782_v37  ;;  %v3856_v37 = vpop.permute.xlu2 %3855  ;;  %v3851_v15 = vpop.permute.xlu1 %3850 }
 0xb6f   : > { %3880 = vmatpush.bf16.msrb.mxu0 %v3838_v32 }
 0xb73   : > { %3881 = vmatpush.bf16.msrb.mxu0 %v3836_v44 }
 0xb77   : > { %3882 = vmatpush.bf16.msrb.mxu0 %v8795_v10 }
 0xb78   : > { %v3795_v1 = vpop.f32.mrf.mxu0  ;;  %v3814_v49 = vpop.f32.mrf.mxu1 }
 0xb79   : > { %v3815_v5 = vadd.f32 %v3814_v49, %v3795_v1  ;;  %v3861_v1 = vpop.permute.xlu0 %3860 }
 0xb7b   : > { %3883 = vmatpush.bf16.msrb.mxu0 %v8798_v18 }
 0xb7f   : > { %3884 = vmatpush.bf16.msrb.mxu0 %v8801_v63 }
 0xb80   : > { %v3797_v61 = vpop.f32.mrf.mxu0  ;;  %v3816_v43 = vpop.f32.mrf.mxu1 }
 0xb81   : > { %v3817_v17 = vadd.f32 %v3816_v43, %v3797_v61 }
 0xb83   : > { %3885 = vmatpush.bf16.msrb.mxu0 %v8804_v13  ;;  %v3837_v47 = vpack.c.bf16 %v3817_v17, %v3815_v5 }
 0xb87   : > { %3886 = vmatpush.bf16.msrb.mxu0 %v8807_v29 }
 0xb88   : > { %v3800_v55 = vpop.f32.mrf.mxu0  ;;  %v3819_v52 = vpop.f32.mrf.mxu1 }
 0xb89   : > { %v3820_v8 = vadd.f32 %v3819_v52, %v3800_v55 }
 0xb8b   : > { %3887 = vmatpush.bf16.msrb.mxu0 %v8810_v40 }
 0xb8e   : > { %3888 = vmatmul.bf16.vlgmr.msrb.gmra.mxu0 %v4341_v2 }
 0xb90   : > { %v3802_v33 = vpop.f32.mrf.mxu0  ;;  %v3821_v19 = vpop.f32.mrf.mxu1 }
 0xb91   : > { %v3822_v53 = vadd.f32 %v3821_v19, %v3802_v33 }
 0xb93   : > { %v3839_v6 = vpack.c.bf16 %v3822_v53, %v3820_v8 }
 0xb95   : > { %3899 = vmatpush.bf16.msrb.mxu1 %v3839_v6 }
 0xb99   : > { %3900 = vmatpush.bf16.msrb.mxu1 %v3837_v47 }
 0xb9d   : > { %3901 = vmatpush.bf16.msrb.mxu1 %v8813_v27 }
 0xb9e   : > { %3893 = vmatmul.bf16.gmra.mxu0 %v4342_v54 }
 0xba1   : > { %3902 = vmatpush.bf16.msrb.mxu1 %v8816_v12 }
 0xba5   : > { %3903 = vmatpush.bf16.msrb.mxu1 %v8819_v50 }
 0xba9   : > { %3904 = vmatpush.bf16.msrb.mxu1 %v8822_v46 }
 0xbad   : > { %3905 = vmatpush.bf16.msrb.mxu1 %v8825_v28 }
 0xbb1   : > { %3906 = vmatpush.bf16.msrb.mxu1 %v8828_v4 }
 0xbb4   : > { %3907 = vmatmul.bf16.vlgmr.msrb.gmra.mxu1 %v4341_v2 }
 0xbc4   : > { %3912 = vmatmul.bf16.gmra.mxu1 %v4342_v54 }
 0xbc5   : > { %v3866_v48 = vpop.permute.xlu1 %3865 }
 0xc0b   : > { %v3889_v58 = vpop.f32.mrf.mxu0 }
 0xc0c   : > { %v3890_v32 = vadd.f32 %v3889_v58, %v3851_v15 }
 0xc0e   : > { %3918 = vst [vmem:[%s190_s23] sm:$0xff] %v3890_v32 }
 0xc13   : > { %v3891_v38 = vpop.f32.mrf.mxu0 }
 0xc14   : > { %v3892_v34 = vadd.f32 %v3891_v38, %v3856_v37 }
 0xc16   : > { %3920 = vst [vmem:[%s190_s23 + $0x10] sm:$0xff] %v3892_v34 }
 0xc1b   : > { %v3894_v44 = vpop.f32.mrf.mxu0 }
 0xc1c   : > { %v3895_v49 = vadd.f32 %v3894_v44, %v3861_v1 }
 0xc1e   : > { %3922 = vst [vmem:[%s190_s23 + $0x20] sm:$0xff] %v3895_v49 }
 0xc23   : > { %v3896_v20 = vpop.f32.mrf.mxu0 }
 0xc24   : > { %v3897_v10 = vadd.f32 %v3896_v20, %v3866_v48 }
 0xc26   : > { %3924 = vst [vmem:[%s190_s23 + $0x30] sm:$0xff] %v3897_v10 }
 0xc31   : > { %v3908_v61 = vpop.f32.mrf.mxu1 }
 0xc32   : > { %v3909_v43 = vadd.f32 %v3908_v61, %v3851_v15 }
 0xc34   : > { %3919 = vst [vmem:[%s190_s23 + $0x8] sm:$0xff] %v3909_v43 }
 0xc39   : > { %v3910_v11 = vpop.f32.mrf.mxu1 }
 0xc3a   : > { %v3911_v39 = vadd.f32 %v3910_v11, %v3856_v37 }
 0xc3c   : > { %3921 = vst [vmem:[%s190_s23 + $0x18] sm:$0xff] %v3911_v39 }
 0xc41   : > { %v3913_v18 = vpop.f32.mrf.mxu1 }
 0xc42   : > { %v3914_v45 = vadd.f32 %v3913_v18, %v3861_v1 }
 0xc44   : > { %3923 = vst [vmem:[%s190_s23 + $0x28] sm:$0xff] %v3914_v45 }
 0xc49   : > { %v3915_v35 = vpop.f32.mrf.mxu1 }
 0xc4a   : > { %v3916_v63 = vadd.f32 %v3915_v35, %v3866_v48 }
 0xc4c   : > { %3925 = vst [vmem:[%s190_s23 + $0x38] sm:$0xff] %v3916_v63 }
 0xc4d   : > { %4948 = shalt.err (!%p4945_p3)
}
 0xc4e   : > { %s4986_s14 = smov 256   ;;  %s4987_s20 = smov 16  }
 0xc4f   : > { %4348 = dma.vmem_to_hbm [thread:$0]  (%p5051_p5), %s3940_s5, 1024, %s3942_s6, %s3927_s7, %s4986_s14, %s4986_s14, %s4987_s20  }
 0xc50 PF: > { %p4354_p4 = scmp.ge.s32.totalorder %s4983_s18, 2  ;;  %s3956_s22 = sand.u32 1, %s4971_s15  }
 0xc51   : > { %s3957_s23 = scalar_lea.sflag [#allocation3], %s3956_s22 }
 0xc52   : > { %p4351_p7 = pnand %p4354_p4, %p5055_p6 }
 0xc54   : > { %p4352_p8 = pneg %p4351_p7 }
 0xc56   : > { %4966 = dma.done.wait (%p4352_p8), %s3957_s23, 1024  }
 0xc57   : > { %4968 = vsyncadd (%p4352_p8), %s3957_s23, 4294966272  ;;  %p14_p9 = scmp.ge.s32.totalorder %s5038_s21, 4   ;;  %s8829_s15 = smov %s4975_s16 }
 0xc58   : > { %s8830_s16 = smov %s4979_s17  ;;  %s8831_s17 = smov %s5049_s24 }
 0xc59   : > { %s8832_s18 = smov %s5038_s21  ;;  %16 = sbr.rel (!%p14_p9) target bundleno = 3 (0x3), region = 71 }
 0xc5e   :  { %3963 = vsyncpa [#allocation3], 1 }
 0xc5f   :  { %3965 = vsyncpa [#allocation3 + $0x1], 1 }

</bundles_post_ra>
